<compile_context>
chip_gen: v5e
topology: v5e:2x2
jax: 0.10.0
libtpu: 0.0.40
codegen_flags: <defaults>
</compile_context>

<pallas_src>
import functools

import jax
import jax.numpy as jnp
from jax.experimental import pallas as pl
from jax.experimental.pallas import tpu as pltpu


_CPARAMS = pltpu.CompilerParams(dimension_semantics=("parallel",))


# ---------------------------------------------------------------------------
# In-kernel helpers.
# ---------------------------------------------------------------------------
def _build_slab(src_ref, slab_ref, K, Cin, Hp, Wp, Lq):
    """im2col in flat-padded-frame layout.

    src_ref : (Cin, P) bf16, P = Dp*Hp*Wp (zero-padded frame per channel).
    slab_ref: (K^3*Cin, Lq) bf16 scratch.  Row tap*Cin + c, column j holds
              src[c, j + off(tap)], so a single (G, K^3*Cin) x (K^3*Cin, Lq)
              GEMM yields every conv output with the spatial dim on lanes.
    """
    for kd in range(K):
        for kh in range(K):
            for kw in range(K):
                tap = (kd * K + kh) * K + kw
                off = (kd * Hp + kh) * Wp + kw
                slab_ref[pl.ds(tap * Cin, Cin), :] = src_ref[:, pl.ds(off, Lq)]


def _masked_moments(acc, mask, st_ref):
    """Per-channel (sum, sum-of-squares) over the valid GEMM columns."""
    st_ref[:, pl.ds(0, 1)] = jnp.sum(acc * mask, axis=1, keepdims=True)
    st_ref[:, pl.ds(1, 1)] = jnp.sum(acc * acc * mask, axis=1, keepdims=True)


# ---------------------------------------------------------------------------
# Pass 1: fused conv1 (3x3x3) + conv3 (1x1x1) GEMM -> pre-BN u13 + moments.
# ---------------------------------------------------------------------------
def _pass1_kernel(xf_ref, w13t_ref, mask_ref, u13_ref, st_ref, slab_ref,
                  *, K, Cin, Hp, Wp, Lq):
    _build_slab(xf_ref, slab_ref, K, Cin, Hp, Wp, Lq)
    acc = jnp.dot(w13t_ref[...], slab_ref[...],
                  preferred_element_type=jnp.float32)      # (2C, Lq)
    u13_ref[...] = acc
    _masked_moments(acc, mask_ref[...], st_ref)


# ---------------------------------------------------------------------------
# Pass 2: bn1 + relu (from stored u1) -> conv2 GEMM -> pre-BN u2 + moments.
# ---------------------------------------------------------------------------
def _pass2_kernel(u1_ref, w2t_ref, bn1_ref, mask_ref, u2_ref, st_ref,
                  frame_ref, slab_ref, *, K, C, Hp, Wp, Lq, P, Q0):
    m = mask_ref[...]                                      # (1, Lq)
    sc = bn1_ref[:, pl.ds(0, 1)]                           # (C, 1)
    sh = bn1_ref[:, pl.ds(1, 1)]
    # Masked so garbage columns / halo positions feed conv2 as exact zeros.
    y1 = jnp.maximum(u1_ref[...] * sc + sh, 0.0) * m
    # Keep only the halo shell zeroed each step (cheap: 222 of 1000 bf16
    # lanes) -- safe even when the parallel N axis is sharded across cores,
    # unlike a one-time program_id==0 zero of a per-core scratch buffer.
    frame_ref[:, pl.ds(0, Q0)] = jnp.zeros((C, Q0), jnp.bfloat16)
    if P - Q0 - Lq > 0:
        frame_ref[:, pl.ds(Q0 + Lq, P - Q0 - Lq)] = jnp.zeros(
            (C, P - Q0 - Lq), jnp.bfloat16)
    frame_ref[:, pl.ds(Q0, Lq)] = y1.astype(jnp.bfloat16)  # cast ONCE
    _build_slab(frame_ref, slab_ref, K, C, Hp, Wp, Lq)
    acc = jnp.dot(w2t_ref[...], slab_ref[...],
                  preferred_element_type=jnp.float32)      # (C, Lq)
    u2_ref[...] = acc
    _masked_moments(acc, m, st_ref)


# ---------------------------------------------------------------------------
# Pass 3: pure elementwise finalize: relu(bn2(u2)) + relu(bn3(u3)).
# ---------------------------------------------------------------------------
def _pass3_kernel(u2_ref, u3_ref, bn_ref, out_ref):
    sc2 = bn_ref[:, pl.ds(0, 1)]
    sh2 = bn_ref[:, pl.ds(1, 1)]
    sc3 = bn_ref[:, pl.ds(2, 1)]
    sh3 = bn_ref[:, pl.ds(3, 1)]
    y2 = jnp.maximum(u2_ref[...] * sc2 + sh2, 0.0)
    z = jnp.maximum(u3_ref[...] * sc3 + sh3, 0.0)
    out_ref[...] = y2 + z


# ---------------------------------------------------------------------------
# pallas_call wrappers.
# ---------------------------------------------------------------------------
def _bcast_spec(shape):
    nd = len(shape)
    return pl.BlockSpec(shape, lambda n: (0,) * nd)


def _pass1(xf, w13t, mask, *, K, Cin, C, Hp, Wp, Lq):
    N, _, P = xf.shape
    kern = functools.partial(_pass1_kernel, K=K, Cin=Cin, Hp=Hp, Wp=Wp, Lq=Lq)
    return pl.pallas_call(
        kern,
        out_shape=(jax.ShapeDtypeStruct((N, 2 * C, Lq), jnp.float32),
                   jax.ShapeDtypeStruct((N, 2 * C, 2), jnp.float32)),
        grid=(N,),
        in_specs=[pl.BlockSpec((None, Cin, P), lambda n: (n, 0, 0)),
                  _bcast_spec(w13t.shape), _bcast_spec(mask.shape)],
        out_specs=(pl.BlockSpec((None, 2 * C, Lq), lambda n: (n, 0, 0)),
                   pl.BlockSpec((None, 2 * C, 2), lambda n: (n, 0, 0))),
        scratch_shapes=[pltpu.VMEM((K ** 3 * Cin, Lq), jnp.bfloat16)],
        compiler_params=_CPARAMS,
    )(xf, w13t, mask)


def _pass2(u13, w2t, bn1, mask, *, K, C, Hp, Wp, Lq, P, Q0):
    N = u13.shape[0]
    kern = functools.partial(_pass2_kernel, K=K, C=C, Hp=Hp, Wp=Wp,
                             Lq=Lq, P=P, Q0=Q0)
    return pl.pallas_call(
        kern,
        out_shape=(jax.ShapeDtypeStruct((N, C, Lq), jnp.float32),
                   jax.ShapeDtypeStruct((N, C, 2), jnp.float32)),
        grid=(N,),
        in_specs=[pl.BlockSpec((None, C, Lq), lambda n: (n, 0, 0)),  # conv1 rows
                  _bcast_spec(w2t.shape), _bcast_spec(bn1.shape),
                  _bcast_spec(mask.shape)],
        out_specs=(pl.BlockSpec((None, C, Lq), lambda n: (n, 0, 0)),
                   pl.BlockSpec((None, C, 2), lambda n: (n, 0, 0))),
        scratch_shapes=[pltpu.VMEM((C, P), jnp.bfloat16),            # y1 frame
                        pltpu.VMEM((K ** 3 * C, Lq), jnp.bfloat16)], # slab2
        compiler_params=_CPARAMS,
    )(u13, w2t, bn1, mask)


def _pass3(u2, u13, bn23, *, C, Lq):
    N = u2.shape[0]
    return pl.pallas_call(
        _pass3_kernel,
        out_shape=jax.ShapeDtypeStruct((N, C, Lq), jnp.float32),
        grid=(N,),
        in_specs=[pl.BlockSpec((None, C, Lq), lambda n: (n, 0, 0)),
                  pl.BlockSpec((None, C, Lq), lambda n: (n, 1, 0)),  # conv3 rows
                  _bcast_spec(bn23.shape)],
        out_specs=pl.BlockSpec((None, C, Lq), lambda n: (n, 0, 0)),
        compiler_params=_CPARAMS,
    )(u2, u13, bn23)


# ---------------------------------------------------------------------------
# JAX-side glue: weight packing and BN-statistic folding.
# ---------------------------------------------------------------------------
def _bn_affine(psum, psumsq, count, gamma, beta, eps):
    """Fold training-mode BN (biased batch var) + affine into scale/shift.
    Note: E[x^2]-mean^2 is cancellation-prone if mean^2 >> var at much larger
    scales; fine here (small activations, N*D*H*W = 1024)."""
    mean = jnp.sum(psum, axis=0) / count
    var = jnp.sum(psumsq, axis=0) / count - mean * mean
    scale = gamma * jax.lax.rsqrt(var + eps)
    shift = beta - mean * scale
    return scale, shift


def residual_block(x, params, eps=1e-5):
    """Matches ResidualBlock.forward:
       relu(bn2(conv2(relu(bn1(conv1 x))))) + relu(bn3(conv3 x)).
    x: (N, Cin, D, H, W) float32 (torch NCDHW).  Returns (N, C, D, H, W)."""
    w1, _b1, g1, bt1 = params["conv1"]
    w2, _b2, g2, bt2 = params["conv2"]
    w3, _b3, g3, bt3 = params["conv3"]
    # Conv biases are dropped: they cancel exactly under training-mode BN.
    N, Cin, D, H, W = x.shape
    K = w1.shape[0]
    C = w1.shape[-1]
    pad = (K - 1) // 2
    Dp, Hp, Wp = D + 2 * pad, H + 2 * pad, W + 2 * pad
    P = Dp * Hp * Wp
    Q0 = (pad * Hp + pad) * Wp + pad            # centre-tap / first-output offset
    Lq = ((D - 1) * Hp + (H - 1)) * Wp + W      # GEMM column count (lane dim)
    cnt = N * D * H * W

    # Pad + flatten per-channel frames; cast to bf16 ONCE (shared by passes).
    xf = jnp.pad(x, ((0, 0), (0, 0), (pad, pad), (pad, pad), (pad, pad)))
    xf = xf.reshape(N, Cin, P).astype(jnp.bfloat16)

    # Transposed column weights so the GEMM output is (Cout, Lq): M on lanes.
    w1t = jnp.transpose(w1, (4, 0, 1, 2, 3)).reshape(C, K ** 3 * Cin)
    ctr = ((K // 2) * K + K // 2) * K + K // 2
    w3t = jnp.zeros((C, K ** 3 * Cin), w1.dtype)
    w3t = w3t.at[:, ctr * Cin:(ctr + 1) * Cin].set(w3.reshape(Cin, C).T)
    w13t = jnp.concatenate([w1t, w3t], axis=0).astype(jnp.bfloat16)  # (2C, 27Cin)
    w2t = jnp.transpose(w2, (4, 0, 1, 2, 3)).reshape(C, K ** 3 * C)
    w2t = w2t.astype(jnp.bfloat16)                                   # (C, 27C)

    # Validity mask over GEMM columns (flat-frame trick leaves garbage where
    # h/w land in the halo: excluded from stats, zeroed before conv2).
    jj = jnp.arange(Lq) + Q0
    df = jj // (Hp * Wp)
    rem = jj % (Hp * Wp)
    hf = rem // Wp
    wf = rem % Wp
    valid = ((df >= pad) & (df < pad + D) & (hf >= pad) & (hf < pad + H)
             & (wf >= pad) & (wf < pad + W))
    mask = valid.astype(jnp.float32)[None, :]                        # (1, Lq)

    # Pass 1: conv1+conv3 fused GEMM -> pre-BN activations + batch moments.
    u13, st13 = _pass1(xf, w13t, mask, K=K, Cin=Cin, C=C, Hp=Hp, Wp=Wp, Lq=Lq)
    sc1, sh1 = _bn_affine(st13[:, :C, 0], st13[:, :C, 1], cnt, g1, bt1, eps)
    sc3, sh3 = _bn_affine(st13[:, C:, 0], st13[:, C:, 1], cnt, g3, bt3, eps)

    # Pass 2: bn1+relu (from stored u1) -> conv2 GEMM -> pre-BN u2 + moments.
    bn1 = jnp.stack([sc1, sh1], axis=1).astype(jnp.float32)          # (C, 2)
    u2, st2 = _pass2(u13, w2t, bn1, mask, K=K, C=C, Hp=Hp, Wp=Wp,
                     Lq=Lq, P=P, Q0=Q0)
    sc2, sh2 = _bn_affine(st2[:, :, 0], st2[:, :, 1], cnt, g2, bt2, eps)

    # Pass 3: pure elementwise finalize (no GEMMs).
    bn23 = jnp.stack([sc2, sh2, sc3, sh3], axis=1).astype(jnp.float32)  # (C, 4)
    out_q = _pass3(u2, u13, bn23, C=C, Lq=Lq)                        # (N, C, Lq)

    # Extract the valid columns back to NCDHW (tiny lane-dense slice).
    out_full = jnp.pad(out_q, ((0, 0), (0, 0), (0, D * Hp * Wp - Lq)))
    return out_full.reshape(N, C, D, Hp, Wp)[:, :, :, :H, :W]


# ---------------------------------------------------------------------------
# Pure-JAX reference (torch math; optional bf16 matmul operands to mirror the
# kernel's MXU precision).  Channels-last internally for clarity.
# ---------------------------------------------------------------------------
def _ref_conv_bn_relu(x, w, b, gamma, beta, eps=1e-5, matmul_dtype=None):
    N, D, H, W, Cin = x.shape
    K = w.shape[0]
    Cout = w.shape[-1]
    pad = (K - 1) // 2
    xp = jnp.pad(x, ((0, 0), (pad, pad), (pad, pad), (pad, pad), (0, 0)))
    if matmul_dtype is not None:
        xp = xp.astype(matmul_dtype)
        w = w.astype(matmul_dtype)
    acc = jnp.zeros((N, D, H, W, Cout), jnp.float32)
    for kd in range(K):
        for kh in range(K):
            for kw in range(K):
                xs = xp[:, kd:kd + D, kh:kh + H, kw:kw + W, :]
                acc = acc + jnp.einsum(
                    "ndhwc,co->ndhwo", xs, w[kd, kh, kw],
                    preferred_element_type=jnp.float32,
                    precision=jax.lax.Precision.HIGHEST)
    acc = acc + b
    mean = acc.mean(axis=(0, 1, 2, 3), keepdims=True)
    var = ((acc - mean) ** 2).mean(axis=(0, 1, 2, 3), keepdims=True)
    y = (acc - mean) * jax.lax.rsqrt(var + eps) * gamma + beta
    return jnp.maximum(y, 0.0)


def _ref_residual_block(x_cl, params, matmul_dtype=None):
    w1, b1, g1, bt1 = params["conv1"]
    w2, b2, g2, bt2 = params["conv2"]
    w3, b3, g3, bt3 = params["conv3"]
    z = _ref_conv_bn_relu(x_cl, w3, b3, g3, bt3, matmul_dtype=matmul_dtype)
    y = _ref_conv_bn_relu(x_cl, w1, b1, g1, bt1, matmul_dtype=matmul_dtype)
    y = _ref_conv_bn_relu(y, w2, b2, g2, bt2, matmul_dtype=matmul_dtype)
    return y + z


def _init_conv(key, cin, cout, k):
    """PyTorch-style init on torch weight shapes, transposed to (K,K,K,Cin,Cout)."""
    kw_, kb_ = jax.random.split(key)
    fan_in = cin * k ** 3
    bound = 1.0 / (fan_in ** 0.5)
    w = jax.random.uniform(kw_, (cout, cin, k, k, k), jnp.float32, -bound, bound)
    b = jax.random.uniform(kb_, (cout,), jnp.float32, -bound, bound)
    w_t = jnp.transpose(w, (2, 3, 4, 1, 0))  # (K, K, K, Cin, Cout)
    gamma = jnp.ones((cout,), jnp.float32)   # BatchNorm3d defaults
    beta = jnp.zeros((cout,), jnp.float32)
    return w_t, b, gamma, beta


if __name__ == "__main__":
    N, Cin, Cout, D, H, W = 2, 4, 8, 8, 8, 8

    key = jax.random.PRNGKey(0)
    kx, k1, k2, k3 = jax.random.split(key, 4)

    x = jax.random.normal(kx, (N, Cin, D, H, W), jnp.float32)  # torch NCDHW
    params = {
        "conv1": _init_conv(k1, Cin, Cout, 3),
        "conv2": _init_conv(k2, Cout, Cout, 3),
        "conv3": _init_conv(k3, Cin, Cout, 1),
    }

    out = jax.jit(residual_block)(x, params)
    out = jax.block_until_ready(out)

    assert out.shape == (N, Cout, D, H, W), out.shape
    assert bool(jnp.all(jnp.isfinite(out)))

    x_cl = jnp.transpose(x, (0, 2, 3, 4, 1))
    # Check 1: reference with bf16 conv operands (validates kernel logic; the
    # biases included there cancel under training-mode BN as expected).
    ref_bf16 = jnp.transpose(
        _ref_residual_block(x_cl, params, matmul_dtype=jnp.bfloat16),
        (0, 4, 1, 2, 3))
    err_bf16 = float(jnp.max(jnp.abs(out - ref_bf16)))
    assert bool(jnp.allclose(out, ref_bf16, atol=1e-2, rtol=1e-2)), err_bf16

    # Check 2: full-f32 torch-equivalent math (bf16 MXU inputs loosen the tol).
    ref_f32 = jnp.transpose(_ref_residual_block(x_cl, params), (0, 4, 1, 2, 3))
    err_f32 = float(jnp.max(jnp.abs(out - ref_f32)))
    assert bool(jnp.allclose(out, ref_f32, atol=1e-1, rtol=1e-1)), err_f32

    print("KERNEL_OK")
</pallas_src>

<mosaic_0001>
module attributes {stable_mosaic.version = 11 : i64} {
  func.func @_pass1_kernel(%arg0: i32, %arg1: memref<1x4x1000xbf16, #tpu.memory_space<vmem>>, %arg2: memref<16x108xbf16, #tpu.memory_space<vmem>>, %arg3: memref<1x778xf32, #tpu.memory_space<vmem>>, %arg4: memref<1x16x778xf32, #tpu.memory_space<vmem>>, %arg5: memref<1x16x2xf32, #tpu.memory_space<vmem>>, %arg6: memref<108x778xbf16, #tpu.memory_space<vmem>>) attributes {dimension_semantics = [#tpu.dimension_semantics<parallel>], iteration_bounds = array<i64: 2>, scalar_prefetch = 0 : i64, scratch_operands = 1 : i64, tpu.core_type = #tpu.core_type<tc>, window_params = [{transform_indices = @transform_0, window_bounds = array<i64: 1, 4, 1000>}, {pipeline_mode = #tpu.pipeline_mode<synchronous>, transform_indices = @transform_1, window_bounds = array<i64: 16, 108>}, {pipeline_mode = #tpu.pipeline_mode<synchronous>, transform_indices = @transform_2, window_bounds = array<i64: 1, 778>}, {transform_indices = @transform_3, window_bounds = array<i64: 1, 16, 778>}, {transform_indices = @transform_4, window_bounds = array<i64: 1, 16, 2>}]} {
    %c0 = arith.constant 0 : index
    %c0_0 = arith.constant 0 : index
    %c0_1 = arith.constant 0 : index
    %0 = vector.load %arg1[%c0, %c0_0, %c0_1] : memref<1x4x1000xbf16, #tpu.memory_space<vmem>>, vector<1x4x778xbf16>
    %1 = vector.shape_cast %0 : vector<1x4x778xbf16> to vector<4x778xbf16>
    %c0_2 = arith.constant 0 : index
    %c0_3 = arith.constant 0 : index
    %2 = vector.load %arg6[%c0_2, %c0_3] : memref<108x778xbf16, #tpu.memory_space<vmem>>, vector<4x778xbf16>
    tpu.vector_store %arg6[%c0_2, %c0_3], %1 {strides = array<i32>} : memref<108x778xbf16, #tpu.memory_space<vmem>>, vector<4x778xbf16>,
    %c0_4 = arith.constant 0 : index
    %c0_5 = arith.constant 0 : index
    %c1 = arith.constant 1 : index
    %3 = vector.load %arg1[%c0_4, %c0_5, %c1] : memref<1x4x1000xbf16, #tpu.memory_space<vmem>>, vector<1x4x778xbf16>
    %4 = vector.shape_cast %3 : vector<1x4x778xbf16> to vector<4x778xbf16>
    %c4 = arith.constant 4 : index
    %c0_6 = arith.constant 0 : index
    %5 = vector.load %arg6[%c4, %c0_6] : memref<108x778xbf16, #tpu.memory_space<vmem>>, vector<4x778xbf16>
    tpu.vector_store %arg6[%c4, %c0_6], %4 {strides = array<i32>} : memref<108x778xbf16, #tpu.memory_space<vmem>>, vector<4x778xbf16>,
    %c0_7 = arith.constant 0 : index
    %c0_8 = arith.constant 0 : index
    %c2 = arith.constant 2 : index
    %6 = vector.load %arg1[%c0_7, %c0_8, %c2] : memref<1x4x1000xbf16, #tpu.memory_space<vmem>>, vector<1x4x778xbf16>
    %7 = vector.shape_cast %6 : vector<1x4x778xbf16> to vector<4x778xbf16>
    %c8 = arith.constant 8 : index
    %c0_9 = arith.constant 0 : index
    %8 = vector.load %arg6[%c8, %c0_9] : memref<108x778xbf16, #tpu.memory_space<vmem>>, vector<4x778xbf16>
    tpu.vector_store %arg6[%c8, %c0_9], %7 {strides = array<i32>} : memref<108x778xbf16, #tpu.memory_space<vmem>>, vector<4x778xbf16>,
    %c0_10 = arith.constant 0 : index
    %c0_11 = arith.constant 0 : index
    %c10 = arith.constant 10 : index
    %9 = vector.load %arg1[%c0_10, %c0_11, %c10] : memref<1x4x1000xbf16, #tpu.memory_space<vmem>>, vector<1x4x778xbf16>
    %10 = vector.shape_cast %9 : vector<1x4x778xbf16> to vector<4x778xbf16>
    %c12 = arith.constant 12 : index
    %c0_12 = arith.constant 0 : index
    %11 = vector.load %arg6[%c12, %c0_12] : memref<108x778xbf16, #tpu.memory_space<vmem>>, vector<4x778xbf16>
    tpu.vector_store %arg6[%c12, %c0_12], %10 {strides = array<i32>} : memref<108x778xbf16, #tpu.memory_space<vmem>>, vector<4x778xbf16>,
    %c0_13 = arith.constant 0 : index
    %c0_14 = arith.constant 0 : index
    %c11 = arith.constant 11 : index
    %12 = vector.load %arg1[%c0_13, %c0_14, %c11] : memref<1x4x1000xbf16, #tpu.memory_space<vmem>>, vector<1x4x778xbf16>
    %13 = vector.shape_cast %12 : vector<1x4x778xbf16> to vector<4x778xbf16>
    %c16 = arith.constant 16 : index
    %c0_15 = arith.constant 0 : index
    %14 = vector.load %arg6[%c16, %c0_15] : memref<108x778xbf16, #tpu.memory_space<vmem>>, vector<4x778xbf16>
    tpu.vector_store %arg6[%c16, %c0_15], %13 {strides = array<i32>} : memref<108x778xbf16, #tpu.memory_space<vmem>>, vector<4x778xbf16>,
    %c0_16 = arith.constant 0 : index
    %c0_17 = arith.constant 0 : index
    %c12_18 = arith.constant 12 : index
    %15 = vector.load %arg1[%c0_16, %c0_17, %c12_18] : memref<1x4x1000xbf16, #tpu.memory_space<vmem>>, vector<1x4x778xbf16>
    %16 = vector.shape_cast %15 : vector<1x4x778xbf16> to vector<4x778xbf16>
    %c20 = arith.constant 20 : index
    %c0_19 = arith.constant 0 : index
    %17 = vector.load %arg6[%c20, %c0_19] : memref<108x778xbf16, #tpu.memory_space<vmem>>, vector<4x778xbf16>
    tpu.vector_store %arg6[%c20, %c0_19], %16 {strides = array<i32>} : memref<108x778xbf16, #tpu.memory_space<vmem>>, vector<4x778xbf16>,
    %c0_20 = arith.constant 0 : index
    %c0_21 = arith.constant 0 : index
    %c20_22 = arith.constant 20 : index
    %18 = vector.load %arg1[%c0_20, %c0_21, %c20_22] : memref<1x4x1000xbf16, #tpu.memory_space<vmem>>, vector<1x4x778xbf16>
    %19 = vector.shape_cast %18 : vector<1x4x778xbf16> to vector<4x778xbf16>
    %c24 = arith.constant 24 : index
    %c0_23 = arith.constant 0 : index
    %20 = vector.load %arg6[%c24, %c0_23] : memref<108x778xbf16, #tpu.memory_space<vmem>>, vector<4x778xbf16>
    tpu.vector_store %arg6[%c24, %c0_23], %19 {strides = array<i32>} : memref<108x778xbf16, #tpu.memory_space<vmem>>, vector<4x778xbf16>,
    %c0_24 = arith.constant 0 : index
    %c0_25 = arith.constant 0 : index
    %c21 = arith.constant 21 : index
    %21 = vector.load %arg1[%c0_24, %c0_25, %c21] : memref<1x4x1000xbf16, #tpu.memory_space<vmem>>, vector<1x4x778xbf16>
    %22 = vector.shape_cast %21 : vector<1x4x778xbf16> to vector<4x778xbf16>
    %c28 = arith.constant 28 : index
    %c0_26 = arith.constant 0 : index
    %23 = vector.load %arg6[%c28, %c0_26] : memref<108x778xbf16, #tpu.memory_space<vmem>>, vector<4x778xbf16>
    tpu.vector_store %arg6[%c28, %c0_26], %22 {strides = array<i32>} : memref<108x778xbf16, #tpu.memory_space<vmem>>, vector<4x778xbf16>,
    %c0_27 = arith.constant 0 : index
    %c0_28 = arith.constant 0 : index
    %c22 = arith.constant 22 : index
    %24 = vector.load %arg1[%c0_27, %c0_28, %c22] : memref<1x4x1000xbf16, #tpu.memory_space<vmem>>, vector<1x4x778xbf16>
    %25 = vector.shape_cast %24 : vector<1x4x778xbf16> to vector<4x778xbf16>
    %c32 = arith.constant 32 : index
    %c0_29 = arith.constant 0 : index
    %26 = vector.load %arg6[%c32, %c0_29] : memref<108x778xbf16, #tpu.memory_space<vmem>>, vector<4x778xbf16>
    tpu.vector_store %arg6[%c32, %c0_29], %25 {strides = array<i32>} : memref<108x778xbf16, #tpu.memory_space<vmem>>, vector<4x778xbf16>,
    %c0_30 = arith.constant 0 : index
    %c0_31 = arith.constant 0 : index
    %c100 = arith.constant 100 : index
    %27 = vector.load %arg1[%c0_30, %c0_31, %c100] : memref<1x4x1000xbf16, #tpu.memory_space<vmem>>, vector<1x4x778xbf16>
    %28 = vector.shape_cast %27 : vector<1x4x778xbf16> to vector<4x778xbf16>
    %c36 = arith.constant 36 : index
    %c0_32 = arith.constant 0 : index
    %29 = vector.load %arg6[%c36, %c0_32] : memref<108x778xbf16, #tpu.memory_space<vmem>>, vector<4x778xbf16>
    tpu.vector_store %arg6[%c36, %c0_32], %28 {strides = array<i32>} : memref<108x778xbf16, #tpu.memory_space<vmem>>, vector<4x778xbf16>,
    %c0_33 = arith.constant 0 : index
    %c0_34 = arith.constant 0 : index
    %c101 = arith.constant 101 : index
    %30 = vector.load %arg1[%c0_33, %c0_34, %c101] : memref<1x4x1000xbf16, #tpu.memory_space<vmem>>, vector<1x4x778xbf16>
    %31 = vector.shape_cast %30 : vector<1x4x778xbf16> to vector<4x778xbf16>
    %c40 = arith.constant 40 : index
    %c0_35 = arith.constant 0 : index
    %32 = vector.load %arg6[%c40, %c0_35] : memref<108x778xbf16, #tpu.memory_space<vmem>>, vector<4x778xbf16>
    tpu.vector_store %arg6[%c40, %c0_35], %31 {strides = array<i32>} : memref<108x778xbf16, #tpu.memory_space<vmem>>, vector<4x778xbf16>,
    %c0_36 = arith.constant 0 : index
    %c0_37 = arith.constant 0 : index
    %c102 = arith.constant 102 : index
    %33 = vector.load %arg1[%c0_36, %c0_37, %c102] : memref<1x4x1000xbf16, #tpu.memory_space<vmem>>, vector<1x4x778xbf16>
    %34 = vector.shape_cast %33 : vector<1x4x778xbf16> to vector<4x778xbf16>
    %c44 = arith.constant 44 : index
    %c0_38 = arith.constant 0 : index
    %35 = vector.load %arg6[%c44, %c0_38] : memref<108x778xbf16, #tpu.memory_space<vmem>>, vector<4x778xbf16>
    tpu.vector_store %arg6[%c44, %c0_38], %34 {strides = array<i32>} : memref<108x778xbf16, #tpu.memory_space<vmem>>, vector<4x778xbf16>,
    %c0_39 = arith.constant 0 : index
    %c0_40 = arith.constant 0 : index
    %c110 = arith.constant 110 : index
    %36 = vector.load %arg1[%c0_39, %c0_40, %c110] : memref<1x4x1000xbf16, #tpu.memory_space<vmem>>, vector<1x4x778xbf16>
    %37 = vector.shape_cast %36 : vector<1x4x778xbf16> to vector<4x778xbf16>
    %c48 = arith.constant 48 : index
    %c0_41 = arith.constant 0 : index
    %38 = vector.load %arg6[%c48, %c0_41] : memref<108x778xbf16, #tpu.memory_space<vmem>>, vector<4x778xbf16>
    tpu.vector_store %arg6[%c48, %c0_41], %37 {strides = array<i32>} : memref<108x778xbf16, #tpu.memory_space<vmem>>, vector<4x778xbf16>,
    %c0_42 = arith.constant 0 : index
    %c0_43 = arith.constant 0 : index
    %c111 = arith.constant 111 : index
    %39 = vector.load %arg1[%c0_42, %c0_43, %c111] : memref<1x4x1000xbf16, #tpu.memory_space<vmem>>, vector<1x4x778xbf16>
    %40 = vector.shape_cast %39 : vector<1x4x778xbf16> to vector<4x778xbf16>
    %c52 = arith.constant 52 : index
    %c0_44 = arith.constant 0 : index
    %41 = vector.load %arg6[%c52, %c0_44] : memref<108x778xbf16, #tpu.memory_space<vmem>>, vector<4x778xbf16>
    tpu.vector_store %arg6[%c52, %c0_44], %40 {strides = array<i32>} : memref<108x778xbf16, #tpu.memory_space<vmem>>, vector<4x778xbf16>,
    %c0_45 = arith.constant 0 : index
    %c0_46 = arith.constant 0 : index
    %c112 = arith.constant 112 : index
    %42 = vector.load %arg1[%c0_45, %c0_46, %c112] : memref<1x4x1000xbf16, #tpu.memory_space<vmem>>, vector<1x4x778xbf16>
    %43 = vector.shape_cast %42 : vector<1x4x778xbf16> to vector<4x778xbf16>
    %c56 = arith.constant 56 : index
    %c0_47 = arith.constant 0 : index
    %44 = vector.load %arg6[%c56, %c0_47] : memref<108x778xbf16, #tpu.memory_space<vmem>>, vector<4x778xbf16>
    tpu.vector_store %arg6[%c56, %c0_47], %43 {strides = array<i32>} : memref<108x778xbf16, #tpu.memory_space<vmem>>, vector<4x778xbf16>,
    %c0_48 = arith.constant 0 : index
    %c0_49 = arith.constant 0 : index
    %c120 = arith.constant 120 : index
    %45 = vector.load %arg1[%c0_48, %c0_49, %c120] : memref<1x4x1000xbf16, #tpu.memory_space<vmem>>, vector<1x4x778xbf16>
    %46 = vector.shape_cast %45 : vector<1x4x778xbf16> to vector<4x778xbf16>
    %c60 = arith.constant 60 : index
    %c0_50 = arith.constant 0 : index
    %47 = vector.load %arg6[%c60, %c0_50] : memref<108x778xbf16, #tpu.memory_space<vmem>>, vector<4x778xbf16>
    tpu.vector_store %arg6[%c60, %c0_50], %46 {strides = array<i32>} : memref<108x778xbf16, #tpu.memory_space<vmem>>, vector<4x778xbf16>,
    %c0_51 = arith.constant 0 : index
    %c0_52 = arith.constant 0 : index
    %c121 = arith.constant 121 : index
    %48 = vector.load %arg1[%c0_51, %c0_52, %c121] : memref<1x4x1000xbf16, #tpu.memory_space<vmem>>, vector<1x4x778xbf16>
    %49 = vector.shape_cast %48 : vector<1x4x778xbf16> to vector<4x778xbf16>
    %c64 = arith.constant 64 : index
    %c0_53 = arith.constant 0 : index
    %50 = vector.load %arg6[%c64, %c0_53] : memref<108x778xbf16, #tpu.memory_space<vmem>>, vector<4x778xbf16>
    tpu.vector_store %arg6[%c64, %c0_53], %49 {strides = array<i32>} : memref<108x778xbf16, #tpu.memory_space<vmem>>, vector<4x778xbf16>,
    %c0_54 = arith.constant 0 : index
    %c0_55 = arith.constant 0 : index
    %c122 = arith.constant 122 : index
    %51 = vector.load %arg1[%c0_54, %c0_55, %c122] : memref<1x4x1000xbf16, #tpu.memory_space<vmem>>, vector<1x4x778xbf16>
    %52 = vector.shape_cast %51 : vector<1x4x778xbf16> to vector<4x778xbf16>
    %c68 = arith.constant 68 : index
    %c0_56 = arith.constant 0 : index
    %53 = vector.load %arg6[%c68, %c0_56] : memref<108x778xbf16, #tpu.memory_space<vmem>>, vector<4x778xbf16>
    tpu.vector_store %arg6[%c68, %c0_56], %52 {strides = array<i32>} : memref<108x778xbf16, #tpu.memory_space<vmem>>, vector<4x778xbf16>,
    %c0_57 = arith.constant 0 : index
    %c0_58 = arith.constant 0 : index
    %c200 = arith.constant 200 : index
    %54 = vector.load %arg1[%c0_57, %c0_58, %c200] : memref<1x4x1000xbf16, #tpu.memory_space<vmem>>, vector<1x4x778xbf16>
    %55 = vector.shape_cast %54 : vector<1x4x778xbf16> to vector<4x778xbf16>
    %c72 = arith.constant 72 : index
    %c0_59 = arith.constant 0 : index
    %56 = vector.load %arg6[%c72, %c0_59] : memref<108x778xbf16, #tpu.memory_space<vmem>>, vector<4x778xbf16>
    tpu.vector_store %arg6[%c72, %c0_59], %55 {strides = array<i32>} : memref<108x778xbf16, #tpu.memory_space<vmem>>, vector<4x778xbf16>,
    %c0_60 = arith.constant 0 : index
    %c0_61 = arith.constant 0 : index
    %c201 = arith.constant 201 : index
    %57 = vector.load %arg1[%c0_60, %c0_61, %c201] : memref<1x4x1000xbf16, #tpu.memory_space<vmem>>, vector<1x4x778xbf16>
    %58 = vector.shape_cast %57 : vector<1x4x778xbf16> to vector<4x778xbf16>
    %c76 = arith.constant 76 : index
    %c0_62 = arith.constant 0 : index
    %59 = vector.load %arg6[%c76, %c0_62] : memref<108x778xbf16, #tpu.memory_space<vmem>>, vector<4x778xbf16>
    tpu.vector_store %arg6[%c76, %c0_62], %58 {strides = array<i32>} : memref<108x778xbf16, #tpu.memory_space<vmem>>, vector<4x778xbf16>,
    %c0_63 = arith.constant 0 : index
    %c0_64 = arith.constant 0 : index
    %c202 = arith.constant 202 : index
    %60 = vector.load %arg1[%c0_63, %c0_64, %c202] : memref<1x4x1000xbf16, #tpu.memory_space<vmem>>, vector<1x4x778xbf16>
    %61 = vector.shape_cast %60 : vector<1x4x778xbf16> to vector<4x778xbf16>
    %c80 = arith.constant 80 : index
    %c0_65 = arith.constant 0 : index
    %62 = vector.load %arg6[%c80, %c0_65] : memref<108x778xbf16, #tpu.memory_space<vmem>>, vector<4x778xbf16>
    tpu.vector_store %arg6[%c80, %c0_65], %61 {strides = array<i32>} : memref<108x778xbf16, #tpu.memory_space<vmem>>, vector<4x778xbf16>,
    %c0_66 = arith.constant 0 : index
    %c0_67 = arith.constant 0 : index
    %c210 = arith.constant 210 : index
    %63 = vector.load %arg1[%c0_66, %c0_67, %c210] : memref<1x4x1000xbf16, #tpu.memory_space<vmem>>, vector<1x4x778xbf16>
    %64 = vector.shape_cast %63 : vector<1x4x778xbf16> to vector<4x778xbf16>
    %c84 = arith.constant 84 : index
    %c0_68 = arith.constant 0 : index
    %65 = vector.load %arg6[%c84, %c0_68] : memref<108x778xbf16, #tpu.memory_space<vmem>>, vector<4x778xbf16>
    tpu.vector_store %arg6[%c84, %c0_68], %64 {strides = array<i32>} : memref<108x778xbf16, #tpu.memory_space<vmem>>, vector<4x778xbf16>,
    %c0_69 = arith.constant 0 : index
    %c0_70 = arith.constant 0 : index
    %c211 = arith.constant 211 : index
    %66 = vector.load %arg1[%c0_69, %c0_70, %c211] : memref<1x4x1000xbf16, #tpu.memory_space<vmem>>, vector<1x4x778xbf16>
    %67 = vector.shape_cast %66 : vector<1x4x778xbf16> to vector<4x778xbf16>
    %c88 = arith.constant 88 : index
    %c0_71 = arith.constant 0 : index
    %68 = vector.load %arg6[%c88, %c0_71] : memref<108x778xbf16, #tpu.memory_space<vmem>>, vector<4x778xbf16>
    tpu.vector_store %arg6[%c88, %c0_71], %67 {strides = array<i32>} : memref<108x778xbf16, #tpu.memory_space<vmem>>, vector<4x778xbf16>,
    %c0_72 = arith.constant 0 : index
    %c0_73 = arith.constant 0 : index
    %c212 = arith.constant 212 : index
    %69 = vector.load %arg1[%c0_72, %c0_73, %c212] : memref<1x4x1000xbf16, #tpu.memory_space<vmem>>, vector<1x4x778xbf16>
    %70 = vector.shape_cast %69 : vector<1x4x778xbf16> to vector<4x778xbf16>
    %c92 = arith.constant 92 : index
    %c0_74 = arith.constant 0 : index
    %71 = vector.load %arg6[%c92, %c0_74] : memref<108x778xbf16, #tpu.memory_space<vmem>>, vector<4x778xbf16>
    tpu.vector_store %arg6[%c92, %c0_74], %70 {strides = array<i32>} : memref<108x778xbf16, #tpu.memory_space<vmem>>, vector<4x778xbf16>,
    %c0_75 = arith.constant 0 : index
    %c0_76 = arith.constant 0 : index
    %c220 = arith.constant 220 : index
    %72 = vector.load %arg1[%c0_75, %c0_76, %c220] : memref<1x4x1000xbf16, #tpu.memory_space<vmem>>, vector<1x4x778xbf16>
    %73 = vector.shape_cast %72 : vector<1x4x778xbf16> to vector<4x778xbf16>
    %c96 = arith.constant 96 : index
    %c0_77 = arith.constant 0 : index
    %74 = vector.load %arg6[%c96, %c0_77] : memref<108x778xbf16, #tpu.memory_space<vmem>>, vector<4x778xbf16>
    tpu.vector_store %arg6[%c96, %c0_77], %73 {strides = array<i32>} : memref<108x778xbf16, #tpu.memory_space<vmem>>, vector<4x778xbf16>,
    %c0_78 = arith.constant 0 : index
    %c0_79 = arith.constant 0 : index
    %c221 = arith.constant 221 : index
    %75 = vector.load %arg1[%c0_78, %c0_79, %c221] : memref<1x4x1000xbf16, #tpu.memory_space<vmem>>, vector<1x4x778xbf16>
    %76 = vector.shape_cast %75 : vector<1x4x778xbf16> to vector<4x778xbf16>
    %c100_80 = arith.constant 100 : index
    %c0_81 = arith.constant 0 : index
    %77 = vector.load %arg6[%c100_80, %c0_81] : memref<108x778xbf16, #tpu.memory_space<vmem>>, vector<4x778xbf16>
    tpu.vector_store %arg6[%c100_80, %c0_81], %76 {strides = array<i32>} : memref<108x778xbf16, #tpu.memory_space<vmem>>, vector<4x778xbf16>,
    %c0_82 = arith.constant 0 : index
    %c0_83 = arith.constant 0 : index
    %c222 = arith.constant 222 : index
    %78 = vector.load %arg1[%c0_82, %c0_83, %c222] : memref<1x4x1000xbf16, #tpu.memory_space<vmem>>, vector<1x4x778xbf16>
    %79 = vector.shape_cast %78 : vector<1x4x778xbf16> to vector<4x778xbf16>
    %c104 = arith.constant 104 : index
    %c0_84 = arith.constant 0 : index
    %80 = vector.load %arg6[%c104, %c0_84] : memref<108x778xbf16, #tpu.memory_space<vmem>>, vector<4x778xbf16>
    tpu.vector_store %arg6[%c104, %c0_84], %79 {strides = array<i32>} : memref<108x778xbf16, #tpu.memory_space<vmem>>, vector<4x778xbf16>,
    %c0_85 = arith.constant 0 : index
    %c0_86 = arith.constant 0 : index
    %81 = vector.load %arg2[%c0_85, %c0_86] : memref<16x108xbf16, #tpu.memory_space<vmem>>, vector<16x108xbf16>
    %c0_87 = arith.constant 0 : index
    %c0_88 = arith.constant 0 : index
    %82 = vector.load %arg6[%c0_87, %c0_88] : memref<108x778xbf16, #tpu.memory_space<vmem>>, vector<108x778xbf16>
    %cst = arith.constant dense<0.000000e+00> : vector<16x778xf32>
    %83 = tpu.matmul %81, %82, %cst {dimension_numbers = #tpu.dot_dimension_numbers<[1], [0], [0], [1], [0, 0, 1, 1], [], []>} : vector<16x108xbf16>, vector<108x778xbf16>, vector<16x778xf32> -> vector<16x778xf32>
    %c0_89 = arith.constant 0 : index
    %c0_90 = arith.constant 0 : index
    %c0_91 = arith.constant 0 : index
    %84 = vector.load %arg4[%c0_89, %c0_90, %c0_91] : memref<1x16x778xf32, #tpu.memory_space<vmem>>, vector<1x16x778xf32>
    %85 = vector.shape_cast %84 : vector<1x16x778xf32> to vector<16x778xf32>
    %86 = vector.shape_cast %83 : vector<16x778xf32> to vector<1x16x778xf32>
    tpu.vector_store %arg4[%c0_89, %c0_90, %c0_91], %86 {strides = array<i32>} : memref<1x16x778xf32, #tpu.memory_space<vmem>>, vector<1x16x778xf32>,
    %c0_92 = arith.constant 0 : index
    %c0_93 = arith.constant 0 : index
    %87 = vector.load %arg3[%c0_92, %c0_93] : memref<1x778xf32, #tpu.memory_space<vmem>>, vector<1x778xf32>
    %88 = vector.broadcast %87 : vector<1x778xf32> to vector<16x778xf32>
    %89 = arith.mulf %83, %88 : vector<16x778xf32>
    %cst_94 = arith.constant dense<0.000000e+00> : vector<16xf32>
    %90 = vector.multi_reduction <add>, %89, %cst_94 [1] : vector<16x778xf32> to vector<16xf32>
    %91 = vector.shape_cast %90 : vector<16xf32> to vector<16x1xf32>
    %c0_95 = arith.constant 0 : index
    %c0_96 = arith.constant 0 : index
    %c0_97 = arith.constant 0 : index
    %92 = vector.load %arg5[%c0_95, %c0_96, %c0_97] : memref<1x16x2xf32, #tpu.memory_space<vmem>>, vector<1x16x1xf32>
    %93 = vector.shape_cast %92 : vector<1x16x1xf32> to vector<16x1xf32>
    %94 = vector.shape_cast %91 : vector<16x1xf32> to vector<1x16x1xf32>
    tpu.vector_store %arg5[%c0_95, %c0_96, %c0_97], %94 {strides = array<i32>} : memref<1x16x2xf32, #tpu.memory_space<vmem>>, vector<1x16x1xf32>,
    %95 = arith.mulf %83, %83 : vector<16x778xf32>
    %96 = vector.broadcast %87 : vector<1x778xf32> to vector<16x778xf32>
    %97 = arith.mulf %95, %96 : vector<16x778xf32>
    %cst_98 = arith.constant dense<0.000000e+00> : vector<16xf32>
    %98 = vector.multi_reduction <add>, %97, %cst_98 [1] : vector<16x778xf32> to vector<16xf32>
    %99 = vector.shape_cast %98 : vector<16xf32> to vector<16x1xf32>
    %c0_99 = arith.constant 0 : index
    %c0_100 = arith.constant 0 : index
    %c1_101 = arith.constant 1 : index
    %100 = vector.load %arg5[%c0_99, %c0_100, %c1_101] : memref<1x16x2xf32, #tpu.memory_space<vmem>>, vector<1x16x1xf32>
    %101 = vector.shape_cast %100 : vector<1x16x1xf32> to vector<16x1xf32>
    %102 = vector.shape_cast %99 : vector<16x1xf32> to vector<1x16x1xf32>
    tpu.vector_store %arg5[%c0_99, %c0_100, %c1_101], %102 {strides = array<i32>} : memref<1x16x2xf32, #tpu.memory_space<vmem>>, vector<1x16x1xf32>,
    return
  }
  func.func @transform_0(%arg0: i32) -> (i32, i32, i32) {
    %c0_i32 = arith.constant 0 : i32
    %c0_i32_0 = arith.constant 0 : i32
    %c0_i32_1 = arith.constant 0 : i32
    return %arg0, %c0_i32, %c0_i32_0 : i32, i32, i32
  }
  func.func @transform_1(%arg0: i32) -> (i32, i32) {
    %c0_i32 = arith.constant 0 : i32
    %c0_i32_0 = arith.constant 0 : i32
    %c0_i32_1 = arith.constant 0 : i32
    return %c0_i32, %c0_i32_0 : i32, i32
  }
  func.func @transform_2(%arg0: i32) -> (i32, i32) {
    %c0_i32 = arith.constant 0 : i32
    %c0_i32_0 = arith.constant 0 : i32
    %c0_i32_1 = arith.constant 0 : i32
    return %c0_i32, %c0_i32_0 : i32, i32
  }
  func.func @transform_3(%arg0: i32) -> (i32, i32, i32) {
    %c0_i32 = arith.constant 0 : i32
    %c0_i32_0 = arith.constant 0 : i32
    %c0_i32_1 = arith.constant 0 : i32
    return %arg0, %c0_i32, %c0_i32_0 : i32, i32, i32
  }
  func.func @transform_4(%arg0: i32) -> (i32, i32, i32) {
    %c0_i32 = arith.constant 0 : i32
    %c0_i32_0 = arith.constant 0 : i32
    %c0_i32_1 = arith.constant 0 : i32
    return %arg0, %c0_i32, %c0_i32_0 : i32, i32, i32
  }
}

module attributes {stable_mosaic.version = 11 : i64} {
  func.func @_pass2_kernel(%arg0: i32, %arg1: memref<1x8x778xf32, #tpu.memory_space<vmem>>, %arg2: memref<8x216xbf16, #tpu.memory_space<vmem>>, %arg3: memref<8x2xf32, #tpu.memory_space<vmem>>, %arg4: memref<1x778xf32, #tpu.memory_space<vmem>>, %arg5: memref<1x8x778xf32, #tpu.memory_space<vmem>>, %arg6: memref<1x8x2xf32, #tpu.memory_space<vmem>>, %arg7: memref<8x1000xbf16, #tpu.memory_space<vmem>>, %arg8: memref<216x778xbf16, #tpu.memory_space<vmem>>) attributes {dimension_semantics = [#tpu.dimension_semantics<parallel>], iteration_bounds = array<i64: 2>, scalar_prefetch = 0 : i64, scratch_operands = 2 : i64, tpu.core_type = #tpu.core_type<tc>, window_params = [{transform_indices = @transform_0, window_bounds = array<i64: 1, 8, 778>}, {pipeline_mode = #tpu.pipeline_mode<synchronous>, transform_indices = @transform_1, window_bounds = array<i64: 8, 216>}, {pipeline_mode = #tpu.pipeline_mode<synchronous>, transform_indices = @transform_2, window_bounds = array<i64: 8, 2>}, {pipeline_mode = #tpu.pipeline_mode<synchronous>, transform_indices = @transform_3, window_bounds = array<i64: 1, 778>}, {transform_indices = @transform_4, window_bounds = array<i64: 1, 8, 778>}, {transform_indices = @transform_5, window_bounds = array<i64: 1, 8, 2>}]} {
    %c0 = arith.constant 0 : index
    %c0_0 = arith.constant 0 : index
    %0 = vector.load %arg4[%c0, %c0_0] : memref<1x778xf32, #tpu.memory_space<vmem>>, vector<1x778xf32>
    %c0_1 = arith.constant 0 : index
    %c0_2 = arith.constant 0 : index
    %1 = vector.load %arg3[%c0_1, %c0_2] : memref<8x2xf32, #tpu.memory_space<vmem>>, vector<8x1xf32>
    %c0_3 = arith.constant 0 : index
    %c1 = arith.constant 1 : index
    %2 = vector.load %arg3[%c0_3, %c1] : memref<8x2xf32, #tpu.memory_space<vmem>>, vector<8x1xf32>
    %c0_4 = arith.constant 0 : index
    %c0_5 = arith.constant 0 : index
    %c0_6 = arith.constant 0 : index
    %3 = vector.load %arg1[%c0_4, %c0_5, %c0_6] : memref<1x8x778xf32, #tpu.memory_space<vmem>>, vector<1x8x778xf32>
    %4 = vector.shape_cast %3 : vector<1x8x778xf32> to vector<8x778xf32>
    %5 = vector.broadcast %1 : vector<8x1xf32> to vector<8x778xf32>
    %6 = arith.mulf %4, %5 : vector<8x778xf32>
    %7 = vector.broadcast %2 : vector<8x1xf32> to vector<8x778xf32>
    %8 = arith.addf %6, %7 : vector<8x778xf32>
    %cst = arith.constant 0.000000e+00 : f32
    %9 = vector.broadcast %cst : f32 to vector<8x778xf32>
    %10 = arith.maximumf %8, %9 : vector<8x778xf32>
    %11 = vector.broadcast %0 : vector<1x778xf32> to vector<8x778xf32>
    %12 = arith.mulf %10, %11 : vector<8x778xf32>
    %cst_7 = arith.constant 0.000000e+00 : bf16
    %13 = vector.broadcast %cst_7 : bf16 to vector<8x111xbf16>
    %c0_8 = arith.constant 0 : index
    %c0_9 = arith.constant 0 : index
    %14 = vector.load %arg7[%c0_8, %c0_9] : memref<8x1000xbf16, #tpu.memory_space<vmem>>, vector<8x111xbf16>
    tpu.vector_store %arg7[%c0_8, %c0_9], %13 {strides = array<i32>} : memref<8x1000xbf16, #tpu.memory_space<vmem>>, vector<8x111xbf16>,
    %cst_10 = arith.constant 0.000000e+00 : bf16
    %15 = vector.broadcast %cst_10 : bf16 to vector<8x111xbf16>
    %c0_11 = arith.constant 0 : index
    %c889 = arith.constant 889 : index
    %16 = vector.load %arg7[%c0_11, %c889] : memref<8x1000xbf16, #tpu.memory_space<vmem>>, vector<8x111xbf16>
    tpu.vector_store %arg7[%c0_11, %c889], %15 {strides = array<i32>} : memref<8x1000xbf16, #tpu.memory_space<vmem>>, vector<8x111xbf16>,
    %17 = arith.truncf %12 : vector<8x778xf32> to vector<8x778xbf16>
    %c0_12 = arith.constant 0 : index
    %c111 = arith.constant 111 : index
    %18 = vector.load %arg7[%c0_12, %c111] : memref<8x1000xbf16, #tpu.memory_space<vmem>>, vector<8x778xbf16>
    tpu.vector_store %arg7[%c0_12, %c111], %17 {strides = array<i32>} : memref<8x1000xbf16, #tpu.memory_space<vmem>>, vector<8x778xbf16>,
    %c0_13 = arith.constant 0 : index
    %c0_14 = arith.constant 0 : index
    %19 = vector.load %arg7[%c0_13, %c0_14] : memref<8x1000xbf16, #tpu.memory_space<vmem>>, vector<8x778xbf16>
    %c0_15 = arith.constant 0 : index
    %c0_16 = arith.constant 0 : index
    %20 = vector.load %arg8[%c0_15, %c0_16] : memref<216x778xbf16, #tpu.memory_space<vmem>>, vector<8x778xbf16>
    tpu.vector_store %arg8[%c0_15, %c0_16], %19 {strides = array<i32>} : memref<216x778xbf16, #tpu.memory_space<vmem>>, vector<8x778xbf16>,
    %c0_17 = arith.constant 0 : index
    %c1_18 = arith.constant 1 : index
    %21 = vector.load %arg7[%c0_17, %c1_18] : memref<8x1000xbf16, #tpu.memory_space<vmem>>, vector<8x778xbf16>
    %c8 = arith.constant 8 : index
    %c0_19 = arith.constant 0 : index
    %22 = vector.load %arg8[%c8, %c0_19] : memref<216x778xbf16, #tpu.memory_space<vmem>>, vector<8x778xbf16>
    tpu.vector_store %arg8[%c8, %c0_19], %21 {strides = array<i32>} : memref<216x778xbf16, #tpu.memory_space<vmem>>, vector<8x778xbf16>,
    %c0_20 = arith.constant 0 : index
    %c2 = arith.constant 2 : index
    %23 = vector.load %arg7[%c0_20, %c2] : memref<8x1000xbf16, #tpu.memory_space<vmem>>, vector<8x778xbf16>
    %c16 = arith.constant 16 : index
    %c0_21 = arith.constant 0 : index
    %24 = vector.load %arg8[%c16, %c0_21] : memref<216x778xbf16, #tpu.memory_space<vmem>>, vector<8x778xbf16>
    tpu.vector_store %arg8[%c16, %c0_21], %23 {strides = array<i32>} : memref<216x778xbf16, #tpu.memory_space<vmem>>, vector<8x778xbf16>,
    %c0_22 = arith.constant 0 : index
    %c10 = arith.constant 10 : index
    %25 = vector.load %arg7[%c0_22, %c10] : memref<8x1000xbf16, #tpu.memory_space<vmem>>, vector<8x778xbf16>
    %c24 = arith.constant 24 : index
    %c0_23 = arith.constant 0 : index
    %26 = vector.load %arg8[%c24, %c0_23] : memref<216x778xbf16, #tpu.memory_space<vmem>>, vector<8x778xbf16>
    tpu.vector_store %arg8[%c24, %c0_23], %25 {strides = array<i32>} : memref<216x778xbf16, #tpu.memory_space<vmem>>, vector<8x778xbf16>,
    %c0_24 = arith.constant 0 : index
    %c11 = arith.constant 11 : index
    %27 = vector.load %arg7[%c0_24, %c11] : memref<8x1000xbf16, #tpu.memory_space<vmem>>, vector<8x778xbf16>
    %c32 = arith.constant 32 : index
    %c0_25 = arith.constant 0 : index
    %28 = vector.load %arg8[%c32, %c0_25] : memref<216x778xbf16, #tpu.memory_space<vmem>>, vector<8x778xbf16>
    tpu.vector_store %arg8[%c32, %c0_25], %27 {strides = array<i32>} : memref<216x778xbf16, #tpu.memory_space<vmem>>, vector<8x778xbf16>,
    %c0_26 = arith.constant 0 : index
    %c12 = arith.constant 12 : index
    %29 = vector.load %arg7[%c0_26, %c12] : memref<8x1000xbf16, #tpu.memory_space<vmem>>, vector<8x778xbf16>
    %c40 = arith.constant 40 : index
    %c0_27 = arith.constant 0 : index
    %30 = vector.load %arg8[%c40, %c0_27] : memref<216x778xbf16, #tpu.memory_space<vmem>>, vector<8x778xbf16>
    tpu.vector_store %arg8[%c40, %c0_27], %29 {strides = array<i32>} : memref<216x778xbf16, #tpu.memory_space<vmem>>, vector<8x778xbf16>,
    %c0_28 = arith.constant 0 : index
    %c20 = arith.constant 20 : index
    %31 = vector.load %arg7[%c0_28, %c20] : memref<8x1000xbf16, #tpu.memory_space<vmem>>, vector<8x778xbf16>
    %c48 = arith.constant 48 : index
    %c0_29 = arith.constant 0 : index
    %32 = vector.load %arg8[%c48, %c0_29] : memref<216x778xbf16, #tpu.memory_space<vmem>>, vector<8x778xbf16>
    tpu.vector_store %arg8[%c48, %c0_29], %31 {strides = array<i32>} : memref<216x778xbf16, #tpu.memory_space<vmem>>, vector<8x778xbf16>,
    %c0_30 = arith.constant 0 : index
    %c21 = arith.constant 21 : index
    %33 = vector.load %arg7[%c0_30, %c21] : memref<8x1000xbf16, #tpu.memory_space<vmem>>, vector<8x778xbf16>
    %c56 = arith.constant 56 : index
    %c0_31 = arith.constant 0 : index
    %34 = vector.load %arg8[%c56, %c0_31] : memref<216x778xbf16, #tpu.memory_space<vmem>>, vector<8x778xbf16>
    tpu.vector_store %arg8[%c56, %c0_31], %33 {strides = array<i32>} : memref<216x778xbf16, #tpu.memory_space<vmem>>, vector<8x778xbf16>,
    %c0_32 = arith.constant 0 : index
    %c22 = arith.constant 22 : index
    %35 = vector.load %arg7[%c0_32, %c22] : memref<8x1000xbf16, #tpu.memory_space<vmem>>, vector<8x778xbf16>
    %c64 = arith.constant 64 : index
    %c0_33 = arith.constant 0 : index
    %36 = vector.load %arg8[%c64, %c0_33] : memref<216x778xbf16, #tpu.memory_space<vmem>>, vector<8x778xbf16>
    tpu.vector_store %arg8[%c64, %c0_33], %35 {strides = array<i32>} : memref<216x778xbf16, #tpu.memory_space<vmem>>, vector<8x778xbf16>,
    %c0_34 = arith.constant 0 : index
    %c100 = arith.constant 100 : index
    %37 = vector.load %arg7[%c0_34, %c100] : memref<8x1000xbf16, #tpu.memory_space<vmem>>, vector<8x778xbf16>
    %c72 = arith.constant 72 : index
    %c0_35 = arith.constant 0 : index
    %38 = vector.load %arg8[%c72, %c0_35] : memref<216x778xbf16, #tpu.memory_space<vmem>>, vector<8x778xbf16>
    tpu.vector_store %arg8[%c72, %c0_35], %37 {strides = array<i32>} : memref<216x778xbf16, #tpu.memory_space<vmem>>, vector<8x778xbf16>,
    %c0_36 = arith.constant 0 : index
    %c101 = arith.constant 101 : index
    %39 = vector.load %arg7[%c0_36, %c101] : memref<8x1000xbf16, #tpu.memory_space<vmem>>, vector<8x778xbf16>
    %c80 = arith.constant 80 : index
    %c0_37 = arith.constant 0 : index
    %40 = vector.load %arg8[%c80, %c0_37] : memref<216x778xbf16, #tpu.memory_space<vmem>>, vector<8x778xbf16>
    tpu.vector_store %arg8[%c80, %c0_37], %39 {strides = array<i32>} : memref<216x778xbf16, #tpu.memory_space<vmem>>, vector<8x778xbf16>,
    %c0_38 = arith.constant 0 : index
    %c102 = arith.constant 102 : index
    %41 = vector.load %arg7[%c0_38, %c102] : memref<8x1000xbf16, #tpu.memory_space<vmem>>, vector<8x778xbf16>
    %c88 = arith.constant 88 : index
    %c0_39 = arith.constant 0 : index
    %42 = vector.load %arg8[%c88, %c0_39] : memref<216x778xbf16, #tpu.memory_space<vmem>>, vector<8x778xbf16>
    tpu.vector_store %arg8[%c88, %c0_39], %41 {strides = array<i32>} : memref<216x778xbf16, #tpu.memory_space<vmem>>, vector<8x778xbf16>,
    %c0_40 = arith.constant 0 : index
    %c110 = arith.constant 110 : index
    %43 = vector.load %arg7[%c0_40, %c110] : memref<8x1000xbf16, #tpu.memory_space<vmem>>, vector<8x778xbf16>
    %c96 = arith.constant 96 : index
    %c0_41 = arith.constant 0 : index
    %44 = vector.load %arg8[%c96, %c0_41] : memref<216x778xbf16, #tpu.memory_space<vmem>>, vector<8x778xbf16>
    tpu.vector_store %arg8[%c96, %c0_41], %43 {strides = array<i32>} : memref<216x778xbf16, #tpu.memory_space<vmem>>, vector<8x778xbf16>,
    %c0_42 = arith.constant 0 : index
    %c111_43 = arith.constant 111 : index
    %45 = vector.load %arg7[%c0_42, %c111_43] : memref<8x1000xbf16, #tpu.memory_space<vmem>>, vector<8x778xbf16>
    %c104 = arith.constant 104 : index
    %c0_44 = arith.constant 0 : index
    %46 = vector.load %arg8[%c104, %c0_44] : memref<216x778xbf16, #tpu.memory_space<vmem>>, vector<8x778xbf16>
    tpu.vector_store %arg8[%c104, %c0_44], %45 {strides = array<i32>} : memref<216x778xbf16, #tpu.memory_space<vmem>>, vector<8x778xbf16>,
    %c0_45 = arith.constant 0 : index
    %c112 = arith.constant 112 : index
    %47 = vector.load %arg7[%c0_45, %c112] : memref<8x1000xbf16, #tpu.memory_space<vmem>>, vector<8x778xbf16>
    %c112_46 = arith.constant 112 : index
    %c0_47 = arith.constant 0 : index
    %48 = vector.load %arg8[%c112_46, %c0_47] : memref<216x778xbf16, #tpu.memory_space<vmem>>, vector<8x778xbf16>
    tpu.vector_store %arg8[%c112_46, %c0_47], %47 {strides = array<i32>} : memref<216x778xbf16, #tpu.memory_space<vmem>>, vector<8x778xbf16>,
    %c0_48 = arith.constant 0 : index
    %c120 = arith.constant 120 : index
    %49 = vector.load %arg7[%c0_48, %c120] : memref<8x1000xbf16, #tpu.memory_space<vmem>>, vector<8x778xbf16>
    %c120_49 = arith.constant 120 : index
    %c0_50 = arith.constant 0 : index
    %50 = vector.load %arg8[%c120_49, %c0_50] : memref<216x778xbf16, #tpu.memory_space<vmem>>, vector<8x778xbf16>
    tpu.vector_store %arg8[%c120_49, %c0_50], %49 {strides = array<i32>} : memref<216x778xbf16, #tpu.memory_space<vmem>>, vector<8x778xbf16>,
    %c0_51 = arith.constant 0 : index
    %c121 = arith.constant 121 : index
    %51 = vector.load %arg7[%c0_51, %c121] : memref<8x1000xbf16, #tpu.memory_space<vmem>>, vector<8x778xbf16>
    %c128 = arith.constant 128 : index
    %c0_52 = arith.constant 0 : index
    %52 = vector.load %arg8[%c128, %c0_52] : memref<216x778xbf16, #tpu.memory_space<vmem>>, vector<8x778xbf16>
    tpu.vector_store %arg8[%c128, %c0_52], %51 {strides = array<i32>} : memref<216x778xbf16, #tpu.memory_space<vmem>>, vector<8x778xbf16>,
    %c0_53 = arith.constant 0 : index
    %c122 = arith.constant 122 : index
    %53 = vector.load %arg7[%c0_53, %c122] : memref<8x1000xbf16, #tpu.memory_space<vmem>>, vector<8x778xbf16>
    %c136 = arith.constant 136 : index
    %c0_54 = arith.constant 0 : index
    %54 = vector.load %arg8[%c136, %c0_54] : memref<216x778xbf16, #tpu.memory_space<vmem>>, vector<8x778xbf16>
    tpu.vector_store %arg8[%c136, %c0_54], %53 {strides = array<i32>} : memref<216x778xbf16, #tpu.memory_space<vmem>>, vector<8x778xbf16>,
    %c0_55 = arith.constant 0 : index
    %c200 = arith.constant 200 : index
    %55 = vector.load %arg7[%c0_55, %c200] : memref<8x1000xbf16, #tpu.memory_space<vmem>>, vector<8x778xbf16>
    %c144 = arith.constant 144 : index
    %c0_56 = arith.constant 0 : index
    %56 = vector.load %arg8[%c144, %c0_56] : memref<216x778xbf16, #tpu.memory_space<vmem>>, vector<8x778xbf16>
    tpu.vector_store %arg8[%c144, %c0_56], %55 {strides = array<i32>} : memref<216x778xbf16, #tpu.memory_space<vmem>>, vector<8x778xbf16>,
    %c0_57 = arith.constant 0 : index
    %c201 = arith.constant 201 : index
    %57 = vector.load %arg7[%c0_57, %c201] : memref<8x1000xbf16, #tpu.memory_space<vmem>>, vector<8x778xbf16>
    %c152 = arith.constant 152 : index
    %c0_58 = arith.constant 0 : index
    %58 = vector.load %arg8[%c152, %c0_58] : memref<216x778xbf16, #tpu.memory_space<vmem>>, vector<8x778xbf16>
    tpu.vector_store %arg8[%c152, %c0_58], %57 {strides = array<i32>} : memref<216x778xbf16, #tpu.memory_space<vmem>>, vector<8x778xbf16>,
    %c0_59 = arith.constant 0 : index
    %c202 = arith.constant 202 : index
    %59 = vector.load %arg7[%c0_59, %c202] : memref<8x1000xbf16, #tpu.memory_space<vmem>>, vector<8x778xbf16>
    %c160 = arith.constant 160 : index
    %c0_60 = arith.constant 0 : index
    %60 = vector.load %arg8[%c160, %c0_60] : memref<216x778xbf16, #tpu.memory_space<vmem>>, vector<8x778xbf16>
    tpu.vector_store %arg8[%c160, %c0_60], %59 {strides = array<i32>} : memref<216x778xbf16, #tpu.memory_space<vmem>>, vector<8x778xbf16>,
    %c0_61 = arith.constant 0 : index
    %c210 = arith.constant 210 : index
    %61 = vector.load %arg7[%c0_61, %c210] : memref<8x1000xbf16, #tpu.memory_space<vmem>>, vector<8x778xbf16>
    %c168 = arith.constant 168 : index
    %c0_62 = arith.constant 0 : index
    %62 = vector.load %arg8[%c168, %c0_62] : memref<216x778xbf16, #tpu.memory_space<vmem>>, vector<8x778xbf16>
    tpu.vector_store %arg8[%c168, %c0_62], %61 {strides = array<i32>} : memref<216x778xbf16, #tpu.memory_space<vmem>>, vector<8x778xbf16>,
    %c0_63 = arith.constant 0 : index
    %c211 = arith.constant 211 : index
    %63 = vector.load %arg7[%c0_63, %c211] : memref<8x1000xbf16, #tpu.memory_space<vmem>>, vector<8x778xbf16>
    %c176 = arith.constant 176 : index
    %c0_64 = arith.constant 0 : index
    %64 = vector.load %arg8[%c176, %c0_64] : memref<216x778xbf16, #tpu.memory_space<vmem>>, vector<8x778xbf16>
    tpu.vector_store %arg8[%c176, %c0_64], %63 {strides = array<i32>} : memref<216x778xbf16, #tpu.memory_space<vmem>>, vector<8x778xbf16>,
    %c0_65 = arith.constant 0 : index
    %c212 = arith.constant 212 : index
    %65 = vector.load %arg7[%c0_65, %c212] : memref<8x1000xbf16, #tpu.memory_space<vmem>>, vector<8x778xbf16>
    %c184 = arith.constant 184 : index
    %c0_66 = arith.constant 0 : index
    %66 = vector.load %arg8[%c184, %c0_66] : memref<216x778xbf16, #tpu.memory_space<vmem>>, vector<8x778xbf16>
    tpu.vector_store %arg8[%c184, %c0_66], %65 {strides = array<i32>} : memref<216x778xbf16, #tpu.memory_space<vmem>>, vector<8x778xbf16>,
    %c0_67 = arith.constant 0 : index
    %c220 = arith.constant 220 : index
    %67 = vector.load %arg7[%c0_67, %c220] : memref<8x1000xbf16, #tpu.memory_space<vmem>>, vector<8x778xbf16>
    %c192 = arith.constant 192 : index
    %c0_68 = arith.constant 0 : index
    %68 = vector.load %arg8[%c192, %c0_68] : memref<216x778xbf16, #tpu.memory_space<vmem>>, vector<8x778xbf16>
    tpu.vector_store %arg8[%c192, %c0_68], %67 {strides = array<i32>} : memref<216x778xbf16, #tpu.memory_space<vmem>>, vector<8x778xbf16>,
    %c0_69 = arith.constant 0 : index
    %c221 = arith.constant 221 : index
    %69 = vector.load %arg7[%c0_69, %c221] : memref<8x1000xbf16, #tpu.memory_space<vmem>>, vector<8x778xbf16>
    %c200_70 = arith.constant 200 : index
    %c0_71 = arith.constant 0 : index
    %70 = vector.load %arg8[%c200_70, %c0_71] : memref<216x778xbf16, #tpu.memory_space<vmem>>, vector<8x778xbf16>
    tpu.vector_store %arg8[%c200_70, %c0_71], %69 {strides = array<i32>} : memref<216x778xbf16, #tpu.memory_space<vmem>>, vector<8x778xbf16>,
    %c0_72 = arith.constant 0 : index
    %c222 = arith.constant 222 : index
    %71 = vector.load %arg7[%c0_72, %c222] : memref<8x1000xbf16, #tpu.memory_space<vmem>>, vector<8x778xbf16>
    %c208 = arith.constant 208 : index
    %c0_73 = arith.constant 0 : index
    %72 = vector.load %arg8[%c208, %c0_73] : memref<216x778xbf16, #tpu.memory_space<vmem>>, vector<8x778xbf16>
    tpu.vector_store %arg8[%c208, %c0_73], %71 {strides = array<i32>} : memref<216x778xbf16, #tpu.memory_space<vmem>>, vector<8x778xbf16>,
    %c0_74 = arith.constant 0 : index
    %c0_75 = arith.constant 0 : index
    %73 = vector.load %arg2[%c0_74, %c0_75] : memref<8x216xbf16, #tpu.memory_space<vmem>>, vector<8x216xbf16>
    %c0_76 = arith.constant 0 : index
    %c0_77 = arith.constant 0 : index
    %74 = vector.load %arg8[%c0_76, %c0_77] : memref<216x778xbf16, #tpu.memory_space<vmem>>, vector<216x778xbf16>
    %cst_78 = arith.constant dense<0.000000e+00> : vector<8x778xf32>
    %75 = tpu.matmul %73, %74, %cst_78 {dimension_numbers = #tpu.dot_dimension_numbers<[1], [0], [0], [1], [0, 0, 1, 1], [], []>} : vector<8x216xbf16>, vector<216x778xbf16>, vector<8x778xf32> -> vector<8x778xf32>
    %c0_79 = arith.constant 0 : index
    %c0_80 = arith.constant 0 : index
    %c0_81 = arith.constant 0 : index
    %76 = vector.load %arg5[%c0_79, %c0_80, %c0_81] : memref<1x8x778xf32, #tpu.memory_space<vmem>>, vector<1x8x778xf32>
    %77 = vector.shape_cast %76 : vector<1x8x778xf32> to vector<8x778xf32>
    %78 = vector.shape_cast %75 : vector<8x778xf32> to vector<1x8x778xf32>
    tpu.vector_store %arg5[%c0_79, %c0_80, %c0_81], %78 {strides = array<i32>} : memref<1x8x778xf32, #tpu.memory_space<vmem>>, vector<1x8x778xf32>,
    %79 = vector.broadcast %0 : vector<1x778xf32> to vector<8x778xf32>
    %80 = arith.mulf %75, %79 : vector<8x778xf32>
    %cst_82 = arith.constant dense<0.000000e+00> : vector<8xf32>
    %81 = vector.multi_reduction <add>, %80, %cst_82 [1] : vector<8x778xf32> to vector<8xf32>
    %82 = vector.shape_cast %81 : vector<8xf32> to vector<8x1xf32>
    %c0_83 = arith.constant 0 : index
    %c0_84 = arith.constant 0 : index
    %c0_85 = arith.constant 0 : index
    %83 = vector.load %arg6[%c0_83, %c0_84, %c0_85] : memref<1x8x2xf32, #tpu.memory_space<vmem>>, vector<1x8x1xf32>
    %84 = vector.shape_cast %83 : vector<1x8x1xf32> to vector<8x1xf32>
    %85 = vector.shape_cast %82 : vector<8x1xf32> to vector<1x8x1xf32>
    tpu.vector_store %arg6[%c0_83, %c0_84, %c0_85], %85 {strides = array<i32>} : memref<1x8x2xf32, #tpu.memory_space<vmem>>, vector<1x8x1xf32>,
    %86 = arith.mulf %75, %75 : vector<8x778xf32>
    %87 = vector.broadcast %0 : vector<1x778xf32> to vector<8x778xf32>
    %88 = arith.mulf %86, %87 : vector<8x778xf32>
    %cst_86 = arith.constant dense<0.000000e+00> : vector<8xf32>
    %89 = vector.multi_reduction <add>, %88, %cst_86 [1] : vector<8x778xf32> to vector<8xf32>
    %90 = vector.shape_cast %89 : vector<8xf32> to vector<8x1xf32>
    %c0_87 = arith.constant 0 : index
    %c0_88 = arith.constant 0 : index
    %c1_89 = arith.constant 1 : index
    %91 = vector.load %arg6[%c0_87, %c0_88, %c1_89] : memref<1x8x2xf32, #tpu.memory_space<vmem>>, vector<1x8x1xf32>
    %92 = vector.shape_cast %91 : vector<1x8x1xf32> to vector<8x1xf32>
    %93 = vector.shape_cast %90 : vector<8x1xf32> to vector<1x8x1xf32>
    tpu.vector_store %arg6[%c0_87, %c0_88, %c1_89], %93 {strides = array<i32>} : memref<1x8x2xf32, #tpu.memory_space<vmem>>, vector<1x8x1xf32>,
    return
  }
  func.func @transform_0(%arg0: i32) -> (i32, i32, i32) {
    %c0_i32 = arith.constant 0 : i32
    %c0_i32_0 = arith.constant 0 : i32
    %c0_i32_1 = arith.constant 0 : i32
    return %arg0, %c0_i32, %c0_i32_0 : i32, i32, i32
  }
  func.func @transform_1(%arg0: i32) -> (i32, i32) {
    %c0_i32 = arith.constant 0 : i32
    %c0_i32_0 = arith.constant 0 : i32
    %c0_i32_1 = arith.constant 0 : i32
    return %c0_i32, %c0_i32_0 : i32, i32
  }
  func.func @transform_2(%arg0: i32) -> (i32, i32) {
    %c0_i32 = arith.constant 0 : i32
    %c0_i32_0 = arith.constant 0 : i32
    %c0_i32_1 = arith.constant 0 : i32
    return %c0_i32, %c0_i32_0 : i32, i32
  }
  func.func @transform_3(%arg0: i32) -> (i32, i32) {
    %c0_i32 = arith.constant 0 : i32
    %c0_i32_0 = arith.constant 0 : i32
    %c0_i32_1 = arith.constant 0 : i32
    return %c0_i32, %c0_i32_0 : i32, i32
  }
  func.func @transform_4(%arg0: i32) -> (i32, i32, i32) {
    %c0_i32 = arith.constant 0 : i32
    %c0_i32_0 = arith.constant 0 : i32
    %c0_i32_1 = arith.constant 0 : i32
    return %arg0, %c0_i32, %c0_i32_0 : i32, i32, i32
  }
  func.func @transform_5(%arg0: i32) -> (i32, i32, i32) {
    %c0_i32 = arith.constant 0 : i32
    %c0_i32_0 = arith.constant 0 : i32
    %c0_i32_1 = arith.constant 0 : i32
    return %arg0, %c0_i32, %c0_i32_0 : i32, i32, i32
  }
}

module attributes {stable_mosaic.version = 11 : i64} {
  func.func @_pass3_kernel(%arg0: i32, %arg1: memref<1x8x778xf32, #tpu.memory_space<vmem>>, %arg2: memref<1x8x778xf32, #tpu.memory_space<vmem>>, %arg3: memref<8x4xf32, #tpu.memory_space<vmem>>, %arg4: memref<1x8x778xf32, #tpu.memory_space<vmem>>) attributes {dimension_semantics = [#tpu.dimension_semantics<parallel>], iteration_bounds = array<i64: 2>, scalar_prefetch = 0 : i64, scratch_operands = 0 : i64, tpu.core_type = #tpu.core_type<tc>, window_params = [{transform_indices = @transform_0, window_bounds = array<i64: 1, 8, 778>}, {transform_indices = @transform_1, window_bounds = array<i64: 1, 8, 778>}, {pipeline_mode = #tpu.pipeline_mode<synchronous>, transform_indices = @transform_2, window_bounds = array<i64: 8, 4>}, {transform_indices = @transform_3, window_bounds = array<i64: 1, 8, 778>}]} {
    %c0 = arith.constant 0 : index
    %c0_0 = arith.constant 0 : index
    %0 = vector.load %arg3[%c0, %c0_0] : memref<8x4xf32, #tpu.memory_space<vmem>>, vector<8x1xf32>
    %c0_1 = arith.constant 0 : index
    %c1 = arith.constant 1 : index
    %1 = vector.load %arg3[%c0_1, %c1] : memref<8x4xf32, #tpu.memory_space<vmem>>, vector<8x1xf32>
    %c0_2 = arith.constant 0 : index
    %c2 = arith.constant 2 : index
    %2 = vector.load %arg3[%c0_2, %c2] : memref<8x4xf32, #tpu.memory_space<vmem>>, vector<8x1xf32>
    %c0_3 = arith.constant 0 : index
    %c3 = arith.constant 3 : index
    %3 = vector.load %arg3[%c0_3, %c3] : memref<8x4xf32, #tpu.memory_space<vmem>>, vector<8x1xf32>
    %c0_4 = arith.constant 0 : index
    %c0_5 = arith.constant 0 : index
    %c0_6 = arith.constant 0 : index
    %4 = vector.load %arg1[%c0_4, %c0_5, %c0_6] : memref<1x8x778xf32, #tpu.memory_space<vmem>>, vector<1x8x778xf32>
    %5 = vector.shape_cast %4 : vector<1x8x778xf32> to vector<8x778xf32>
    %6 = vector.broadcast %0 : vector<8x1xf32> to vector<8x778xf32>
    %7 = arith.mulf %5, %6 : vector<8x778xf32>
    %8 = vector.broadcast %1 : vector<8x1xf32> to vector<8x778xf32>
    %9 = arith.addf %7, %8 : vector<8x778xf32>
    %cst = arith.constant 0.000000e+00 : f32
    %10 = vector.broadcast %cst : f32 to vector<8x778xf32>
    %11 = arith.maximumf %9, %10 : vector<8x778xf32>
    %c0_7 = arith.constant 0 : index
    %c0_8 = arith.constant 0 : index
    %c0_9 = arith.constant 0 : index
    %12 = vector.load %arg2[%c0_7, %c0_8, %c0_9] : memref<1x8x778xf32, #tpu.memory_space<vmem>>, vector<1x8x778xf32>
    %13 = vector.shape_cast %12 : vector<1x8x778xf32> to vector<8x778xf32>
    %14 = vector.broadcast %2 : vector<8x1xf32> to vector<8x778xf32>
    %15 = arith.mulf %13, %14 : vector<8x778xf32>
    %16 = vector.broadcast %3 : vector<8x1xf32> to vector<8x778xf32>
    %17 = arith.addf %15, %16 : vector<8x778xf32>
    %cst_10 = arith.constant 0.000000e+00 : f32
    %18 = vector.broadcast %cst_10 : f32 to vector<8x778xf32>
    %19 = arith.maximumf %17, %18 : vector<8x778xf32>
    %20 = arith.addf %11, %19 : vector<8x778xf32>
    %c0_11 = arith.constant 0 : index
    %c0_12 = arith.constant 0 : index
    %c0_13 = arith.constant 0 : index
    %21 = vector.load %arg4[%c0_11, %c0_12, %c0_13] : memref<1x8x778xf32, #tpu.memory_space<vmem>>, vector<1x8x778xf32>
    %22 = vector.shape_cast %21 : vector<1x8x778xf32> to vector<8x778xf32>
    %23 = vector.shape_cast %20 : vector<8x778xf32> to vector<1x8x778xf32>
    tpu.vector_store %arg4[%c0_11, %c0_12, %c0_13], %23 {strides = array<i32>} : memref<1x8x778xf32, #tpu.memory_space<vmem>>, vector<1x8x778xf32>,
    return
  }
  func.func @transform_0(%arg0: i32) -> (i32, i32, i32) {
    %c0_i32 = arith.constant 0 : i32
    %c0_i32_0 = arith.constant 0 : i32
    %c0_i32_1 = arith.constant 0 : i32
    return %arg0, %c0_i32, %c0_i32_0 : i32, i32, i32
  }
  func.func @transform_1(%arg0: i32) -> (i32, i32, i32) {
    %c1_i32 = arith.constant 1 : i32
    %c0_i32 = arith.constant 0 : i32
    %c0_i32_0 = arith.constant 0 : i32
    return %arg0, %c1_i32, %c0_i32 : i32, i32, i32
  }
  func.func @transform_2(%arg0: i32) -> (i32, i32) {
    %c0_i32 = arith.constant 0 : i32
    %c0_i32_0 = arith.constant 0 : i32
    %c0_i32_1 = arith.constant 0 : i32
    return %c0_i32, %c0_i32_0 : i32, i32
  }
  func.func @transform_3(%arg0: i32) -> (i32, i32, i32) {
    %c0_i32 = arith.constant 0 : i32
    %c0_i32_0 = arith.constant 0 : i32
    %c0_i32_1 = arith.constant 0 : i32
    return %arg0, %c0_i32, %c0_i32_0 : i32, i32, i32
  }
}

</mosaic_0001>

<bundles_post_ra>
// kernel: residual_block.5
= control target key start
LH: loop header
LB: loop body
LE: loop exit
PB: predicated region body
PF: predicated region fallthrough
CT: control target
= control target key end

     0   :  { %s423_s12 = smov 0   ;;  %s454_s0 = inlined_call_operand.vmem [shape: f32[2,8,778], index: 0, kind: input, shape index: {}]   ;;  %s455_s1 = inlined_call_operand.vmem [shape: f32[2,16,778], index: 1, kind: input, shape index: {}]   ;;  %s456_s2 = inlined_call_operand.vmem [shape: f32[8,4], index: 2, kind: input, shape index: {}]   ;;  %s457_s3 = inlined_call_operand.vmem [shape: f32[2,8,778], index: 3, kind: output, shape index: {}]  }
   0x1 LB: > { %s356_s13 = sadd.s32 4294967295, %s397_s12   ;;  %p360_p0 = scmp.ge.s32.totalorder %s397_s12, 1  ;;  %s397_s12 = sphi %s423_s12, %s13_s12  }
   0x2   : > { %p148_p1 = scmp.lt.s32.totalorder %s397_s12, 3 }
   0x4   : > { %p149_p2 = pnand %p360_p0, %p148_p1 }
   0x5   : > { %p178_p3 = scmp.lt.s32.totalorder (!%p149_p2), %s356_s13, 1 }
   0x6   : > { %152 = sbr.rel (%p149_p2) target bundleno = 152 (0x98), region = 32 }
   0xb   : > { %v194_v0 = vld [vmem:[%s456_s2] sm:$0xff]  ;;  %v399_v1 = vmov 0   ;;  %v400_v2 = vmov 1   ;;  %v401_v3 = vmov 2   ;;  %v402_v4 = vmov 3   ;;  %s459_s13 = smov (!%p178_p3, %s356_s13), 1 }
   0xc   : > { %386 = vset.pattern.permute.xlu0 %v399_v1  ;;  %388 = vset.pattern.permute.xlu1 %v400_v2  ;;  %s373_s16 = smul.u32 56, %s459_s13  ;;  %vm281_vm0 = vcmask 80896  }
   0xd   : > { %204 = vperm.xlu0 %386, %v194_v0   ;;  %215 = vperm.xlu1 %388, %v194_v0   ;;  %s362_s20 = smul.u32 112, %s459_s13 }
   0xe   : > { %s182_s19 = scalar_lea.vmem %s454_s0, %s373_s16  ;;  %s193_s26 = scalar_lea.vmem %s457_s3, %s373_s16 }
   0xf   : > { %v195_v5 = vld [vmem:[%s182_s19] sm:$0xff]  ;;  %v196_v7 = vld [vmem:[%s182_s19 + $0x8] sm:$0xff]  ;;  %v197_v9 = vld [vmem:[%s182_s19 + $0x10] sm:$0xff]  ;;  %s322_s23 = scalar_lea.vmem %s455_s1, %s362_s20 }
  0x10   : > { %v198_v10 = vld [vmem:[%s182_s19 + $0x18] sm:$0xff]  ;;  %v199_v12 = vld [vmem:[%s182_s19 + $0x20] sm:$0xff]  ;;  %v200_v13 = vld [vmem:[%s182_s19 + $0x28] sm:$0xff] }
  0x11   : > { %v201_v14 = vld [vmem:[%s182_s19 + $0x30] sm:$0xff]  ;;  %v364_v22 = vld [vmem:[%s322_s23 + $0x38] sm:$0xff]  ;;  %v365_v24 = vld [vmem:[%s322_s23 + $0x40] sm:$0xff] }
  0x12   : > { %v366_v25 = vld [vmem:[%s322_s23 + $0x48] sm:$0xff]  ;;  %v367_v26 = vld [vmem:[%s322_s23 + $0x50] sm:$0xff]  ;;  %v368_v29 = vld [vmem:[%s322_s23 + $0x58] sm:$0xff] }
  0x13   : > { %v369_v30 = vld [vmem:[%s322_s23 + $0x60] sm:$0xff]  ;;  %v370_v31 = vld [vmem:[%s322_s23 + $0x68] sm:$0xff] }
  0x15   : > { %387 = vset.pattern.permute.xlu0 %v401_v3  ;;  %389 = vset.pattern.permute.xlu1 %v402_v4 }
  0x16   : > { %240 = vperm.xlu0 %387, %v194_v0   ;;  %251 = vperm.xlu1 %389, %v194_v0  }
  0x1e   : > { %390 = vset.pattern.permute.xlu0 %v402_v4 }
  0x7f   : > { %v205_v6 = vpop.permute.xlu0 %204  ;;  %v216_v8 = vpop.permute.xlu1 %215 }
  0x80   : > { %v207_v11 = vmul.f32 %v205_v6, %v195_v5  ;;  %v208_v15 = vmul.f32 %v205_v6, %v196_v7  ;;  %v209_v16 = vmul.f32 %v205_v6, %v197_v9  ;;  %v210_v17 = vmul.f32 %v205_v6, %v198_v10 }
  0x81   : > { %v211_v18 = vmul.f32 %v205_v6, %v199_v12  ;;  %v212_v19 = vmul.f32 %v205_v6, %v200_v13  ;;  %v213_v20 = vmul.f32 %v205_v6, %v201_v14 }
  0x82   : > { %v218_v21 = vadd.f32 %v216_v8, %v207_v11  ;;  %v219_v23 = vadd.f32 %v216_v8, %v208_v15  ;;  %v220_v27 = vadd.f32 %v216_v8, %v209_v16  ;;  %v221_v28 = vadd.f32 %v216_v8, %v210_v17 }
  0x83   : > { %v222_v32 = vadd.f32 %v216_v8, %v211_v18  ;;  %v223_v33 = vadd.f32 %v216_v8, %v212_v19  ;;  %v224_v34 = vadd.f32 %v216_v8, %v213_v20 }
  0x84   : > { %v225_v35 = vmax.f32 %v218_v21, 0.0  ;;  %v226_v42 = vmax.f32 %v219_v23, 0.0  ;;  %v227_v50 = vmax.f32 %v220_v27, 0.0  ;;  %v228_v58 = vmax.f32 %v221_v28, 0.0 }
  0x85   : > { %v229_v59 = vmax.f32 %v222_v32, 0.0  ;;  %v230_v2 = vmax.f32 %v223_v33, 0.0  ;;  %v231_v4 = vmax.f32 %v224_v34, 0.0 }
  0x88   : > { %v241_v36 = vpop.permute.xlu0 %240  ;;  %v252_v37 = vpop.permute.xlu1 %251 }
  0x89   : > { %v243_v38 = vmul.f32 %v364_v22, %v241_v36  ;;  %v244_v39 = vmul.f32 %v365_v24, %v241_v36  ;;  %v245_v40 = vmul.f32 %v366_v25, %v241_v36  ;;  %v246_v41 = vmul.f32 %v367_v26, %v241_v36 }
  0x8a   : > { %v247_v43 = vmul.f32 %v368_v29, %v241_v36  ;;  %v248_v44 = vmul.f32 %v369_v30, %v241_v36  ;;  %v249_v45 = vmul.f32 %v370_v31, %v241_v36 }
  0x8b   : > { %v254_v46 = vadd.f32 %v252_v37, %v243_v38  ;;  %v255_v47 = vadd.f32 %v252_v37, %v244_v39  ;;  %v256_v48 = vadd.f32 %v252_v37, %v245_v40  ;;  %v257_v49 = vadd.f32 %v252_v37, %v246_v41 }
  0x8c   : > { %v258_v51 = vadd.f32 %v252_v37, %v247_v43  ;;  %v259_v52 = vadd.f32 %v252_v37, %v248_v44  ;;  %v260_v53 = vadd.f32 %v252_v37, %v249_v45 }
  0x8d   : > { %v261_v54 = vmax.f32 %v254_v46, 0.0  ;;  %v262_v55 = vmax.f32 %v255_v47, 0.0  ;;  %v263_v56 = vmax.f32 %v256_v48, 0.0  ;;  %v264_v57 = vmax.f32 %v257_v49, 0.0 }
  0x8e   : > { %v265_v60 = vmax.f32 %v258_v51, 0.0  ;;  %v266_v61 = vmax.f32 %v259_v52, 0.0  ;;  %v267_v62 = vmax.f32 %v260_v53, 0.0 }
  0x8f   : > { %v268_v63 = vadd.f32 %v261_v54, %v225_v35  ;;  %v269_v0 = vadd.f32 %v262_v55, %v226_v42  ;;  %v270_v1 = vadd.f32 %v263_v56, %v227_v50  ;;  %v271_v3 = vadd.f32 %v264_v57, %v228_v58 }
  0x90   : > { %v272_v5 = vadd.f32 %v265_v60, %v229_v59  ;;  %v273_v6 = vadd.f32 %v266_v61, %v230_v2  ;;  %v274_v7 = vadd.f32 %v267_v62, %v231_v4 }
  0x91   : > { %275 = vst [vmem:[%s193_s26] sm:$0xff] %v268_v63 }
  0x92   : > { %276 = vst [vmem:[%s193_s26 + $0x8] sm:$0xff] %v269_v0 }
  0x93   : > { %277 = vst [vmem:[%s193_s26 + $0x10] sm:$0xff] %v270_v1 }
  0x94   : > { %278 = vst [vmem:[%s193_s26 + $0x18] sm:$0xff] %v271_v3 }
  0x95   : > { %279 = vst [vmem:[%s193_s26 + $0x20] sm:$0xff] %v272_v5 }
  0x96   : > { %280 = vst [vmem:[%s193_s26 + $0x28] sm:$0xff] %v273_v6 }
  0x97   : > { %282 = vst.msk [vmem:[%s193_s26 + $0x30] sm:$0xff] %vm281_vm0, %v274_v7 }
  0x98 PF: > { %s13_s12 = sadd.s32 1, %s397_s12  }
  0x99   : > { %p10_p4 = scmp.ge.s32.totalorder %s13_s12, 4  }
  0x9b   :  { %12 = sbr.rel (!%p10_p4) target bundleno = 1 (0x1), region = 65 }

// kernel: residual_block.3
= control target key start
LH: loop header
LB: loop body
LE: loop exit
PB: predicated region body
PF: predicated region fallthrough
CT: control target
= control target key end

     0   :  { %s2342_s15 = smov 0   ;;  %s3010_s0 = inlined_call_operand.vmem [shape: bf16[2,4,1000], index: 0, kind: input, shape index: {}]   ;;  %s3011_s1 = inlined_call_operand.vmem [shape: bf16[16,108], index: 1, kind: input, shape index: {}]   ;;  %s3012_s2 = inlined_call_operand.vmem [shape: f32[1,778], index: 2, kind: input, shape index: {}]   ;;  %s3013_s3 = inlined_call_operand.vmem [shape: f32[2,16,778], index: 3, kind: output, shape index: {0}]   ;;  %s3014_s4 = inlined_call_operand.vmem [shape: f32[2,16,2], index: 4, kind: output, shape index: {1}]  }
   0x1 LB: > { %s1977_s16 = sadd.s32 4294967295, %s2289_s15   ;;  %p1981_p0 = scmp.ge.s32.totalorder %s2289_s15, 1  ;;  %s2289_s15 = sphi %s2342_s15, %s15_s15  }
   0x2   : > { %p165_p1 = scmp.lt.s32.totalorder %s2289_s15, 3 }
   0x4   : > { %p166_p2 = pnand %p1981_p0, %p165_p1 }
   0x5   : > { %p196_p3 = scmp.lt.s32.totalorder (!%p166_p2), %s1977_s16, 1  ;;  %s2291_s21 = smov (!%p166_p2), 127  }
   0x6   : > { %169 = sbr.rel (%p166_p2) target bundleno = 711 (0x2c7), region = 32  ;;  %s2292_s22 = smov (!%p166_p2), 126  }
   0x7   : > { %s2293_s23 = smov (!%p166_p2), 118   ;;  %s2294_s24 = smov (!%p166_p2), 117  }
   0x8   : > { %s2295_s25 = smov (!%p166_p2), 116   ;;  %s2296_s26 = smov (!%p166_p2), 108  }
   0x9   : > { %s2297_s27 = smov (!%p166_p2), 107   ;;  %s2298_s28 = smov (!%p166_p2), 106  }
   0xa   : > { %s2299_s29 = smov (!%p166_p2), 28   ;;  %s2300_s30 = smov (!%p166_p2), 27  }
   0xb   : > { %s3034_s16 = smov (!%p196_p3, %s1977_s16), 1  ;;  %s2301_s5 = smov 26   ;;  %vm230_vm0 = vcmask 74752   ;;  %vm260_vm1 = vcmask 1043456   ;;  %vm305_vm2 = vcmask 1031168   ;;  %vm275_vm3 = vcmask 76802  }
   0xc   : > { %s2196_s17 = sshll.u32 %s3034_s16, 4  ;;  %s2302_s6 = smov 18   ;;  %vm262_vm4 = vcmask 1039360   ;;  %vm348_vm5 = vcmask 965632   ;;  %vm390_vm6 = vcmask 957440   ;;  %vm3021_vm7 = vcmask 949248  }
   0xd   : > { %s2358_s20 = scalar_lea.vmem %s3010_s0, %s2196_s17  ;;  %s2303_s7 = smov 17   ;;  %vm475_vm8 = vcmask 883712   ;;  %vm518_vm9 = vcmask 875520   ;;  %vm3018_vm10 = vcmask 867328   ;;  %vm603_vm11 = vcmask 228352  }
   0xe   : > { %v213_v0 = vld [vmem:[%s2358_s20 + $0x8] sm:$0x3f]  ;;  %v2362_v1 = vld [vmem:[%s2358_s20] sm:$0xff]  ;;  %s2304_s8 = smov 16   ;;  %s2305_s9 = smov 8   ;;  %vm3015_vm12 = vcmask 220160  }
   0xf   : > { %218 = vst [vmem:[#allocation1 + $0x10] ss:$2 sm:$0xff] %v213_v0  ;;  %v233_v2 = vld [vmem:[%s2358_s20 + $0x8] sm:$0x3f]  ;;  %s2306_s10 = smov 7   ;;  %s2307_s11 = smov 6  }
  0x10   : > { %215 = vst [vmem:[#allocation1] ss:$2 sm:$0xff] %v2362_v1  ;;  %v278_v7 = vld [vmem:[%s2358_s20 + $0x8] sm:$0x3f]  ;;  %s2308_s12 = smov 56   ;;  %s2309_s13 = smov 55  }
  0x11   : > { %v320_v12 = vld [vmem:[%s2358_s20 + $0x8] sm:$0x3f]  ;;  %s2310_s14 = smov 54   ;;  %s2311_s18 = smov 46   ;;  %vm3016_vm13 = vcmask 211968   ;;  %vm3020_vm14 = vcmask 146432  }
  0x12   : > { %v363_v17 = vld [vmem:[%s2358_s20 + $0x8] sm:$0x3f]  ;;  %s2312_s19 = smov 45   ;;  %vm773_vm15 = vcmask 138240  }
  0x13   : > { %v405_v22 = vld [vmem:[%s2358_s20 + $0x8] sm:$0x3f] }
  0x14   : > { %v448_v27 = vld [vmem:[%s2358_s20 + $0x8] sm:$0x3f] }
  0x15   : > { %v490_v32 = vld [vmem:[%s2358_s20 + $0x8] sm:$0x3f] }
  0x16   : > { %v221_v3 = vld.sshfl [vmem:[#allocation1 + $0x10] sm:$0xff pattern:$0x75643120]  ;;  %v2366_v4 = vld.sshfl [vmem:[#allocation1 + $0x18] sm:$0xff pattern:$0x75643120] }
  0x17   : > { %239 = vst [vmem:[#allocation1 + $0x11] ss:$2 sm:$0xff] %v233_v2  ;;  %v219_v5 = vld.sshfl [vmem:[#allocation1] sm:$0xff pattern:$0x75643120] }
  0x18   : > { %229 = vst [vmem:[#allocation2 + $0x10] sm:$0x33] %v221_v3  ;;  %v220_v6 = vld.sshfl [vmem:[#allocation1 + $0x8] sm:$0xff pattern:$0x75643120] }
  0x19   : > { %236 = vst [vmem:[#allocation1 + $0x1] ss:$2 sm:$0xff] %v2362_v1  ;;  %v533_v37 = vld [vmem:[%s2358_s20 + $0x8] sm:$0x3f] }
  0x1a   : > { %227 = vst [vmem:[#allocation2] sm:$0x33] %v219_v5  ;;  %v575_v42 = vld [vmem:[%s2358_s20 + $0x8] sm:$0x3f] }
  0x1b   : > { %228 = vst [vmem:[#allocation2 + $0x8] sm:$0x33] %v220_v6  ;;  %v618_v47 = vld [vmem:[%s2358_s20 + $0x8] sm:$0x3f] }
  0x1c   : > { %v660_v52 = vld [vmem:[%s2358_s20 + $0x8] sm:$0x3f]  ;;  %231 = vst.msk [vmem:[#allocation2 + $0x18] sm:$0x3] %vm230_vm0, %v2366_v4 }
  0x1d   : > { %v703_v57 = vld [vmem:[%s2358_s20 + $0x8] sm:$0x3f] }
  0x1e   : > { %v244_v8 = vld.sshfl [vmem:[#allocation1 + $0x10] sm:$0xff pattern:$0x75643120]  ;;  %v246_v9 = vld.sshfl [vmem:[#allocation1 + $0x18] sm:$0xff pattern:$0x75643120] }
  0x1f   : > { %252 = vrot.lane.b32.xlu1 %v244_v8, %s2291_s21  ;;  %283 = vst [vmem:[#allocation1 + $0x10] ss:$2 sm:$0xff] %v278_v7  ;;  %v745_v62 = vld [vmem:[%s2358_s20 + $0x8] sm:$0x3f] }
  0x20   : > { %v240_v10 = vld.sshfl [vmem:[#allocation1] sm:$0xff pattern:$0x75643120]  ;;  %v242_v11 = vld.sshfl [vmem:[#allocation1 + $0x8] sm:$0xff pattern:$0x75643120] }
  0x21   : > { %248 = vrot.lane.b32.xlu0 %v240_v10, %s2291_s21  ;;  %280 = vst [vmem:[#allocation1] ss:$2 sm:$0xff] %v2362_v1  ;;  %v788_v5 = vld [vmem:[%s2358_s20 + $0x8] sm:$0x3f] }
  0x26   : > { %v290_v13 = vld.sshfl [vmem:[#allocation1 + $0x18] sm:$0xff pattern:$0x75643120]  ;;  %v288_v14 = vld.sshfl [vmem:[#allocation1 + $0x10] sm:$0xff pattern:$0x75643120] }
  0x27   : > { %254 = vrot.lane.b32.xlu1 %v246_v9, %s2291_s21  ;;  %326 = vst [vmem:[#allocation1 + $0x11] ss:$2 sm:$0xff] %v320_v12 }
  0x28   : > { %v284_v15 = vld.sshfl [vmem:[#allocation1] sm:$0xff pattern:$0x75643120]  ;;  %v286_v16 = vld.sshfl [vmem:[#allocation1 + $0x8] sm:$0xff pattern:$0x75643120] }
  0x29   : > { %250 = vrot.lane.b32.xlu0 %v242_v11, %s2291_s21  ;;  %292 = vrot.lane.b32.xlu2 %v284_v15, %s2292_s22  ;;  %323 = vst [vmem:[#allocation1 + $0x1] ss:$2 sm:$0xff] %v2362_v1  ;;  %v830_v11 = vld [vmem:[%s2358_s20 + $0x8] sm:$0xff]  ;;  %s2313_s21 = smov 44  }
  0x2e   : > { %v331_v18 = vld.sshfl [vmem:[#allocation1 + $0x10] sm:$0xff pattern:$0x75643120]  ;;  %v333_v19 = vld.sshfl [vmem:[#allocation1 + $0x18] sm:$0xff pattern:$0x75643120] }
  0x2f   : > { %298 = vrot.lane.b32.xlu1 %v290_v13, %s2292_s22  ;;  %368 = vst [vmem:[#allocation1 + $0x10] ss:$2 sm:$0xff] %v363_v17 }
  0x30   : > { %v329_v20 = vld.sshfl [vmem:[#allocation1 + $0x8] sm:$0xff pattern:$0x75643120]  ;;  %v327_v21 = vld.sshfl [vmem:[#allocation1] sm:$0xff pattern:$0x75643120] }
  0x31   : > { %296 = vrot.lane.b32.xlu0 %v288_v14, %s2292_s22  ;;  %294 = vrot.lane.b32.xlu2 %v286_v16, %s2292_s22  ;;  %365 = vst [vmem:[#allocation1] ss:$2 sm:$0xff] %v2362_v1  ;;  %s2314_s22 = smov 36  }
  0x36   : > { %v373_v23 = vld.sshfl [vmem:[#allocation1 + $0x10] sm:$0xff pattern:$0x75643120]  ;;  %v375_v24 = vld.sshfl [vmem:[#allocation1 + $0x18] sm:$0xff pattern:$0x75643120] }
  0x37   : > { %339 = vrot.lane.b32.xlu1 %v331_v18, %s2293_s23  ;;  %411 = vst [vmem:[#allocation1 + $0x11] ss:$2 sm:$0xff] %v405_v22 }
  0x38   : > { %v371_v25 = vld.sshfl [vmem:[#allocation1 + $0x8] sm:$0xff pattern:$0x75643120]  ;;  %v369_v26 = vld.sshfl [vmem:[#allocation1] sm:$0xff pattern:$0x75643120] }
  0x39   : > { %337 = vrot.lane.b32.xlu0 %v329_v20, %s2293_s23  ;;  %335 = vrot.lane.b32.xlu2 %v327_v21, %s2293_s23  ;;  %408 = vst [vmem:[#allocation1 + $0x1] ss:$2 sm:$0xff] %v2362_v1 }
  0x3e   : > { %v416_v28 = vld.sshfl [vmem:[#allocation1 + $0x10] sm:$0xff pattern:$0x75643120]  ;;  %v2378_v29 = vld.sshfl [vmem:[#allocation1 + $0x18] sm:$0xff pattern:$0x75643120] }
  0x3f   : > { %379 = vrot.lane.b32.xlu1 %v371_v25, %s2294_s24  ;;  %453 = vst [vmem:[#allocation1 + $0x10] ss:$2 sm:$0xff] %v448_v27 }
  0x40   : > { %v412_v30 = vld.sshfl [vmem:[#allocation1] sm:$0xff pattern:$0x75643120]  ;;  %v414_v31 = vld.sshfl [vmem:[#allocation1 + $0x8] sm:$0xff pattern:$0x75643120] }
  0x41   : > { %341 = vrot.lane.b32.xlu2 %v333_v19, %s2293_s23  ;;  %377 = vrot.lane.b32.xlu0 %v369_v26, %s2294_s24  ;;  %450 = vst [vmem:[#allocation1] ss:$2 sm:$0xff] %v2362_v1  ;;  %s2315_s23 = smov 35  }
  0x46   : > { %v458_v33 = vld.sshfl [vmem:[#allocation1 + $0x10] sm:$0xff pattern:$0x75643120]  ;;  %v2382_v34 = vld.sshfl [vmem:[#allocation1 + $0x18] sm:$0xff pattern:$0x75643120] }
  0x47   : > { %420 = vrot.lane.b32.xlu1 %v412_v30, %s2295_s25  ;;  %496 = vst [vmem:[#allocation1 + $0x11] ss:$2 sm:$0xff] %v490_v32 }
  0x48   : > { %v456_v35 = vld.sshfl [vmem:[#allocation1 + $0x8] sm:$0xff pattern:$0x75643120]  ;;  %v2385_v36 = vld.sshfl [vmem:[#allocation1] sm:$0xff pattern:$0x75643120] }
  0x49   : > { %381 = vrot.lane.b32.xlu2 %v373_v23, %s2294_s24  ;;  %383 = vrot.lane.b32.xlu0 %v375_v24, %s2294_s24  ;;  %493 = vst [vmem:[#allocation1 + $0x1] ss:$2 sm:$0xff] %v2362_v1 }
  0x4e   : > { %v501_v38 = vld.sshfl [vmem:[#allocation1 + $0x10] sm:$0xff pattern:$0x75643120]  ;;  %v2389_v39 = vld.sshfl [vmem:[#allocation1 + $0x18] sm:$0xff pattern:$0x75643120] }
  0x4f   : > { %464 = vrot.lane.b32.xlu1 %v456_v35, %s2296_s26  ;;  %538 = vst [vmem:[#allocation1 + $0x10] ss:$2 sm:$0xff] %v533_v37 }
  0x50   : > { %v499_v40 = vld.sshfl [vmem:[#allocation1 + $0x8] sm:$0xff pattern:$0x75643120]  ;;  %v2392_v41 = vld.sshfl [vmem:[#allocation1] sm:$0xff pattern:$0x75643120] }
  0x51   : > { %424 = vrot.lane.b32.xlu0 %v416_v28, %s2295_s25  ;;  %422 = vrot.lane.b32.xlu2 %v414_v31, %s2295_s25  ;;  %535 = vst [vmem:[#allocation1] ss:$2 sm:$0xff] %v2362_v1 }
  0x56   : > { %v543_v43 = vld.sshfl [vmem:[#allocation1 + $0x10] sm:$0xff pattern:$0x75643120]  ;;  %v2398_v44 = vld.sshfl [vmem:[#allocation1 + $0x18] sm:$0xff pattern:$0x75643120] }
  0x57   : > { %509 = vrot.lane.b32.xlu1 %v501_v38, %s2297_s27  ;;  %581 = vst [vmem:[#allocation1 + $0x11] ss:$2 sm:$0xff] %v575_v42 }
  0x58   : > { %v541_v45 = vld.sshfl [vmem:[#allocation1 + $0x8] sm:$0xff pattern:$0x75643120]  ;;  %v539_v46 = vld.sshfl [vmem:[#allocation1] sm:$0xff pattern:$0x75643120] }
  0x59   : > { %466 = vrot.lane.b32.xlu2 %v458_v33, %s2296_s26  ;;  %507 = vrot.lane.b32.xlu0 %v499_v40, %s2297_s27  ;;  %578 = vst [vmem:[#allocation1 + $0x1] ss:$2 sm:$0xff] %v2362_v1 }
  0x5e   : > { %v586_v48 = vld.sshfl [vmem:[#allocation1 + $0x10] sm:$0xff pattern:$0x75643120]  ;;  %v2405_v49 = vld.sshfl [vmem:[#allocation1 + $0x18] sm:$0xff pattern:$0x75643120] }
  0x5f   : > { %547 = vrot.lane.b32.xlu1 %v539_v46, %s2298_s28  ;;  %623 = vst [vmem:[#allocation1 + $0x10] ss:$2 sm:$0xff] %v618_v47 }
  0x60   : > { %v584_v50 = vld.sshfl [vmem:[#allocation1 + $0x8] sm:$0xff pattern:$0x75643120]  ;;  %v582_v51 = vld.sshfl [vmem:[#allocation1] sm:$0xff pattern:$0x75643120] }
  0x61   : > { %551 = vrot.lane.b32.xlu0 %v543_v43, %s2298_s28  ;;  %549 = vrot.lane.b32.xlu2 %v541_v45, %s2298_s28  ;;  %620 = vst [vmem:[#allocation1] ss:$2 sm:$0xff] %v2362_v1 }
  0x66   : > { %v628_v53 = vld.sshfl [vmem:[#allocation1 + $0x10] sm:$0xff pattern:$0x75643120]  ;;  %v2412_v54 = vld.sshfl [vmem:[#allocation1 + $0x18] sm:$0xff pattern:$0x75643120] }
  0x67   : > { %592 = vrot.lane.b32.xlu1 %v584_v50, %s2299_s29  ;;  %666 = vst [vmem:[#allocation1 + $0x11] ss:$2 sm:$0xff] %v660_v52  ;;  %v961_v52 = vld [vmem:[%s2358_s20 + $0xa] sm:$0x3f] }
  0x68   : > { %v626_v55 = vld.sshfl [vmem:[#allocation1 + $0x8] sm:$0xff pattern:$0x75643120]  ;;  %v624_v56 = vld.sshfl [vmem:[#allocation1] sm:$0xff pattern:$0x75643120] }
  0x69   : > { %594 = vrot.lane.b32.xlu2 %v586_v48, %s2299_s29  ;;  %634 = vrot.lane.b32.xlu0 %v626_v55, %s2300_s30  ;;  %663 = vst [vmem:[#allocation1 + $0x1] ss:$2 sm:$0xff] %v2362_v1  ;;  %v2479_v55 = vld [vmem:[%s2358_s20 + $0x2] sm:$0xff] }
  0x6e   : > { %v671_v58 = vld.sshfl [vmem:[#allocation1 + $0x10] sm:$0xff pattern:$0x75643120]  ;;  %v2419_v59 = vld.sshfl [vmem:[#allocation1 + $0x18] sm:$0xff pattern:$0x75643120] }
  0x6f   : > { %636 = vrot.lane.b32.xlu1 %v628_v53, %s2300_s30  ;;  %708 = vst [vmem:[#allocation1 + $0x10] ss:$2 sm:$0xff] %v703_v57 }
  0x70   : > { %v669_v60 = vld.sshfl [vmem:[#allocation1 + $0x8] sm:$0xff pattern:$0x75643120]  ;;  %v667_v61 = vld.sshfl [vmem:[#allocation1] sm:$0xff pattern:$0x75643120] }
  0x71   : > { %590 = vrot.lane.b32.xlu2 %v582_v51, %s2299_s29  ;;  %632 = vrot.lane.b32.xlu0 %v624_v56, %s2300_s30  ;;  %705 = vst [vmem:[#allocation1] ss:$2 sm:$0xff] %v2362_v1 }
  0x76   : > { %v713_v63 = vld.sshfl [vmem:[#allocation1 + $0x10] sm:$0xff pattern:$0x75643120]  ;;  %v2426_v0 = vld.sshfl [vmem:[#allocation1 + $0x18] sm:$0xff pattern:$0x75643120] }
  0x77   : > { %675 = vrot.lane.b32.xlu1 %v667_v61, %s2301_s5  ;;  %751 = vst [vmem:[#allocation1 + $0x11] ss:$2 sm:$0xff] %v745_v62 }
  0x78   : > { %v711_v2 = vld.sshfl [vmem:[#allocation1 + $0x8] sm:$0xff pattern:$0x75643120]  ;;  %v709_v3 = vld.sshfl [vmem:[#allocation1] sm:$0xff pattern:$0x75643120] }
  0x79   : > { %679 = vrot.lane.b32.xlu0 %v671_v58, %s2301_s5  ;;  %677 = vrot.lane.b32.xlu2 %v669_v60, %s2301_s5  ;;  %748 = vst [vmem:[#allocation1 + $0x1] ss:$2 sm:$0xff] %v2362_v1 }
  0x7e   : > { %v756_v6 = vld.sshfl [vmem:[#allocation1 + $0x10] sm:$0xff pattern:$0x75643120]  ;;  %v2435_v7 = vld.sshfl [vmem:[#allocation1 + $0x18] sm:$0xff pattern:$0x75643120] }
  0x7f   : > { %717 = vrot.lane.b32.xlu1 %v709_v3, %s2302_s6  ;;  %793 = vst [vmem:[#allocation1 + $0x10] ss:$2 sm:$0xff] %v788_v5 }
  0x80   : > { %v754_v8 = vld.sshfl [vmem:[#allocation1 + $0x8] sm:$0xff pattern:$0x75643120]  ;;  %v752_v9 = vld.sshfl [vmem:[#allocation1] sm:$0xff pattern:$0x75643120] }
  0x81   : > { %721 = vrot.lane.b32.xlu0 %v713_v63, %s2302_s6  ;;  %719 = vrot.lane.b32.xlu2 %v711_v2, %s2302_s6  ;;  %790 = vst [vmem:[#allocation1] ss:$2 sm:$0xff] %v2362_v1 }
  0x83   : > { %v293_v10 = vpop.permute.xlu2 %292 }
  0x84   : > { %v300_v15 = vrot.slane %v293_v10, 4 }
  0x86   : > { %v798_v12 = vld.sshfl [vmem:[#allocation1 + $0x10] sm:$0xff pattern:$0x75643120]  ;;  %v2442_v13 = vld.sshfl [vmem:[#allocation1 + $0x18] sm:$0xff pattern:$0x75643120] }
  0x87   : > { %762 = vrot.lane.b32.xlu1 %v754_v8, %s2303_s7  ;;  %836 = vst [vmem:[#allocation1 + $0x11] ss:$2 sm:$0xff] %v830_v11 }
  0x88   : > { %v796_v4 = vld.sshfl [vmem:[#allocation1 + $0x8] sm:$0xff pattern:$0x75643120]  ;;  %v794_v14 = vld.sshfl [vmem:[#allocation1] sm:$0xff pattern:$0x75643120] }
  0x89   : > { %764 = vrot.lane.b32.xlu2 %v756_v6, %s2303_s7  ;;  %804 = vrot.lane.b32.xlu0 %v796_v4, %s2304_s8  ;;  %833 = vst [vmem:[#allocation1 + $0x1] ss:$2 sm:$0xff] %v2362_v1 }
  0x8b   : > { %v2448_v16 = vpop.permute.xlu2 %294 }
  0x8c   : > { %v301_v17 = vrot.slane %v2448_v16, 4 }
  0x8e   : > { %v304_v18 = vsel %vm260_vm1, %v300_v15, %v301_v17  ;;  %v841_v19 = vld.sshfl [vmem:[#allocation1 + $0x10] sm:$0xff pattern:$0x75643120]  ;;  %v2454_v20 = vld.sshfl [vmem:[#allocation1 + $0x18] sm:$0xff pattern:$0x75643120] }
  0x8f   : > { %806 = vrot.lane.b32.xlu1 %v798_v12, %s2304_s8  ;;  %879 = vst [vmem:[#allocation1 + $0x10] ss:$2 sm:$0xff] %v830_v11  ;;  %v306_v21 = vsel %vm305_vm2, %v293_v10, %v304_v18  ;;  %v1003_v12 = vld [vmem:[%s2358_s20 + $0xa] sm:$0x3f] }
  0x90   : > { %v839_v22 = vld.sshfl [vmem:[#allocation1 + $0x8] sm:$0xff pattern:$0x75643120]  ;;  %v837_v23 = vld.sshfl [vmem:[#allocation1] sm:$0xff pattern:$0x75643120] }
  0x91   : > { %760 = vrot.lane.b32.xlu2 %v752_v9, %s2303_s7  ;;  %802 = vrot.lane.b32.xlu0 %v794_v14, %s2304_s8  ;;  %v253_v24 = vpop.permute.xlu1 %252  ;;  %876 = vst [vmem:[#allocation1] ss:$2 sm:$0xff] %v2362_v1 }
  0x92   : > { %315 = vst [vmem:[#allocation2 + $0x1c] sm:$0x33] %v306_v21  ;;  %v258_v33 = vrot.slane %v253_v24, 4 }
  0x93   : > { %v249_v25 = vpop.permute.xlu0 %248  ;;  %v2461_v26 = vpop.permute.xlu2 %335 }
  0x94   : > { %v256_v40 = vrot.slane %v249_v25, 4  ;;  %v343_v8 = vrot.slane %v2461_v26, 4 }
  0x96   : > { %v884_v27 = vld.sshfl [vmem:[#allocation1 + $0x10] sm:$0xff pattern:$0x75643120]  ;;  %v2463_v28 = vld.sshfl [vmem:[#allocation1 + $0x18] sm:$0xff pattern:$0x75643120] }
  0x97   : > { %845 = vrot.lane.b32.xlu1 %v837_v23, %s2305_s9  ;;  %923 = vst [vmem:[#allocation1 + $0x11] ss:$2 sm:$0xff] %v830_v11 }
  0x98   : > { %v882_v30 = vld.sshfl [vmem:[#allocation1 + $0x8] sm:$0xff pattern:$0x75643120]  ;;  %v880_v31 = vld.sshfl [vmem:[#allocation1] sm:$0xff pattern:$0x75643120] }
  0x99   : > { %849 = vrot.lane.b32.xlu0 %v841_v19, %s2305_s9  ;;  %847 = vrot.lane.b32.xlu2 %v839_v22, %s2305_s9  ;;  %v255_v32 = vpop.permute.xlu1 %254  ;;  %920 = vst [vmem:[#allocation1 + $0x1] ss:$2 sm:$0xff] %v2362_v1 }
  0x9a   : > { %v259_v35 = vrot.slane %v255_v32, 4  ;;  %276 = vst.msk [vmem:[#allocation2 + $0x18] sm:$0xc] %vm275_vm3, %v255_v32 }
  0x9b   : > { %v251_v37 = vpop.permute.xlu0 %250  ;;  %v342_v38 = vpop.permute.xlu2 %341 }
  0x9c   : > { %v266_v42 = vsel %vm260_vm1, %v258_v33, %v259_v35  ;;  %v257_v43 = vrot.slane %v251_v37, 4  ;;  %361 = vst.msk [vmem:[#allocation2 + $0x34] sm:$0xc] %vm275_vm3, %v342_v38  ;;  %v346_v6 = vrot.slane %v342_v38, 4  ;;  %v1046_v38 = vld [vmem:[%s2358_s20 + $0xa] sm:$0x3f] }
  0x9d   : > { %v267_v45 = vsel %vm262_vm4, %v253_v24, %v266_v42 }
  0x9e   : > { %274 = vst [vmem:[#allocation2 + $0x10] sm:$0xcc] %v267_v45  ;;  %v261_v46 = vsel %vm260_vm1, %v256_v40, %v257_v43  ;;  %v264_v1 = vsel %vm260_vm1, %v257_v43, %v258_v33  ;;  %v928_v50 = vld.sshfl [vmem:[#allocation1 + $0x10] sm:$0xff pattern:$0x75643120] }
  0x9f   : > { %v263_v47 = vsel %vm262_vm4, %v249_v25, %v261_v46  ;;  %v265_v48 = vsel %vm262_vm4, %v251_v37, %v264_v1  ;;  %888 = vrot.lane.b32.xlu1 %v880_v31, %s2306_s10  ;;  %v2475_v51 = vld.sshfl [vmem:[#allocation1 + $0x18] sm:$0xff pattern:$0x75643120]  ;;  %vm3019_vm4 = vcmask 64512  }
  0xa0   : > { %272 = vst [vmem:[#allocation2] sm:$0xcc] %v263_v47  ;;  %v926_v53 = vld.sshfl [vmem:[#allocation1 + $0x8] sm:$0xff pattern:$0x75643120] }
  0xa1   : > { %273 = vst [vmem:[#allocation2 + $0x8] sm:$0xcc] %v265_v48  ;;  %892 = vrot.lane.b32.xlu0 %v884_v27, %s2306_s10  ;;  %890 = vrot.lane.b32.xlu2 %v882_v30, %s2306_s10  ;;  %v299_v56 = vpop.permute.xlu1 %298  ;;  %v924_v57 = vld.sshfl [vmem:[#allocation1] sm:$0xff pattern:$0x75643120] }
  0xa2   : > { %v303_v58 = vrot.slane %v299_v56, 4  ;;  %318 = vst.msk [vmem:[#allocation2 + $0x34] sm:$0x3] %vm230_vm0, %v299_v56 }
  0xa3   : > { %v297_v60 = vpop.permute.xlu0 %296  ;;  %v2484_v61 = vpop.permute.xlu2 %381  ;;  %963 = vst [vmem:[#allocation1] ss:$2 sm:$0xff] %v2479_v55 }
  0xa4   : > { %v302_v62 = vrot.slane %v297_v60, 4  ;;  %966 = vst [vmem:[#allocation1 + $0x10] ss:$2 sm:$0xff] %v961_v52  ;;  %v387_v27 = vrot.slane %v2484_v61, 4 }
  0xa6   : > { %v307_v63 = vsel %vm260_vm1, %v301_v17, %v302_v62  ;;  %v309_v2 = vsel %vm260_vm1, %v302_v62, %v303_v58 }
  0xa7   : > { %v308_v3 = vsel %vm305_vm2, %v2448_v16, %v307_v63  ;;  %v310_v5 = vsel %vm305_vm2, %v297_v60, %v309_v2  ;;  %934 = vrot.lane.b32.xlu1 %v926_v53, %s2307_s11  ;;  %v1088_v60 = vld [vmem:[%s2358_s20 + $0xa] sm:$0x3f]  ;;  %vm3017_vm2 = vcmask 130048  }
  0xa8   : > { %316 = vst [vmem:[#allocation2 + $0x24] sm:$0x33] %v308_v3 }
  0xa9   : > { %317 = vst [vmem:[#allocation2 + $0x2c] sm:$0x33] %v310_v5  ;;  %936 = vrot.lane.b32.xlu2 %v928_v50, %s2307_s11  ;;  %v340_v9 = vpop.permute.xlu1 %339 }
  0xaa   : > { %v969_v10 = vld.sshfl [vmem:[#allocation1 + $0x8] sm:$0xff pattern:$0x75643120]  ;;  %v345_v11 = vrot.slane %v340_v9, 4 }
  0xab   : > { %977 = vrot.lane.b32.xlu0 %v969_v10, %s2308_s12  ;;  %v338_v4 = vpop.permute.xlu0 %337  ;;  %v2499_v14 = vpop.permute.xlu2 %422  ;;  %v971_v15 = vld.sshfl [vmem:[#allocation1 + $0x10] sm:$0xff pattern:$0x75643120]  ;;  %v2501_v16 = vld.sshfl [vmem:[#allocation1 + $0x18] sm:$0xff pattern:$0x75643120] }
  0xac   : > { %v352_v17 = vsel %vm260_vm1, %v345_v11, %v346_v6  ;;  %v344_v18 = vrot.slane %v338_v4, 4  ;;  %v967_v19 = vld.sshfl [vmem:[#allocation1] sm:$0xff pattern:$0x75643120]  ;;  %1009 = vst [vmem:[#allocation1 + $0x11] ss:$2 sm:$0xff] %v1003_v12 }
  0xad   : > { %v353_v21 = vsel %vm348_vm5, %v340_v9, %v352_v17  ;;  %1006 = vst [vmem:[#allocation1 + $0x1] ss:$2 sm:$0xff] %v2479_v55  ;;  %v429_v47 = vrot.slane %v2499_v14, 4 }
  0xae   : > { %360 = vst [vmem:[#allocation2 + $0x2c] sm:$0xcc] %v353_v21  ;;  %v347_v22 = vsel %vm260_vm1, %v343_v8, %v344_v18  ;;  %v350_v23 = vsel %vm260_vm1, %v344_v18, %v345_v11 }
  0xaf   : > { %v349_v24 = vsel %vm348_vm5, %v2461_v26, %v347_v22  ;;  %v351_v25 = vsel %vm348_vm5, %v338_v4, %v350_v23  ;;  %979 = vrot.lane.b32.xlu1 %v971_v15, %s2308_s12  ;;  %vm901_vm5 = vcmask 56320  }
  0xb0   : > { %358 = vst [vmem:[#allocation2 + $0x1c] sm:$0xcc] %v349_v24 }
  0xb1   : > { %359 = vst [vmem:[#allocation2 + $0x24] sm:$0xcc] %v351_v25  ;;  %932 = vrot.lane.b32.xlu2 %v924_v57, %s2307_s11  ;;  %v380_v30 = vpop.permute.xlu1 %379 }
  0xb2   : > { %v386_v31 = vrot.slane %v380_v30, 4 }
  0xb3   : > { %975 = vrot.lane.b32.xlu0 %v967_v19, %s2308_s12  ;;  %v378_v32 = vpop.permute.xlu0 %377  ;;  %v2515_v26 = vpop.permute.xlu2 %466  ;;  %v1014_v37 = vld.sshfl [vmem:[#allocation1 + $0x10] sm:$0xff pattern:$0x75643120]  ;;  %v2520_v42 = vld.sshfl [vmem:[#allocation1 + $0x18] sm:$0xff pattern:$0x75643120] }
  0xb4   : > { %v392_v33 = vsel %vm260_vm1, %v386_v31, %v387_v27  ;;  %v385_v35 = vrot.slane %v378_v32, 4  ;;  %v1012_v45 = vld.sshfl [vmem:[#allocation1 + $0x8] sm:$0xff pattern:$0x75643120]  ;;  %1051 = vst [vmem:[#allocation1 + $0x10] ss:$2 sm:$0xff] %v1046_v38 }
  0xb5   : > { %v393_v40 = vsel %vm390_vm6, %v380_v30, %v392_v33  ;;  %v1010_v1 = vld.sshfl [vmem:[#allocation1] sm:$0xff pattern:$0x75643120]  ;;  %v472_v5 = vrot.slane %v2515_v26, 4  ;;  %v1131_v19 = vld [vmem:[%s2358_s20 + $0xa] sm:$0x3f] }
  0xb6   : > { %401 = vst [vmem:[#allocation2 + $0x40] sm:$0x33] %v393_v40  ;;  %v389_v43 = vsel %vm260_vm1, %v385_v35, %v386_v31 }
  0xb7   : > { %v391_v46 = vsel %vm390_vm6, %v378_v32, %v389_v43  ;;  %1018 = vrot.lane.b32.xlu1 %v1010_v1, %s2309_s13  ;;  %1048 = vst [vmem:[#allocation1] ss:$2 sm:$0xff] %v2479_v55 }
  0xb8   : > { %400 = vst [vmem:[#allocation2 + $0x38] sm:$0x33] %v391_v46 }
  0xb9   : > { %1020 = vrot.lane.b32.xlu2 %v1012_v45, %s2309_s13  ;;  %v421_v48 = vpop.permute.xlu1 %420 }
  0xba   : > { %v428_v50 = vrot.slane %v421_v48, 4 }
  0xbb   : > { %1022 = vrot.lane.b32.xlu0 %v1014_v37, %s2309_s13  ;;  %v384_v52 = vpop.permute.xlu0 %383  ;;  %v2529_v53 = vpop.permute.xlu2 %549  ;;  %v1056_v63 = vld.sshfl [vmem:[#allocation1 + $0x10] sm:$0xff pattern:$0x75643120]  ;;  %v2538_v3 = vld.sshfl [vmem:[#allocation1 + $0x18] sm:$0xff pattern:$0x75643120] }
  0xbc   : > { %v388_v56 = vrot.slane %v384_v52, 4  ;;  %403 = vst.msk [vmem:[#allocation2 + $0x50] sm:$0x3] %vm230_vm0, %v384_v52  ;;  %v432_v57 = vsel %vm260_vm1, %v428_v50, %v429_v47  ;;  %v556_v35 = vrot.slane %v2529_v53, 4  ;;  %v1173_v37 = vld [vmem:[%s2358_s20 + $0xa] sm:$0x3f] }
  0xbd   : > { %v434_v58 = vsel %vm3021_vm7, %v421_v48, %v432_v57  ;;  %1094 = vst [vmem:[#allocation1 + $0x11] ss:$2 sm:$0xff] %v1088_v60 }
  0xbe   : > { %v394_v62 = vsel %vm260_vm1, %v387_v27, %v388_v56  ;;  %443 = vst [vmem:[#allocation2 + $0x38] sm:$0xcc] %v434_v58  ;;  %v1054_v6 = vld.sshfl [vmem:[#allocation1 + $0x8] sm:$0xff pattern:$0x75643120] }
  0xbf   : > { %v395_v2 = vsel %vm390_vm6, %v2484_v61, %v394_v62  ;;  %v1052_v8 = vld.sshfl [vmem:[#allocation1] sm:$0xff pattern:$0x75643120]  ;;  %vm3022_vm6 = vcmask 48128  }
  0xc0   : > { %402 = vst [vmem:[#allocation2 + $0x48] sm:$0x33] %v395_v2  ;;  %1060 = vrot.lane.b32.xlu1 %v1052_v8, %s2310_s14  ;;  %v1216_v2 = vld [vmem:[%s2358_s20 + $0xa] sm:$0x3f] }
  0xc1   : > { %1062 = vrot.lane.b32.xlu2 %v1054_v6, %s2310_s14  ;;  %v2542_v9 = vpop.permute.xlu1 %464  ;;  %1091 = vst [vmem:[#allocation1 + $0x1] ss:$2 sm:$0xff] %v2479_v55 }
  0xc2   : > { %v471_v10 = vrot.slane %v2542_v9, 4 }
  0xc3   : > { %1064 = vrot.lane.b32.xlu0 %v1056_v63, %s2310_s14  ;;  %v2548_v61 = vpop.permute.xlu0 %424  ;;  %v2550_v11 = vpop.permute.xlu2 %594 }
  0xc4   : > { %v430_v12 = vrot.slane %v2548_v61, 4  ;;  %v477_v4 = vsel %vm260_vm1, %v471_v10, %v472_v5  ;;  %v1099_v21 = vld.sshfl [vmem:[#allocation1 + $0x10] sm:$0xff pattern:$0x75643120]  ;;  %v600_v60 = vrot.slane %v2550_v11, 4 }
  0xc5   : > { %v478_v15 = vsel %vm475_vm8, %v2542_v9, %v477_v4  ;;  %v2566_v22 = vld.sshfl [vmem:[#allocation1 + $0x18] sm:$0xff pattern:$0x75643120] }
  0xc6   : > { %v435_v17 = vsel %vm260_vm1, %v429_v47, %v430_v12  ;;  %486 = vst [vmem:[#allocation2 + $0x5c] sm:$0x33] %v478_v15 }
  0xc7   : > { %v436_v18 = vsel %vm3021_vm7, %v2499_v14, %v435_v17  ;;  %1136 = vst [vmem:[#allocation1 + $0x10] ss:$2 sm:$0xff] %v1131_v19  ;;  %vm1201_vm7 = vcmask 359424  }
  0xc8   : > { %444 = vst [vmem:[#allocation2 + $0x40] sm:$0xcc] %v436_v18  ;;  %v1097_v23 = vld.sshfl [vmem:[#allocation1 + $0x8] sm:$0xff pattern:$0x75643120] }
  0xc9   : > { %1107 = vrot.lane.b32.xlu2 %v1099_v21, %s2311_s18  ;;  %v2569_v24 = vpop.permute.xlu1 %509  ;;  %1105 = vrot.lane.b32.xlu1 %v1097_v23, %s2311_s18  ;;  %v1095_v25 = vld.sshfl [vmem:[#allocation1] sm:$0xff pattern:$0x75643120] }
  0xca   : > { %v515_v27 = vrot.slane %v2569_v24, 4  ;;  %1133 = vst [vmem:[#allocation1] ss:$2 sm:$0xff] %v2479_v55 }
  0xcb   : > { %v2574_v14 = vpop.permute.xlu0 %507  ;;  %v591_v30 = vpop.permute.xlu2 %590 }
  0xcc   : > { %v514_v31 = vrot.slane %v2574_v14, 4  ;;  %v598_v62 = vrot.slane %v591_v30, 4 }
  0xce   : > { %v520_v32 = vsel %vm260_vm1, %v514_v31, %v515_v27  ;;  %v1141_v38 = vld.sshfl [vmem:[#allocation1 + $0x10] sm:$0xff pattern:$0x75643120]  ;;  %v2586_v40 = vld.sshfl [vmem:[#allocation1 + $0x18] sm:$0xff pattern:$0x75643120] }
  0xcf   : > { %v521_v33 = vsel %vm518_vm9, %v2574_v14, %v520_v32  ;;  %1179 = vst [vmem:[#allocation1 + $0x11] ss:$2 sm:$0xff] %v1173_v37  ;;  %v1258_v37 = vld [vmem:[%s2358_s20 + $0xa] sm:$0x3f] }
  0xd0   : > { %529 = vst [vmem:[#allocation2 + $0x5c] sm:$0xcc] %v521_v33 }
  0xd1   : > { %1103 = vrot.lane.b32.xlu2 %v1095_v25, %s2311_s18  ;;  %v548_v43 = vpop.permute.xlu1 %547  ;;  %v1139_v45 = vld.sshfl [vmem:[#allocation1 + $0x8] sm:$0xff pattern:$0x75643120]  ;;  %1149 = vrot.lane.b32.xlu1 %v1141_v38, %s2312_s19  ;;  %v1137_v46 = vld.sshfl [vmem:[#allocation1] sm:$0xff pattern:$0x75643120] }
  0xd2   : > { %1147 = vrot.lane.b32.xlu0 %v1139_v45, %s2312_s19  ;;  %v555_v47 = vrot.slane %v548_v43, 4  ;;  %1176 = vst [vmem:[#allocation1 + $0x1] ss:$2 sm:$0xff] %v2479_v55 }
  0xd3   : > { %v2591_v1 = vpop.permute.xlu0 %551  ;;  %v2593_v48 = vpop.permute.xlu2 %677 }
  0xd4   : > { %v557_v50 = vrot.slane %v2591_v1, 4  ;;  %v559_v52 = vsel %vm260_vm1, %v555_v47, %v556_v35 }
  0xd5   : > { %v561_v57 = vsel %vm3018_vm10, %v548_v43, %v559_v52 }
  0xd6   : > { %v562_v56 = vsel %vm260_vm1, %v556_v35, %v557_v50  ;;  %570 = vst [vmem:[#allocation2 + $0x70] sm:$0x33] %v561_v57  ;;  %v1184_v6 = vld.sshfl [vmem:[#allocation1 + $0x10] sm:$0xff pattern:$0x75643120] }
  0xd7   : > { %v563_v58 = vsel %vm3018_vm10, %v2529_v53, %v562_v56  ;;  %v2606_v8 = vld.sshfl [vmem:[#allocation1 + $0x18] sm:$0xff pattern:$0x75643120]  ;;  %vm1116_vm10 = vcmask 375808  }
  0xd8   : > { %571 = vst [vmem:[#allocation2 + $0x78] sm:$0x33] %v563_v58 }
  0xd9   : > { %v593_v63 = vpop.permute.xlu1 %592  ;;  %v1182_v4 = vld.sshfl [vmem:[#allocation1 + $0x8] sm:$0xff pattern:$0x75643120]  ;;  %v1180_v15 = vld.sshfl [vmem:[#allocation1] sm:$0xff pattern:$0x75643120] }
  0xda   : > { %1145 = vrot.lane.b32.xlu0 %v1137_v46, %s2312_s19  ;;  %1190 = vrot.lane.b32.xlu2 %v1182_v4, %s2313_s21  ;;  %v599_v53 = vrot.slane %v593_v63, 4  ;;  %1221 = vst [vmem:[#allocation1 + $0x10] ss:$2 sm:$0xff] %v1216_v2 }
  0xdb   : > { %v635_v17 = vpop.permute.xlu0 %634  ;;  %v2609_v18 = vpop.permute.xlu2 %719  ;;  %1188 = vrot.lane.b32.xlu1 %v1180_v15, %s2313_s21  ;;  %1218 = vst [vmem:[#allocation1] ss:$2 sm:$0xff] %v2479_v55 }
  0xdc   : > { %v602_v19 = vsel %vm260_vm1, %v598_v62, %v599_v53  ;;  %v605_v21 = vsel %vm260_vm1, %v599_v53, %v600_v60  ;;  %v641_v33 = vrot.slane %v635_v17, 4 }
  0xdd   : > { %v604_v23 = vsel %vm603_vm11, %v591_v30, %v602_v19  ;;  %v606_v25 = vsel %vm603_vm11, %v593_v63, %v605_v21  ;;  %v684_v63 = vrot.slane %v2593_v48, 4 }
  0xde   : > { %613 = vst [vmem:[#allocation2 + $0x70] sm:$0xcc] %v604_v23  ;;  %v1301_v23 = vld [vmem:[%s2358_s20 + $0xa] sm:$0x3f]  ;;  %s2316_s20 = smov 34  }
  0xdf   : > { %614 = vst [vmem:[#allocation2 + $0x78] sm:$0xcc] %v606_v25 }
  0xe1   : > { %v2620_v32 = vpop.permute.xlu1 %636  ;;  %v1226_v38 = vld.sshfl [vmem:[#allocation1 + $0x10] sm:$0xff pattern:$0x75643120]  ;;  %v1228_v43 = vld.sshfl [vmem:[#allocation1 + $0x18] sm:$0xff pattern:$0x75643120] }
  0xe2   : > { %v642_v35 = vrot.slane %v2620_v32, 4  ;;  %1192 = vrot.lane.b32.xlu0 %v1184_v6, %s2313_s21  ;;  %v1224_v30 = vld.sshfl [vmem:[#allocation1 + $0x8] sm:$0xff pattern:$0x75643120]  ;;  %1264 = vst [vmem:[#allocation1 + $0x11] ss:$2 sm:$0xff] %v1258_v37 }
  0xe3   : > { %v633_v45 = vpop.permute.xlu0 %632  ;;  %v2625_v46 = vpop.permute.xlu2 %764  ;;  %1236 = vrot.lane.b32.xlu1 %v1228_v43, %s2314_s22  ;;  %1232 = vrot.lane.b32.xlu2 %v1224_v30, %s2314_s22  ;;  %v1222_v57 = vld.sshfl [vmem:[#allocation1] sm:$0xff pattern:$0x75643120] }
  0xe4   : > { %v647_v47 = vsel %vm260_vm1, %v641_v33, %v642_v35  ;;  %v640_v52 = vrot.slane %v633_v45, 4  ;;  %1261 = vst [vmem:[#allocation1 + $0x1] ss:$2 sm:$0xff] %v2479_v55 }
  0xe5   : > { %v648_v56 = vsel %vm3015_vm12, %v635_v17, %v647_v47 }
  0xe6   : > { %656 = vst [vmem:[#allocation2 + $0x94] sm:$0x33] %v648_v56  ;;  %v644_v58 = vsel %vm260_vm1, %v640_v52, %v641_v33 }
  0xe7   : > { %v646_v62 = vsel %vm3015_vm12, %v633_v45, %v644_v58  ;;  %v726_v45 = vrot.slane %v2609_v18, 4  ;;  %vm988_vm12 = vcmask 457728  }
  0xe8   : > { %655 = vst [vmem:[#allocation2 + $0x8c] sm:$0x33] %v646_v62 }
  0xe9   : > { %v676_v2 = vpop.permute.xlu1 %675  ;;  %v1269_v21 = vld.sshfl [vmem:[#allocation1 + $0x10] sm:$0xff pattern:$0x75643120]  ;;  %v1271_v37 = vld.sshfl [vmem:[#allocation1 + $0x18] sm:$0xff pattern:$0x75643120] }
  0xea   : > { %v683_v6 = vrot.slane %v676_v2, 4  ;;  %1234 = vrot.lane.b32.xlu0 %v1226_v38, %s2314_s22  ;;  %1306 = vst [vmem:[#allocation1 + $0x10] ss:$2 sm:$0xff] %v1301_v23 }
  0xeb   : > { %v2635_v4 = vpop.permute.xlu0 %679  ;;  %v761_v15 = vpop.permute.xlu2 %760  ;;  %1230 = vrot.lane.b32.xlu2 %v1222_v57, %s2314_s22  ;;  %v1267_v25 = vld.sshfl [vmem:[#allocation1 + $0x8] sm:$0xff pattern:$0x75643120]  ;;  %v1265_v38 = vld.sshfl [vmem:[#allocation1] sm:$0xff pattern:$0x75643120] }
  0xec   : > { %v685_v17 = vrot.slane %v2635_v4, 4  ;;  %v687_v53 = vsel %vm260_vm1, %v683_v6, %v684_v63  ;;  %1275 = vrot.lane.b32.xlu1 %v1267_v25, %s2315_s23  ;;  %1303 = vst [vmem:[#allocation1] ss:$2 sm:$0xff] %v2479_v55  ;;  %v770_v55 = vrot.slane %v2625_v46, 4 }
  0xed   : > { %v689_v19 = vsel %vm3016_vm13, %v676_v2, %v687_v53  ;;  %v768_v2 = vrot.slane %v761_v15, 4 }
  0xee   : > { %v690_v33 = vsel %vm260_vm1, %v684_v63, %v685_v17  ;;  %698 = vst [vmem:[#allocation2 + $0x8c] sm:$0xcc] %v689_v19 }
  0xef   : > { %v691_v43 = vsel %vm3016_vm13, %v2593_v48, %v690_v33  ;;  %vm1031_vm13 = vcmask 449536  }
  0xf0   : > { %699 = vst [vmem:[#allocation2 + $0x94] sm:$0xcc] %v691_v43 }
  0xf1   : > { %v718_v30 = vpop.permute.xlu1 %717  ;;  %v1311_v6 = vld.sshfl [vmem:[#allocation1 + $0x10] sm:$0xff pattern:$0x75643120] }
  0xf2   : > { %v725_v47 = vrot.slane %v718_v30, 4  ;;  %1273 = vrot.lane.b32.xlu0 %v1265_v38, %s2315_s23 }
  0xf3   : > { %v2650_v52 = vpop.permute.xlu0 %721  ;;  %v848_v56 = vpop.permute.xlu2 %847  ;;  %1277 = vrot.lane.b32.xlu2 %v1269_v21, %s2315_s23  ;;  %v1309_v53 = vld.sshfl [vmem:[#allocation1 + $0x8] sm:$0xff pattern:$0x75643120] }
  0xf4   : > { %v727_v57 = vrot.slane %v2650_v52, 4  ;;  %v729_v58 = vsel %vm260_vm1, %v725_v47, %v726_v45  ;;  %1319 = vrot.lane.b32.xlu1 %v1311_v6, %s2316_s20 }
  0xf5   : > { %v731_v48 = vsel %vm3020_vm14, %v718_v30, %v729_v58  ;;  %v1313_v30 = vld.sshfl [vmem:[#allocation1 + $0x18] sm:$0xff pattern:$0x75643120] }
  0xf6   : > { %v732_v62 = vsel %vm260_vm1, %v726_v45, %v727_v57  ;;  %740 = vst [vmem:[#allocation2 + $0xa8] sm:$0x33] %v731_v48  ;;  %v1307_v45 = vld.sshfl [vmem:[#allocation1] sm:$0xff pattern:$0x75643120] }
  0xf7   : > { %v733_v63 = vsel %vm3020_vm14, %v2609_v18, %v732_v62  ;;  %vm1243_vm14 = vcmask 293888  }
  0xf8   : > { %741 = vst [vmem:[#allocation2 + $0xb0] sm:$0x33] %v733_v63 }
  0xf9   : > { %v763_v19 = vpop.permute.xlu1 %762 }
  0xfa   : > { %v769_v21 = vrot.slane %v763_v19, 4  ;;  %1317 = vrot.lane.b32.xlu0 %v1309_v53, %s2316_s20 }
  0xfb   : > { %v805_v23 = vpop.permute.xlu0 %804  ;;  %v891_v25 = vpop.permute.xlu2 %890  ;;  %1279 = vrot.lane.b32.xlu2 %v1271_v37, %s2315_s23 }
  0xfc   : > { %v772_v33 = vsel %vm260_vm1, %v768_v2, %v769_v21  ;;  %v775_v38 = vsel %vm260_vm1, %v769_v21, %v770_v55  ;;  %1315 = vrot.lane.b32.xlu1 %v1307_v45, %s2316_s20  ;;  %v811_v58 = vrot.slane %v805_v23, 4 }
  0xfd   : > { %v774_v18 = vsel %vm773_vm15, %v761_v15, %v772_v33  ;;  %v776_v43 = vsel %vm773_vm15, %v763_v19, %v775_v38  ;;  %v854_v19 = vrot.slane %v848_v56, 4 }
  0xfe   : > { %783 = vst [vmem:[#allocation2 + $0xa8] sm:$0xcc] %v774_v18 }
  0xff   : > { %784 = vst [vmem:[#allocation2 + $0xb0] sm:$0xcc] %v776_v43 }
 0x101   : > { %v2669_v47 = vpop.permute.xlu1 %806 }
 0x102   : > { %v812_v48 = vrot.slane %v2669_v47, 4  ;;  %1321 = vrot.lane.b32.xlu0 %v1313_v30, %s2316_s20 }
 0x103   : > { %v803_v62 = vpop.permute.xlu0 %802  ;;  %v2672_v63 = vpop.permute.xlu2 %936  ;;  %462 = vrot.lane.b32.xlu2 %v2385_v36, %s2296_s26 }
 0x104   : > { %v817_v15 = vsel %vm260_vm1, %v811_v58, %v812_v48  ;;  %v810_v37 = vrot.slane %v803_v62, 4  ;;  %1066 = vrot.lane.b32.xlu1 %v2538_v3, %s2310_s14 }
 0x105   : > { %v818_v2 = vsel %vm3017_vm2, %v805_v23, %v817_v15 }
 0x106   : > { %826 = vst [vmem:[#allocation2 + $0xcc] sm:$0x33] %v818_v2  ;;  %v814_v6 = vsel %vm260_vm1, %v810_v37, %v811_v58 }
 0x107   : > { %v816_v53 = vsel %vm3017_vm2, %v803_v62, %v814_v6  ;;  %vm1073_vm2 = vcmask 441344  }
 0x108   : > { %825 = vst [vmem:[#allocation2 + $0xc4] sm:$0x33] %v816_v53 }
 0x109   : > { %v846_v21 = vpop.permute.xlu1 %845 }
 0x10a   : > { %v853_v33 = vrot.slane %v846_v21, 4  ;;  %505 = vrot.lane.b32.xlu0 %v2392_v41, %s2297_s27  ;;  %v897_v41 = vrot.slane %v891_v25, 4 }
 0x10b   : > { %v2686_v38 = vpop.permute.xlu0 %849  ;;  %v933_v36 = vpop.permute.xlu2 %932  ;;  %1109 = vrot.lane.b32.xlu2 %v2566_v22, %s2311_s18 }
 0x10c   : > { %v855_v23 = vrot.slane %v2686_v38, 4  ;;  %v857_v18 = vsel %vm260_vm1, %v853_v33, %v854_v19  ;;  %1194 = vrot.lane.b32.xlu1 %v2606_v8, %s2313_s21  ;;  %v940_v6 = vrot.slane %v933_v36, 4 }
 0x10d   : > { %v859_v43 = vsel %vm3019_vm4, %v846_v21, %v857_v18 }
 0x10e   : > { %v860_v3 = vsel %vm260_vm1, %v854_v19, %v855_v23  ;;  %869 = vst [vmem:[#allocation2 + $0xc4] sm:$0xcc] %v859_v43 }
 0x10f   : > { %v861_v45 = vsel %vm3019_vm4, %v848_v56, %v860_v3  ;;  %vm1158_vm4 = vcmask 367616  }
 0x110   : > { %870 = vst [vmem:[#allocation2 + $0xcc] sm:$0xcc] %v861_v45 }
 0x111   : > { %v889_v30 = vpop.permute.xlu1 %888 }
 0x112   : > { %v896_v58 = vrot.slane %v889_v30, 4  ;;  %1151 = vrot.lane.b32.xlu0 %v2586_v40, %s2312_s19  ;;  %v942_v40 = vrot.slane %v2672_v63, 4 }
 0x113   : > { %v2701_v22 = vpop.permute.xlu0 %892  ;;  %v1021_v62 = vpop.permute.xlu2 %1020  ;;  %894 = vrot.lane.b32.xlu2 %v2463_v28, %s2306_s10 }
 0x114   : > { %v898_v15 = vrot.slane %v2701_v22, 4  ;;  %v900_v37 = vsel %vm260_vm1, %v896_v58, %v897_v41  ;;  %981 = vrot.lane.b32.xlu1 %v2501_v16, %s2308_s12  ;;  %v1027_v58 = vrot.slane %v1021_v62, 4 }
 0x115   : > { %v902_v56 = vsel %vm901_vm5, %v889_v30, %v900_v37 }
 0x116   : > { %v903_v8 = vsel %vm260_vm1, %v897_v41, %v898_v15  ;;  %912 = vst [vmem:[#allocation2 + $0xe0] sm:$0x33] %v902_v56 }
 0x117   : > { %v904_v2 = vsel %vm901_vm5, %v891_v25, %v903_v8 }
 0x118   : > { %913 = vst [vmem:[#allocation2 + $0xe8] sm:$0x33] %v904_v2 }
 0x119   : > { %v935_v53 = vpop.permute.xlu1 %934 }
 0x11a   : > { %v941_v19 = vrot.slane %v935_v53, 4  ;;  %938 = vrot.lane.b32.xlu0 %v2475_v51, %s2307_s11 }
 0x11b   : > { %v1063_v28 = vpop.permute.xlu2 %1062  ;;  %1024 = vrot.lane.b32.xlu2 %v2520_v42, %s2309_s13 }
 0x11c   : > { %v944_v21 = vsel %vm260_vm1, %v940_v6, %v941_v19  ;;  %v947_v25 = vsel %vm260_vm1, %v941_v19, %v942_v40  ;;  %723 = vrot.lane.b32.xlu1 %v2426_v0, %s2302_s6 }
 0x11d   : > { %v946_v33 = vsel %vm3022_vm6, %v933_v36, %v944_v21  ;;  %v948_v16 = vsel %vm3022_vm6, %v935_v53, %v947_v25  ;;  %v978_v18 = vpop.permute.xlu0 %977  ;;  %vm1286_vm6 = vcmask 285696  }
 0x11e   : > { %956 = vst [vmem:[#allocation2 + $0xe0] sm:$0xcc] %v946_v33  ;;  %v984_v43 = vrot.slane %v978_v18, 4 }
 0x11f   : > { %957 = vst [vmem:[#allocation2 + $0xe8] sm:$0xcc] %v948_v16 }
 0x121   : > { %v2727_v51 = vpop.permute.xlu1 %979 }
 0x122   : > { %v985_v3 = vrot.slane %v2727_v51, 4  ;;  %851 = vrot.lane.b32.xlu0 %v2454_v20, %s2305_s9 }
 0x123   : > { %v2732_v42 = vpop.permute.xlu2 %1107  ;;  %766 = vrot.lane.b32.xlu2 %v2435_v7, %s2303_s7 }
 0x124   : > { %v990_v36 = vsel %vm260_vm1, %v984_v43, %v985_v3  ;;  %553 = vrot.lane.b32.xlu1 %v2398_v44, %s2298_s28 }
 0x125   : > { %v991_v0 = vsel %vm988_vm12, %v978_v18, %v990_v36  ;;  %v976_v45 = vpop.permute.xlu0 %975 }
 0x126   : > { %999 = vst [vmem:[#allocation2 + $0x104] sm:$0x33] %v991_v0  ;;  %v983_v41 = vrot.slane %v976_v45, 4 }
 0x128   : > { %v987_v30 = vsel %vm260_vm1, %v983_v41, %v984_v43 }
 0x129   : > { %v989_v20 = vsel %vm988_vm12, %v976_v45, %v987_v30  ;;  %v1019_v37 = vpop.permute.xlu1 %1018 }
 0x12a   : > { %998 = vst [vmem:[#allocation2 + $0xfc] sm:$0x33] %v989_v20  ;;  %808 = vrot.lane.b32.xlu0 %v2442_v13, %s2304_s8  ;;  %v1026_v7 = vrot.slane %v1019_v37, 4  ;;  %s210_s8 = scalar_lea.vmem %s3014_s4, %s2196_s17 }
 0x12b   : > { %v1104_v56 = vpop.permute.xlu2 %1103  ;;  %596 = vrot.lane.b32.xlu2 %v2405_v49, %s2299_s29  ;;  %v1069_v49 = vrot.slane %v1063_v28, 4 }
 0x12c   : > { %v1030_v2 = vsel %vm260_vm1, %v1026_v7, %v1027_v58  ;;  %681 = vrot.lane.b32.xlu1 %v2419_v59, %s2301_s5  ;;  %v1111_v43 = vrot.slane %v1104_v56, 4 }
 0x12d   : > { %v2748_v8 = vpop.permute.xlu0 %1022  ;;  %v1032_v44 = vsel %vm1031_vm13, %v1019_v37, %v1030_v2 }
 0x12e   : > { %v1028_v6 = vrot.slane %v2748_v8, 4  ;;  %1041 = vst [vmem:[#allocation2 + $0xfc] sm:$0xcc] %v1032_v44 }
 0x130   : > { %v1033_v53 = vsel %vm260_vm1, %v1027_v58, %v1028_v6 }
 0x131   : > { %v1034_v13 = vsel %vm1031_vm13, %v1021_v62, %v1033_v53 }
 0x132   : > { %1042 = vst [vmem:[#allocation2 + $0x104] sm:$0xcc] %v1034_v13  ;;  %638 = vrot.lane.b32.xlu0 %v2412_v54, %s2300_s30  ;;  %v1061_v19 = vpop.permute.xlu1 %1060  ;;  %v1113_v54 = vrot.slane %v2732_v42, 4 }
 0x133   : > { %426 = vrot.lane.b32.xlu2 %v2378_v29, %s2295_s25  ;;  %v1068_v25 = vrot.slane %v1061_v19, 4 }
 0x134   : > { %v1191_v16 = vpop.permute.xlu2 %1190  ;;  %511 = vrot.lane.b32.xlu1 %v2389_v39, %s2297_s27 }
 0x135   : > { %v2763_v21 = vpop.permute.xlu0 %1064  ;;  %v1072_v59 = vsel %vm260_vm1, %v1068_v25, %v1069_v49 }
 0x136   : > { %v1070_v33 = vrot.slane %v2763_v21, 4  ;;  %v1074_v18 = vsel %vm1073_vm2, %v1061_v19, %v1072_v59  ;;  %v1197_v19 = vrot.slane %v1191_v16, 4 }
 0x137   : > { %1083 = vst [vmem:[#allocation2 + $0x118] sm:$0x33] %v1074_v18 }
 0x138   : > { %v1075_v62 = vsel %vm260_vm1, %v1069_v49, %v1070_v33 }
 0x139   : > { %v1076_v29 = vsel %vm1073_vm2, %v1063_v28, %v1075_v62 }
 0x13a   : > { %1084 = vst [vmem:[#allocation2 + $0x120] sm:$0x33] %v1076_v29  ;;  %468 = vrot.lane.b32.xlu0 %v2382_v34, %s2296_s26  ;;  %s2248_s26 = smul.u32 112, %s3034_s16 }
 0x13b   : > { %v1106_v36 = vpop.permute.xlu1 %1105 }
 0x13c   : > { %v1112_v0 = vrot.slane %v1106_v36, 4  ;;  %s2977_s29 = scalar_lea.vmem %s3013_s3, %s2248_s26 }
 0x13d   : > { %v1233_v39 = vpop.permute.xlu2 %1232 }
 0x13e   : > { %v1115_v45 = vsel %vm260_vm1, %v1111_v43, %v1112_v0  ;;  %v1118_v41 = vsel %vm260_vm1, %v1112_v0, %v1113_v54  ;;  %v1239_v7 = vrot.slane %v1233_v39, 4 }
 0x13f   : > { %v1117_v28 = vsel %vm1116_vm10, %v1104_v56, %v1115_v45  ;;  %v1119_v30 = vsel %vm1116_vm10, %v1106_v36, %v1118_v41 }
 0x140   : > { %1126 = vst [vmem:[#allocation2 + $0x118] sm:$0xcc] %v1117_v28 }
 0x141   : > { %1127 = vst [vmem:[#allocation2 + $0x120] sm:$0xcc] %v1119_v30 }
 0x143   : > { %v2783_v58 = vpop.permute.xlu1 %1149 }
 0x144   : > { %v1148_v20 = vpop.permute.xlu0 %1147  ;;  %v1155_v34 = vrot.slane %v2783_v58, 4 }
 0x145   : > { %v1154_v37 = vrot.slane %v1148_v20, 4  ;;  %v1231_v2 = vpop.permute.xlu2 %1230 }
 0x146   : > { %v1238_v53 = vrot.slane %v1231_v2, 4 }
 0x147   : > { %v1160_v44 = vsel %vm260_vm1, %v1154_v37, %v1155_v34 }
 0x148   : > { %v1161_v56 = vsel %vm1158_vm4, %v1148_v20, %v1160_v44  ;;  %v1242_v13 = vsel %vm260_vm1, %v1238_v53, %v1239_v7 }
 0x149   : > { %1169 = vst [vmem:[#allocation2 + $0x13c] sm:$0x33] %v1161_v56  ;;  %v1244_v49 = vsel %vm1243_vm14, %v1231_v2, %v1242_v13 }
 0x14a   : > { %1253 = vst [vmem:[#allocation2 + $0x150] sm:$0x33] %v1244_v49 }
 0x14c   : > { %v1146_v25 = vpop.permute.xlu0 %1145 }
 0x14d   : > { %v1153_v59 = vrot.slane %v1146_v25, 4  ;;  %v1189_v62 = vpop.permute.xlu1 %1188  ;;  %v1278_v29 = vpop.permute.xlu2 %1277 }
 0x14e   : > { %v1196_v18 = vrot.slane %v1189_v62, 4  ;;  %v1283_v30 = vrot.slane %v1278_v29, 4 }
 0x14f   : > { %v1157_v43 = vsel %vm260_vm1, %v1153_v59, %v1154_v37 }
 0x150   : > { %v1159_v36 = vsel %vm1158_vm4, %v1146_v25, %v1157_v43  ;;  %v1200_v0 = vsel %vm260_vm1, %v1196_v18, %v1197_v19 }
 0x151   : > { %1168 = vst [vmem:[#allocation2 + $0x134] sm:$0x33] %v1159_v36  ;;  %v1202_v45 = vsel %vm1201_vm7, %v1189_v62, %v1200_v0 }
 0x152   : > { %1211 = vst [vmem:[#allocation2 + $0x134] sm:$0xcc] %v1202_v45 }
 0x154   : > { %v2796_v41 = vpop.permute.xlu0 %1192 }
 0x155   : > { %v1198_v28 = vrot.slane %v2796_v41, 4  ;;  %v1237_v20 = vpop.permute.xlu1 %1236  ;;  %v1280_v2 = vpop.permute.xlu2 %1279 }
 0x156   : > { %1256 = vst.msk [vmem:[#allocation2 + $0x168] sm:$0x3] %vm230_vm0, %v1237_v20  ;;  %v1284_v44 = vrot.slane %v1280_v2, 4  ;;  %v1241_v49 = vrot.slane %v1237_v20, 4 }
 0x157   : > { %v1203_v37 = vsel %vm260_vm1, %v1197_v19, %v1198_v28  ;;  %1299 = vst.msk [vmem:[#allocation2 + $0x168] sm:$0xc] %vm275_vm3, %v1280_v2 }
 0x158   : > { %v1204_v53 = vsel %vm1201_vm7, %v1191_v16, %v1203_v37  ;;  %v1290_v56 = vsel %vm260_vm1, %v1283_v30, %v1284_v44 }
 0x159   : > { %1212 = vst [vmem:[#allocation2 + $0x13c] sm:$0xcc] %v1204_v53  ;;  %v1291_v13 = vsel %vm1286_vm6, %v1278_v29, %v1290_v56 }
 0x15a   : > { %1298 = vst [vmem:[#allocation2 + $0x160] sm:$0xcc] %v1291_v13 }
 0x15c   : > { %v1235_v25 = vpop.permute.xlu0 %1234 }
 0x15d   : > { %v1240_v59 = vrot.slane %v1235_v25, 4  ;;  %v463_v62 = vpop.permute.xlu2 %462 }
 0x15e   : > { %v470_v43 = vrot.slane %v463_v62, 4  ;;  %v1276_v16 = vpop.permute.xlu1 %1275 }
 0x15f   : > { %v1245_v18 = vsel %vm260_vm1, %v1239_v7, %v1240_v59  ;;  %v1247_v19 = vsel %vm260_vm1, %v1240_v59, %v1241_v49  ;;  %v1282_v45 = vrot.slane %v1276_v16, 4 }
 0x160   : > { %v1246_v36 = vsel %vm1243_vm14, %v1233_v39, %v1245_v18  ;;  %v1248_v0 = vsel %vm1243_vm14, %v1235_v25, %v1247_v19  ;;  %v474_v29 = vsel %vm260_vm1, %v470_v43, %v471_v10  ;;  %vm1328_vm14 = vcmask 277504  }
 0x161   : > { %1254 = vst [vmem:[#allocation2 + $0x158] sm:$0x33] %v1246_v36  ;;  %v476_v20 = vsel %vm475_vm8, %v463_v62, %v474_v29  ;;  %v1288_v7 = vsel %vm260_vm1, %v1282_v45, %v1283_v30 }
 0x162   : > { %1255 = vst [vmem:[#allocation2 + $0x160] sm:$0x33] %v1248_v0  ;;  %v1289_v2 = vsel %vm1286_vm6, %v1276_v16, %v1288_v7 }
 0x163   : > { %485 = vst [vmem:[#allocation2 + $0x54] sm:$0x33] %v476_v20 }
 0x164   : > { %v1274_v37 = vpop.permute.xlu0 %1273  ;;  %1297 = vst [vmem:[#allocation2 + $0x158] sm:$0xcc] %v1289_v2 }
 0x165   : > { %v1281_v39 = vrot.slane %v1274_v37, 4  ;;  %v1110_v44 = vpop.permute.xlu2 %1109 }
 0x166   : > { %v1114_v56 = vrot.slane %v1110_v44, 4  ;;  %1129 = vst.msk [vmem:[#allocation2 + $0x130] sm:$0xc] %vm275_vm3, %v1110_v44  ;;  %v1320_v13 = vpop.permute.xlu1 %1319 }
 0x167   : > { %v1285_v53 = vsel %vm260_vm1, %v1281_v39, %v1282_v45  ;;  %v1325_v49 = vrot.slane %v1320_v13, 4 }
 0x168   : > { %v1287_v9 = vsel %vm1286_vm6, %v1274_v37, %v1285_v53  ;;  %v1120_v10 = vsel %vm260_vm1, %v1113_v54, %v1114_v56  ;;  %vm3031_vm6 = vcmask 211968  }
 0x169   : > { %1296 = vst [vmem:[#allocation2 + $0x150] sm:$0xcc] %v1287_v9  ;;  %v1121_v30 = vsel %vm1116_vm10, %v2732_v42, %v1120_v10  ;;  %vm1654_vm10 = vcmask 1045504  }
 0x16a   : > { %1128 = vst [vmem:[#allocation2 + $0x128] sm:$0xcc] %v1121_v30 }
 0x16c   : > { %v1318_v25 = vpop.permute.xlu0 %1317 }
 0x16d   : > { %v1324_v59 = vrot.slane %v1318_v25, 4  ;;  %v895_v62 = vpop.permute.xlu2 %894 }
 0x16e   : > { %v899_v19 = vrot.slane %v895_v62, 4  ;;  %v1316_v0 = vpop.permute.xlu1 %1315 }
 0x16f   : > { %v1330_v18 = vsel %vm260_vm1, %v1324_v59, %v1325_v49  ;;  %v1323_v16 = vrot.slane %v1316_v0, 4 }
 0x170   : > { %v1331_v43 = vsel %vm1328_vm14, %v1318_v25, %v1330_v18  ;;  %v905_v54 = vsel %vm260_vm1, %v898_v15, %v899_v19  ;;  %v907_v36 = vsel %vm901_vm5, %v895_v62, %v899_v19  ;;  %v2169_v15 = vld [vmem:[#allocation2 + $0x158] sm:$0xf]  ;;  %v2143_v62 = vld [vmem:[#allocation2 + $0x13c] sm:$0xf0] }
 0x171   : > { %1339 = vst [vmem:[#allocation2 + $0x174] sm:$0x33] %v1331_v43  ;;  %v906_v42 = vsel %vm901_vm5, %v2701_v22, %v905_v54  ;;  %v1327_v20 = vsel %vm260_vm1, %v1323_v16, %v1324_v59  ;;  %v2242_v22 = vld [vmem:[#allocation2 + $0x15c] sm:$0xf]  ;;  %vm3030_vm5 = vcmask 130048  }
 0x172   : > { %915 = vst.msk [vmem:[#allocation2 + $0xf8] sm:$0x3] %vm230_vm0, %v907_v36  ;;  %v1329_v7 = vsel %vm1328_vm14, %v1316_v0, %v1327_v20  ;;  %v2238_v59 = vld [vmem:[#allocation2 + $0x138] sm:$0xf0]  ;;  %v2235_v36 = vld [vmem:[#allocation2 + $0x124] sm:$0xf] }
 0x173   : > { %914 = vst [vmem:[#allocation2 + $0xf0] sm:$0x33] %v906_v42  ;;  %v2231_v42 = vld [vmem:[#allocation2 + $0x100] sm:$0xf0]  ;;  %v2161_v0 = vld [vmem:[#allocation2 + $0x150] sm:$0xf] }
 0x174   : > { %v1322_v29 = vpop.permute.xlu0 %1321  ;;  %1338 = vst [vmem:[#allocation2 + $0x16c] sm:$0x33] %v1329_v7 }
 0x175   : > { %v1326_v45 = vrot.slane %v1322_v29, 4  ;;  %1341 = vst.msk [vmem:[#allocation2 + $0x184] sm:$0x3] %vm230_vm0, %v1322_v29  ;;  %v1025_v2 = vpop.permute.xlu2 %1024 }
 0x176   : > { %v1029_v39 = vrot.slane %v1025_v2, 4  ;;  %1044 = vst.msk [vmem:[#allocation2 + $0x114] sm:$0xc] %vm275_vm3, %v1025_v2  ;;  %v1067_v25 = vpop.permute.xlu1 %1066  ;;  %v2241_v2 = vld [vmem:[#allocation2 + $0x154] sm:$0xf] }
 0x177   : > { %v1332_v37 = vsel %vm260_vm1, %v1325_v49, %v1326_v45  ;;  %v1071_v19 = vrot.slane %v1067_v25, 4  ;;  %1086 = vst.msk [vmem:[#allocation2 + $0x130] sm:$0x3] %vm230_vm0, %v1067_v25  ;;  %v2146_v45 = vor.u32 %v2235_v36, %v2143_v62 }
 0x178   : > { %v1333_v44 = vsel %vm1328_vm14, %v1320_v13, %v1332_v37  ;;  %v2245_v53 = vld [vmem:[#allocation2 + $0x170] sm:$0x30]  ;;  %v2171_v56 = vld [vmem:[#allocation2 + $0x174] sm:$0x30]  ;;  %v1035_v9 = vsel %vm260_vm1, %v1028_v6, %v1029_v39  ;;  %v2141_v6 = vld [vmem:[#allocation2 + $0x120] sm:$0xf] }
 0x179   : > { %1340 = vst [vmem:[#allocation2 + $0x17c] sm:$0x33] %v1333_v44  ;;  %v2170_v10 = vor.u32 %v2245_v53, %v2169_v15  ;;  %v2174_v30 = vor.u32 %v2242_v22, %v2171_v56  ;;  %v1036_v49 = vsel %vm1031_vm13, %v2748_v8, %v1035_v9  ;;  %v1077_v8 = vsel %vm260_vm1, %v1070_v33, %v1071_v19  ;;  %v2113_v22 = vld [vmem:[#allocation2 + $0xe8] sm:$0xf]  ;;  %v2237_v9 = vld [vmem:[#allocation2 + $0x130] sm:$0xf0] }
 0x17a   : > { %1043 = vst [vmem:[#allocation2 + $0x10c] sm:$0xcc] %v1036_v49  ;;  %v1078_v16 = vsel %vm1073_vm2, %v2763_v21, %v1077_v8  ;;  %v2142_v29 = vor.u32 %v2238_v59, %v2141_v6  ;;  %v2115_v33 = vld [vmem:[#allocation2 + $0x104] sm:$0xf0]  ;;  %v2228_v21 = vld [vmem:[#allocation2 + $0xec] sm:$0xf]  ;;  %v2114_v25 = vor.u32 %v2231_v42, %v2113_v22 }
 0x17b   : > { %v1662_v13 = vsel %vm1654_vm10, %v2170_v10, 0  ;;  %v1665_v18 = vsel %vm1654_vm10, %v2174_v30, 0  ;;  %v2244_v7 = vld [vmem:[#allocation2 + $0x168] sm:$0x30]  ;;  %v2163_v15 = vld [vmem:[#allocation2 + $0x16c] sm:$0x30]  ;;  %v2118_v59 = vor.u32 %v2228_v21, %v2115_v33 }
 0x17c   : > { %1705 = vmatpush.bf16.msra.mxu2 %v1662_v13  ;;  %1719 = vmatpush.bf16.msra.mxu3 %v1665_v18  ;;  %v506_v43 = vpop.permute.xlu0 %505  ;;  %1085 = vst [vmem:[#allocation2 + $0x128] sm:$0x33] %v1078_v16  ;;  %v2162_v44 = vor.u32 %v2244_v7, %v2161_v0  ;;  %v2166_v53 = vor.u32 %v2241_v2, %v2163_v15  ;;  %v2135_v30 = vld [vmem:[#allocation2 + $0x134] sm:$0xf0]  ;;  %v2224_v18 = vld [vmem:[#allocation2 + $0xc8] sm:$0xf0] }
 0x17d   : > { %v513_v54 = vrot.slane %v506_v43, 4  ;;  %v767_v20 = vpop.permute.xlu2 %766  ;;  %v2133_v13 = vld [vmem:[#allocation2 + $0x118] sm:$0xf]  ;;  %v2087_v19 = vld [vmem:[#allocation2 + $0xcc] sm:$0xf0]  ;;  %vm3026_vm13 = vcmask 146432  }
 0x17e   : > { %v771_v39 = vrot.slane %v767_v20, 4  ;;  %786 = vst.msk [vmem:[#allocation2 + $0xc0] sm:$0xc] %vm275_vm3, %v767_v20  ;;  %v1659_v10 = vsel %vm1654_vm10, %v2166_v53, 0  ;;  %v1195_v62 = vpop.permute.xlu1 %1194  ;;  %v2234_v6 = vld [vmem:[#allocation2 + $0x11c] sm:$0xf]  ;;  %v2134_v8 = vor.u32 %v2237_v9, %v2133_v13 }
 0x17f   : > { %v517_v37 = vsel %vm260_vm1, %v513_v54, %v514_v31  ;;  %v1656_v31 = vsel %vm1654_vm10, %v2162_v44, 0  ;;  %1691 = vmatpush.bf16.msra.mxu1 %v1659_v10  ;;  %1214 = vst.msk [vmem:[#allocation2 + $0x14c] sm:$0xc] %vm275_vm3, %v1195_v62  ;;  %v2138_v36 = vor.u32 %v2234_v6, %v2135_v30  ;;  %v2230_v42 = vld [vmem:[#allocation2 + $0xf8] sm:$0xf0]  ;;  %vm3032_vm14 = vcmask 220160  }
 0x180   : > { %v519_v56 = vsel %vm518_vm9, %v506_v43, %v517_v37  ;;  %1706 = vmatpush.bf16.msra.mxu2 %v2142_v29  ;;  %1720 = vmatpush.bf16.msra.mxu3 %v2146_v45  ;;  %v777_v14 = vsel %vm260_vm1, %v770_v55, %v771_v39  ;;  %v1199_v43 = vrot.slane %v1195_v62, 4  ;;  %v2085_v55 = vld [vmem:[#allocation2 + $0xb0] sm:$0xf]  ;;  %v2107_v29 = vld [vmem:[#allocation2 + $0xfc] sm:$0xf0] }
 0x181   : > { %528 = vst [vmem:[#allocation2 + $0x54] sm:$0xcc] %v519_v56  ;;  %v778_v49 = vsel %vm773_vm15, %v2625_v46, %v777_v14  ;;  %1677 = vmatpush.bf16.msra.mxu0 %v1656_v31  ;;  %v2221_v46 = vld [vmem:[#allocation2 + $0xb4] sm:$0xf]  ;;  %v2086_v20 = vor.u32 %v2224_v18, %v2085_v55  ;;  %v2059_v37 = vld [vmem:[#allocation2 + $0x94] sm:$0xf0] }
 0x182   : > { %785 = vst [vmem:[#allocation2 + $0xb8] sm:$0xcc] %v778_v49  ;;  %v1205_v16 = vsel %vm260_vm1, %v1198_v28, %v1199_v43  ;;  %v2090_v7 = vor.u32 %v2221_v46, %v2087_v19  ;;  %v2217_v15 = vld [vmem:[#allocation2 + $0x90] sm:$0xf0]  ;;  %v2105_v39 = vld [vmem:[#allocation2 + $0xe0] sm:$0xf] }
 0x183   : > { %v1206_v45 = vsel %vm1201_vm7, %v2796_v41, %v1205_v16  ;;  %1692 = vmatpush.bf16.msra.mxu1 %v2138_v36  ;;  %v2227_v44 = vld [vmem:[#allocation2 + $0xe4] sm:$0xf]  ;;  %v2057_v41 = vld [vmem:[#allocation2 + $0x78] sm:$0xf]  ;;  %v2214_v53 = vld [vmem:[#allocation2 + $0x7c] sm:$0xf]  ;;  %v2106_v56 = vor.u32 %v2230_v42, %v2105_v39 }
 0x184   : > { %1707 = vmatpush.bf16.msra.mxu2 %v2114_v25  ;;  %1721 = vmatpush.bf16.msra.mxu3 %v2118_v59  ;;  %v1152_v54 = vpop.permute.xlu0 %1151  ;;  %1213 = vst [vmem:[#allocation2 + $0x144] sm:$0xcc] %v1206_v45  ;;  %v2110_v21 = vor.u32 %v2227_v44, %v2107_v29  ;;  %v2079_v14 = vld [vmem:[#allocation2 + $0xc4] sm:$0xf0]  ;;  %v2058_v10 = vor.u32 %v2217_v15, %v2057_v41  ;;  %v2210_v25 = vld [vmem:[#allocation2 + $0x58] sm:$0xf0] }
 0x185   : > { %v1156_v0 = vrot.slane %v1152_v54, 4  ;;  %1171 = vst.msk [vmem:[#allocation2 + $0x14c] sm:$0x3] %vm230_vm0, %v1152_v54  ;;  %1678 = vmatpush.bf16.msra.mxu0 %v2134_v8  ;;  %v597_v2 = vpop.permute.xlu2 %596  ;;  %v2077_v49 = vld [vmem:[#allocation2 + $0xa8] sm:$0xf]  ;;  %vm3023_vm7 = vcmask 48128  }
 0x186   : > { %v601_v33 = vrot.slane %v597_v2, 4  ;;  %616 = vst.msk [vmem:[#allocation2 + $0x88] sm:$0xc] %vm275_vm3, %v597_v2  ;;  %v982_v30 = vpop.permute.xlu1 %981  ;;  %v2031_v59 = vld [vmem:[#allocation2 + $0x5c] sm:$0xf0]  ;;  %vm3027_vm15 = vcmask 64512  }
 0x187   : > { %v1162_v22 = vsel %vm260_vm1, %v1155_v34, %v1156_v0  ;;  %v2223_v34 = vld [vmem:[#allocation2 + $0xc0] sm:$0xf0]  ;;  %1693 = vmatpush.bf16.msra.mxu1 %v2110_v21  ;;  %v986_v62 = vrot.slane %v982_v30, 4  ;;  %v2220_v13 = vld [vmem:[#allocation2 + $0xac] sm:$0xf]  ;;  %vm3028_vm2 = vmmov %vm3027_vm15 }
 0x188   : > { %v1163_v28 = vsel %vm1158_vm4, %v2783_v58, %v1162_v22  ;;  %1708 = vmatpush.bf16.msra.mxu2 %v2086_v20  ;;  %1722 = vmatpush.bf16.msra.mxu3 %v2090_v7  ;;  %v607_v9 = vsel %vm260_vm1, %v600_v60, %v601_v33  ;;  %v2062_v58 = vor.u32 %v2214_v53, %v2059_v37  ;;  %v2029_v18 = vld [vmem:[#allocation2 + $0x40] sm:$0xf]  ;;  %v2216_v6 = vld [vmem:[#allocation2 + $0x88] sm:$0xf0]  ;;  %v2203_v8 = vld [vmem:[#allocation2 + $0x20] sm:$0xf0] }
 0x189   : > { %1170 = vst [vmem:[#allocation2 + $0x144] sm:$0x33] %v1163_v28  ;;  %v608_v31 = vsel %vm603_vm11, %v2550_v11, %v607_v9  ;;  %1679 = vmatpush.bf16.msra.mxu0 %v2106_v56  ;;  %v2078_v19 = vor.u32 %v2223_v34, %v2077_v49  ;;  %v2082_v43 = vor.u32 %v2220_v13, %v2079_v14  ;;  %v2207_v11 = vld [vmem:[#allocation2 + $0x44] sm:$0xf]  ;;  %v2051_v36 = vld [vmem:[#allocation2 + $0x8c] sm:$0xf0]  ;;  %vm3024_vm11 = vmmov %vm3023_vm7 }
 0x18a   : > { %615 = vst [vmem:[#allocation2 + $0x80] sm:$0xcc] %v608_v31  ;;  %v992_v54 = vsel %vm260_vm1, %v985_v3, %v986_v62  ;;  %v2247_v46 = vld [vmem:[#allocation2 + $0x180] sm:$0x30]  ;;  %v2030_v0 = vor.u32 %v2210_v25, %v2029_v18  ;;  %v2034_v16 = vor.u32 %v2207_v11, %v2031_v59  ;;  %v2003_v45 = vld [vmem:[#allocation2 + $0x24] sm:$0xf0] }
 0x18b   : > { %1001 = vst.msk [vmem:[#allocation2 + $0x114] sm:$0x3] %vm230_vm0, %v982_v30  ;;  %v993_v42 = vsel %vm988_vm12, %v2727_v51, %v992_v54  ;;  %1694 = vmatpush.bf16.msra.mxu1 %v2082_v43  ;;  %v2049_v20 = vld [vmem:[#allocation2 + $0x70] sm:$0xf]  ;;  %v2213_v7 = vld [vmem:[#allocation2 + $0x74] sm:$0xf] }
 0x18c   : > { %1709 = vmatpush.bf16.msra.mxu2 %v2058_v10  ;;  %1723 = vmatpush.bf16.msra.mxu3 %v2062_v58  ;;  %v939_v60 = vpop.permute.xlu0 %938  ;;  %1000 = vst [vmem:[#allocation2 + $0x10c] sm:$0x33] %v993_v42  ;;  %v2050_v37 = vor.u32 %v2216_v6, %v2049_v20  ;;  %v2185_v39 = vld [vmem:[#allocation2 + $0x168] sm:$0xf]  ;;  %v2200_v33 = vld [vmem:[#allocation2 + $0xc] sm:$0xf]  ;;  %v2054_v44 = vor.u32 %v2213_v7, %v2051_v36 }
 0x18d   : > { %v943_v55 = vrot.slane %v939_v60, 4  ;;  %1680 = vmatpush.bf16.msra.mxu0 %v2078_v19  ;;  %v427_v29 = vpop.permute.xlu2 %426  ;;  %v2001_v22 = vld [vmem:[#allocation2 + $0x8] sm:$0xf]  ;;  %v2186_v28 = vor.u32 %v2247_v46, %v2185_v39  ;;  %v2021_v41 = vld [vmem:[#allocation2 + $0x38] sm:$0xf]  ;;  %vm3025_vm12 = vcmask 949248   ;;  %v2006_v9 = vor.u32 %v2200_v33, %v2003_v45 }
 0x18e   : > { %v431_v15 = vrot.slane %v427_v29, 4  ;;  %v2209_v53 = vld [vmem:[#allocation2 + $0x50] sm:$0xf0]  ;;  %v2023_v56 = vld [vmem:[#allocation2 + $0x54] sm:$0xf0]  ;;  %v724_v34 = vpop.permute.xlu1 %723  ;;  %vm3029_vm4 = vcmask 867328  }
 0x18f   : > { %v949_v2 = vsel %vm260_vm1, %v942_v40, %v943_v55  ;;  %v951_v3 = vsel %vm3023_vm7, %v939_v60, %v943_v55  ;;  %446 = vst.msk [vmem:[#allocation2 + $0x50] sm:$0xc] %vm275_vm3, %v427_v29  ;;  %1695 = vmatpush.bf16.msra.mxu1 %v2054_v44  ;;  %v2206_v14 = vld [vmem:[#allocation2 + $0x3c] sm:$0xf]  ;;  %v728_v10 = vrot.slane %v724_v34, 4  ;;  %v1674_v25 = vsel %vm1654_vm10, %v2186_v28, 0 }
 0x190   : > { %v950_v51 = vsel %vm3024_vm11, %v2672_v63, %v949_v2  ;;  %959 = vst.msk [vmem:[#allocation2 + $0xf8] sm:$0xc] %vm275_vm3, %v951_v3  ;;  %1710 = vmatpush.bf16.msra.mxu2 %v2030_v0  ;;  %1724 = vmatpush.bf16.msra.mxu3 %v2034_v16  ;;  %v437_v40 = vsel %vm260_vm1, %v430_v12, %v431_v15  ;;  %v2246_v31 = vld [vmem:[#allocation2 + $0x178] sm:$0x30]  ;;  %v1995_v30 = vld [vmem:[#allocation2 + $0x1c] sm:$0xf0] }
 0x191   : > { %958 = vst [vmem:[#allocation2 + $0xf0] sm:$0xcc] %v950_v51  ;;  %v438_v21 = vsel %vm3025_vm12, %v2548_v61, %v437_v40  ;;  %v2002_v63 = vor.u32 %v2203_v8, %v2001_v22  ;;  %1681 = vmatpush.bf16.msra.mxu0 %v2050_v37  ;;  %v2202_v58 = vld [vmem:[#allocation2 + $0x18] sm:$0xf0]  ;;  %v2179_v12 = vld [vmem:[#allocation2 + $0x17c] sm:$0x30]  ;;  %v2022_v59 = vor.u32 %v2209_v53, %v2021_v41 }
 0x192   : > { %445 = vst [vmem:[#allocation2 + $0x48] sm:$0xcc] %v438_v21  ;;  %v2905_v49 = vld [vmem:[%s3011_s1] sm:$0xff]  ;;  %v2026_v62 = vor.u32 %v2206_v14, %v2023_v56  ;;  %v2240_v13 = vld [vmem:[#allocation2 + $0x148] sm:$0xf0]  ;;  %v734_v60 = vsel %vm260_vm1, %v727_v57, %v728_v10 }
 0x193   : > { %743 = vst.msk [vmem:[#allocation2 + $0xc0] sm:$0x3] %vm230_vm0, %v724_v34  ;;  %v2177_v19 = vld [vmem:[#allocation2 + $0x160] sm:$0xf]  ;;  %v2243_v43 = vld [vmem:[#allocation2 + $0x164] sm:$0xf]  ;;  %v735_v11 = vsel %vm3026_vm13, %v2650_v52, %v734_v60 }
 0x194   : > { %1711 = vmatpush.bf16.msra.mxu2 %v2002_v63  ;;  %1725 = vmatpush.bf16.msra.mxu3 %v2006_v9  ;;  %v852_v61 = vpop.permute.xlu0 %851  ;;  %v2157_v6 = vld [vmem:[#allocation2 + $0x130] sm:$0xf]  ;;  %v2178_v55 = vor.u32 %v2246_v31, %v2177_v19  ;;  %v2182_v54 = vor.u32 %v2243_v43, %v2179_v12  ;;  %742 = vst [vmem:[#allocation2 + $0xb8] sm:$0x33] %v735_v11  ;;  %v1993_v57 = vld [vmem:[#allocation2] sm:$0xf] }
 0x195   : > { %v856_v18 = vrot.slane %v852_v61, 4  ;;  %1682 = vmatpush.bf16.msra.mxu0 %v2022_v59  ;;  %1696 = vmatpush.bf16.msra.mxu1 %v2026_v62  ;;  %v2158_v46 = vor.u32 %v2240_v13, %v2157_v6  ;;  %v2199_v42 = vld [vmem:[#allocation2 + $0x4] sm:$0xf]  ;;  %v1994_v0 = vor.u32 %v2202_v58, %v1993_v57  ;;  %v2233_v2 = vld [vmem:[#allocation2 + $0x110] sm:$0xf0] }
 0x196   : > { %v1998_v16 = vor.u32 %v2199_v42, %v1995_v30  ;;  %v2239_v29 = vld [vmem:[#allocation2 + $0x140] sm:$0xf0]  ;;  %v554_v45 = vpop.permute.xlu1 %553  ;;  %v1668_v20 = vsel %vm1654_vm10, %v2178_v55, 0  ;;  %v1671_v7 = vsel %vm1654_vm10, %v2182_v54, 0  ;;  %v2151_v3 = vld [vmem:[#allocation2 + $0x144] sm:$0xf0] }
 0x197   : > { %v862_v8 = vsel %vm260_vm1, %v855_v23, %v856_v18  ;;  %v864_v36 = vsel %vm3027_vm15, %v852_v61, %v856_v18  ;;  %2189 = vmatmul.msk.bf16.vlgmr.msra.gmra.mxu2 %vm475_vm8, %v2905_v49  ;;  %2190 = vmatmul.msk.bf16.vlgmr.msra.gmra.mxu3 %vm475_vm8, %v2905_v49  ;;  %v2129_v23 = vld [vmem:[#allocation2 + $0xf8] sm:$0xf]  ;;  %v558_v15 = vrot.slane %v554_v45, 4  ;;  %573 = vst.msk [vmem:[#allocation2 + $0x88] sm:$0x3] %vm230_vm0, %v554_v45 }
 0x198   : > { %1761 = vmatpush.bf16.msrb.mxu2 %v1674_v25  ;;  %v863_v52 = vsel %vm3028_vm2, %v2686_v38, %v862_v8  ;;  %872 = vst.msk [vmem:[#allocation2 + $0xdc] sm:$0xc] %vm275_vm3, %v864_v36  ;;  %v2130_v38 = vor.u32 %v2233_v2, %v2129_v23  ;;  %v2149_v37 = vld [vmem:[#allocation2 + $0x128] sm:$0xf]  ;;  %v2236_v22 = vld [vmem:[#allocation2 + $0x12c] sm:$0xf] }
 0x199   : > { %871 = vst [vmem:[#allocation2 + $0xd4] sm:$0xcc] %v863_v52  ;;  %1683 = vmatpush.bf16.msra.mxu0 %v1994_v0  ;;  %1697 = vmatpush.bf16.msra.mxu1 %v1998_v16  ;;  %v2150_v51 = vor.u32 %v2239_v29, %v2149_v37  ;;  %v564_v44 = vsel %vm260_vm1, %v557_v50, %v558_v15  ;;  %v2232_v40 = vld [vmem:[#allocation2 + $0x108] sm:$0xf0]  ;;  %v2121_v53 = vld [vmem:[#allocation2 + $0xf0] sm:$0xf] }
 0x19a   : > { %v2154_v28 = vor.u32 %v2236_v22, %v2151_v3  ;;  %v565_v41 = vsel %vm3029_vm4, %v2591_v1, %v564_v44  ;;  %v2229_v56 = vld [vmem:[#allocation2 + $0xf4] sm:$0xf]  ;;  %v2123_v21 = vld [vmem:[#allocation2 + $0x10c] sm:$0xf0]  ;;  %v2122_v9 = vor.u32 %v2232_v40, %v2121_v53  ;;  %v2101_v10 = vld [vmem:[#allocation2 + $0xc0] sm:$0xf] }
 0x19b   : > { %572 = vst [vmem:[#allocation2 + $0x80] sm:$0x33] %v565_v41  ;;  %v2126_v34 = vor.u32 %v2229_v56, %v2123_v21  ;;  %v2093_v25 = vld [vmem:[#allocation2 + $0xb8] sm:$0xf]  ;;  %v2222_v13 = vld [vmem:[#allocation2 + $0xbc] sm:$0xf] }
 0x19c   : > { %1762 = vmatpush.bf16.msrb.mxu2 %v2158_v46  ;;  %v809_v39 = vpop.permute.xlu0 %808  ;;  %2187 = vmatmul.msk.bf16.vlgmr.msra.gmra.mxu0 %vm475_vm8, %v2905_v49  ;;  %v2045_v16 = vld [vmem:[#allocation2 + $0x50] sm:$0xf]  ;;  %v2037_v29 = vld [vmem:[#allocation2 + $0x48] sm:$0xf]  ;;  %v2201_v22 = vld [vmem:[#allocation2 + $0x14] sm:$0xf] }
 0x19d   : > { %1733 = vmatpush.bf16.msrb.mxu0 %v1668_v20  ;;  %1747 = vmatpush.bf16.msrb.mxu1 %v1671_v7  ;;  %v813_v33 = vrot.slane %v809_v39, 4  ;;  %828 = vst.msk [vmem:[#allocation2 + $0xdc] sm:$0x3] %vm230_vm0, %v809_v39  ;;  %v2208_v20 = vld [vmem:[#allocation2 + $0x4c] sm:$0xf] }
 0x19e   : > { %2188 = vmatmul.msk.bf16.vlgmr.msra.gmra.mxu1 %vm475_vm8, %v2905_v49  ;;  %v682_v1 = vpop.permute.xlu1 %681  ;;  %v2011_v37 = vld [vmem:[#allocation2 + $0x2c] sm:$0xf0] }
 0x19f   : > { %v819_v63 = vsel %vm260_vm1, %v812_v48, %v813_v33  ;;  %v686_v14 = vrot.slane %v682_v1, 4  ;;  %701 = vst.msk [vmem:[#allocation2 + $0xa4] sm:$0xc] %vm275_vm3, %v682_v1  ;;  %v2009_v39 = vld [vmem:[#allocation2 + $0x10] sm:$0xf]  ;;  %v2014_v33 = vor.u32 %v2201_v22, %v2011_v37 }
 0x1a0   : > { %1763 = vmatpush.bf16.msrb.mxu2 %v2130_v38  ;;  %v820_v50 = vsel %vm3030_vm5, %v2669_v47, %v819_v63  ;;  %v2204_v38 = vld [vmem:[#allocation2 + $0x28] sm:$0xf0]  ;;  %v1789_v63 = vld [vmem:[%s3012_s2] sm:$0x7f] }
 0x1a1   : > { %1734 = vmatpush.bf16.msrb.mxu0 %v2150_v51  ;;  %1748 = vmatpush.bf16.msrb.mxu1 %v2154_v28  ;;  %827 = vst [vmem:[#allocation2 + $0xd4] sm:$0x33] %v820_v50  ;;  %v692_v48 = vsel %vm260_vm1, %v685_v17, %v686_v14  ;;  %v2010_v51 = vor.u32 %v2204_v38, %v2009_v39  ;;  %v1791_v50 = vperm.slane %v1789_v63, 0 }
 0x1a2   : > { %v693_v12 = vsel %vm3031_vm6, %v2635_v4, %v692_v48  ;;  %v2065_v36 = vld [vmem:[#allocation2 + $0x80] sm:$0xf]  ;;  %v2215_v42 = vld [vmem:[#allocation2 + $0x84] sm:$0xf] }
 0x1a3   : > { %700 = vst [vmem:[#allocation2 + $0x9c] sm:$0xcc] %v693_v12 }
 0x1a4   : > { %v639_v31 = vpop.permute.xlu0 %638  ;;  %v2226_v58 = vld [vmem:[#allocation2 + $0xd8] sm:$0xf0] }
 0x1a5   : > { %1735 = vmatpush.bf16.msrb.mxu0 %v2122_v9  ;;  %1749 = vmatpush.bf16.msrb.mxu1 %v2126_v34  ;;  %v643_v30 = vrot.slane %v639_v31, 4  ;;  %658 = vst.msk [vmem:[#allocation2 + $0xa4] sm:$0x3] %vm230_vm0, %v639_v31  ;;  %v2102_v47 = vor.u32 %v2226_v58, %v2101_v10  ;;  %v1792_v9 = vperm.slane %v1789_v63, 1  ;;  %v1793_v10 = vperm.slane %v1789_v63, 2 }
 0x1a6   : > { %v512_v19 = vpop.permute.xlu1 %511 }
 0x1a7   : > { %v649_v61 = vsel %vm260_vm1, %v642_v35, %v643_v30  ;;  %1764 = vmatpush.bf16.msrb.mxu2 %v2102_v47  ;;  %v516_v4 = vrot.slane %v512_v19, 4  ;;  %531 = vst.msk [vmem:[#allocation2 + $0x6c] sm:$0xc] %vm275_vm3, %v512_v19  ;;  %v2073_v35 = vld [vmem:[#allocation2 + $0x88] sm:$0xf]  ;;  %vm1886_vm3 = vcmask 15368  }
 0x1a8   : > { %v650_v59 = vsel %vm3032_vm14, %v2620_v32, %v649_v61  ;;  %v2225_v62 = vld [vmem:[#allocation2 + $0xd0] sm:$0xf0]  ;;  %v2095_v18 = vld [vmem:[#allocation2 + $0xd4] sm:$0xf0]  ;;  %v1794_v61 = vperm.slane %v1789_v63, 3 }
 0x1a9   : > { %657 = vst [vmem:[#allocation2 + $0x9c] sm:$0x33] %v650_v59  ;;  %v2094_v60 = vor.u32 %v2225_v62, %v2093_v25  ;;  %v2098_v17 = vor.u32 %v2222_v13, %v2095_v18  ;;  %v522_v32 = vsel %vm260_vm1, %v515_v27, %v516_v4 }
 0x1aa   : > { %v523_v54 = vsel %vm518_vm9, %v2569_v24, %v522_v32 }
 0x1ab   : > { %1736 = vmatpush.bf16.msrb.mxu0 %v2094_v60  ;;  %1750 = vmatpush.bf16.msrb.mxu1 %v2098_v17  ;;  %530 = vst [vmem:[#allocation2 + $0x64] sm:$0xcc] %v523_v54 }
 0x1ac   : > { %v469_v43 = vpop.permute.xlu0 %468  ;;  %v2219_v11 = vld [vmem:[#allocation2 + $0xa0] sm:$0xf0] }
 0x1ad   : > { %v473_v6 = vrot.slane %v469_v43, 4  ;;  %488 = vst.msk [vmem:[#allocation2 + $0x6c] sm:$0x3] %vm230_vm0, %v469_v43  ;;  %v2074_v55 = vor.u32 %v2219_v11, %v2073_v35  ;;  %v1795_v43 = vperm.slane %v1789_v63, 4  ;;  %v1796_v11 = vperm.slane %v1789_v63, 5 }
 0x1ae   : > { %vm1780_vm0 = vcmask 80896  }
 0x1af   : > { %v479_v8 = vsel %vm260_vm1, %v472_v5, %v473_v6  ;;  %1765 = vmatpush.bf16.msrb.mxu2 %v2074_v55  ;;  %v2205_v5 = vld [vmem:[#allocation2 + $0x30] sm:$0xf0]  ;;  %vm1837_vm1 = vcmask 7168  }
 0x1b0   : > { %v480_v46 = vsel %vm475_vm8, %v2515_v26, %v479_v8  ;;  %v2218_v57 = vld [vmem:[#allocation2 + $0x98] sm:$0xf0]  ;;  %v2067_v52 = vld [vmem:[#allocation2 + $0x9c] sm:$0xf0]  ;;  %v2017_v26 = vld [vmem:[#allocation2 + $0x18] sm:$0xf] }
 0x1b1   : > { %487 = vst [vmem:[#allocation2 + $0x64] sm:$0x33] %v480_v46  ;;  %v2066_v0 = vor.u32 %v2218_v57, %v2065_v36  ;;  %v2070_v27 = vor.u32 %v2215_v42, %v2067_v52  ;;  %v2018_v15 = vor.u32 %v2205_v5, %v2017_v26  ;;  %v1797_v42 = vperm.slane %v1789_v63, 6 }
 0x1b3   : > { %1737 = vmatpush.bf16.msrb.mxu0 %v2066_v0  ;;  %1751 = vmatpush.bf16.msrb.mxu1 %v2070_v27 }
 0x1b4   : > { %v2212_v24 = vld [vmem:[#allocation2 + $0x68] sm:$0xf0] }
 0x1b5   : > { %v2046_v23 = vor.u32 %v2212_v24, %v2045_v16 }
 0x1b7   : > { %1766 = vmatpush.bf16.msrb.mxu2 %v2046_v23 }
 0x1b8   : > { %v2211_v45 = vld [vmem:[#allocation2 + $0x60] sm:$0xf0]  ;;  %v2039_v7 = vld [vmem:[#allocation2 + $0x64] sm:$0xf0] }
 0x1b9   : > { %v2038_v2 = vor.u32 %v2211_v45, %v2037_v29  ;;  %v2042_v3 = vor.u32 %v2208_v20, %v2039_v7 }
 0x1bb   : > { %1738 = vmatpush.bf16.msrb.mxu0 %v2038_v2  ;;  %1752 = vmatpush.bf16.msrb.mxu1 %v2042_v3 }
 0x1bc   : > { %1767 = vmatpush.bf16.msrb.mxu2 %v2018_v15 }
 0x1bf   : > { %2193 = vmatmul.msk.bf16.vlgmr.msrb.gmra.mxu2 %vm475_vm8, %v2905_v49  ;;  %1739 = vmatpush.bf16.msrb.mxu0 %v2010_v51 }
 0x1c0   : > { %1753 = vmatpush.bf16.msrb.mxu1 %v2014_v33 }
 0x1c2   : > { %2191 = vmatmul.msk.bf16.vlgmr.msrb.gmra.mxu0 %vm475_vm8, %v2905_v49 }
 0x1c3   : > { %2192 = vmatmul.msk.bf16.vlgmr.msrb.gmra.mxu1 %vm475_vm8, %v2905_v49 }
 0x219   : > { %v1685_v44 = vpop.f32.mrf.mxu0 }
 0x21a   : > { %v1713_v28 = vpop.f32.mrf.mxu2  ;;  %1774 = vst [vmem:[%s2977_s29] sm:$0xff] %v1685_v44  ;;  %v1727_v41 = vpop.f32.mrf.mxu3  ;;  %v1840_v34 = vmul.f32 %v1685_v44, %v1685_v44  ;;  %v1805_v14 = vmul.f32 %v1791_v50, %v1685_v44 }
 0x21b   : > { %v1699_v40 = vpop.f32.mrf.mxu1  ;;  %1776 = vst [vmem:[%s2977_s29 + $0x10] sm:$0xff] %v1713_v28  ;;  %v1842_v48 = vmul.f32 %v1713_v28, %v1713_v28  ;;  %v1807_v12 = vmul.f32 %v1793_v10, %v1713_v28  ;;  %v1843_v25 = vmul.f32 %v1727_v41, %v1727_v41  ;;  %v1808_v17 = vmul.f32 %v1794_v61, %v1727_v41 }
 0x21c   : > { %1775 = vst [vmem:[%s2977_s29 + $0x8] sm:$0xff] %v1699_v40  ;;  %v1841_v1 = vmul.f32 %v1699_v40, %v1699_v40  ;;  %v1806_v31 = vmul.f32 %v1792_v9, %v1699_v40  ;;  %v1854_v58 = vmul.f32 %v1840_v34, %v1791_v50 }
 0x21d   : > { %1777 = vst [vmem:[%s2977_s29 + $0x18] sm:$0xff] %v1727_v41  ;;  %v1856_v62 = vmul.f32 %v1842_v48, %v1793_v10  ;;  %v1857_v32 = vmul.f32 %v1843_v25, %v1794_v61 }
 0x21e   : > { %v1855_v30 = vmul.f32 %v1841_v1, %v1792_v9  ;;  %v1819_v47 = vadd.f32 %v1806_v31, %v1805_v14 }
 0x220   : > { %v1868_v59 = vadd.f32 %v1855_v30, %v1854_v58  ;;  %v1820_v60 = vadd.f32 %v1819_v47, %v1807_v12 }
 0x221   : > { %v1687_v49 = vpop.f32.mrf.mxu0 }
 0x222   : > { %v1715_v53 = vpop.f32.mrf.mxu2  ;;  %1782 = vst [vmem:[%s2977_s29 + $0x38] sm:$0xff] %v1687_v49  ;;  %v1729_v21 = vpop.f32.mrf.mxu3  ;;  %v1847_v13 = vmul.f32 %v1687_v49, %v1687_v49  ;;  %v1812_v19 = vmul.f32 %v1791_v50, %v1687_v49  ;;  %v1869_v6 = vadd.f32 %v1868_v59, %v1856_v62  ;;  %v1821_v8 = vadd.f32 %v1820_v60, %v1808_v17 }
 0x223   : > { %v1701_v56 = vpop.f32.mrf.mxu1  ;;  %1784 = vst [vmem:[%s2977_s29 + $0x48] sm:$0xff] %v1715_v53  ;;  %v1849_v35 = vmul.f32 %v1715_v53, %v1715_v53  ;;  %v1814_v46 = vmul.f32 %v1793_v10, %v1715_v53  ;;  %v1815_v52 = vmul.f32 %v1794_v61, %v1729_v21  ;;  %v1850_v23 = vmul.f32 %v1729_v21, %v1729_v21 }
 0x224   : > { %1783 = vst [vmem:[%s2977_s29 + $0x40] sm:$0xff] %v1701_v56  ;;  %v1848_v18 = vmul.f32 %v1701_v56, %v1701_v56  ;;  %v1813_v4 = vmul.f32 %v1792_v9, %v1701_v56  ;;  %v1861_v55 = vmul.f32 %v1847_v13, %v1791_v50  ;;  %v1870_v3 = vadd.f32 %v1869_v6, %v1857_v32 }
 0x225   : > { %1785 = vst [vmem:[%s2977_s29 + $0x50] sm:$0xff] %v1729_v21  ;;  %v1863_v24 = vmul.f32 %v1849_v35, %v1793_v10  ;;  %v1864_v28 = vmul.f32 %v1850_v23, %v1794_v61 }
 0x226   : > { %v1862_v54 = vmul.f32 %v1848_v18, %v1792_v9  ;;  %v1828_v36 = vadd.f32 %v1813_v4, %v1812_v19 }
 0x228   : > { %v1877_v45 = vadd.f32 %v1862_v54, %v1861_v55  ;;  %v1829_v26 = vadd.f32 %v1828_v36, %v1814_v46 }
 0x22a   : > { %v1878_v44 = vadd.f32 %v1877_v45, %v1863_v24  ;;  %v1830_v49 = vadd.f32 %v1829_v26, %v1815_v52 }
 0x22c   : > { %v1879_v1 = vadd.f32 %v1878_v44, %v1864_v28 }
 0x23f   : > { %v1741_v57 = vpop.f32.mrf.mxu0 }
 0x240   : > { %1778 = vst [vmem:[%s2977_s29 + $0x20] sm:$0xff] %v1741_v57  ;;  %v1809_v0 = vmul.f32 %v1795_v43, %v1741_v57  ;;  %v1844_v27 = vmul.f32 %v1741_v57, %v1741_v57  ;;  %v1755_v16 = vpop.f32.mrf.mxu1 }
 0x241   : > { %1779 = vst [vmem:[%s2977_s29 + $0x28] sm:$0xff] %v1755_v16  ;;  %v1810_v29 = vmul.f32 %v1796_v11, %v1755_v16  ;;  %v1845_v5 = vmul.f32 %v1755_v16, %v1755_v16 }
 0x242   : > { %v1858_v20 = vmul.f32 %v1844_v27, %v1795_v43  ;;  %v1769_v7 = vpop.f32.mrf.mxu2  ;;  %v1822_v2 = vadd.f32 %v1821_v8, %v1809_v0 }
 0x243   : > { %1781 = vst.msk [vmem:[%s2977_s29 + $0x30] sm:$0xff] %vm1780_vm0, %v1769_v7  ;;  %v1811_v15 = vmul.f32 %v1797_v42, %v1769_v7  ;;  %v1846_v38 = vmul.f32 %v1769_v7, %v1769_v7  ;;  %v1859_v37 = vmul.f32 %v1845_v5, %v1796_v11 }
 0x244   : > { %v1823_v39 = vadd.f32 %v1822_v2, %v1810_v29  ;;  %v1871_v51 = vadd.f32 %v1870_v3, %v1858_v20 }
 0x245   : > { %v1824_v22 = vsel %vm1780_vm0, %v1811_v15, 0.0  ;;  %v1860_v33 = vmul.f32 %v1846_v38, %v1797_v42 }
 0x246   : > { %v1825_v40 = vadd.f32 %v1824_v22, %v1823_v39  ;;  %v1872_v41 = vadd.f32 %v1871_v51, %v1859_v37 }
 0x247   : > { %v1743_v53 = vpop.f32.mrf.mxu0  ;;  %v1873_v56 = vsel %vm1780_vm0, %v1860_v33, 0.0 }
 0x248   : > { %1786 = vst [vmem:[%s2977_s29 + $0x58] sm:$0xff] %v1743_v53  ;;  %v1816_v21 = vmul.f32 %v1795_v43, %v1743_v53  ;;  %v1851_v63 = vmul.f32 %v1743_v53, %v1743_v53  ;;  %v1757_v50 = vpop.f32.mrf.mxu1  ;;  %1826 = vadd.xlane.f32.xlu2 %v1825_v40  ;;  %v1874_v9 = vadd.f32 %v1873_v56, %v1872_v41 }
 0x249   : > { %1787 = vst [vmem:[%s2977_s29 + $0x60] sm:$0xff] %v1757_v50  ;;  %v1852_v34 = vmul.f32 %v1757_v50, %v1757_v50  ;;  %v1817_v10 = vmul.f32 %v1796_v11, %v1757_v50 }
 0x24a   : > { %v1831_v14 = vadd.f32 %v1830_v49, %v1816_v21  ;;  %v1865_v31 = vmul.f32 %v1851_v63, %v1795_v43  ;;  %v1771_v58 = vpop.f32.mrf.mxu2  ;;  %1875 = vadd.xlane.f32.xlu1 %v1874_v9 }
 0x24b   : > { %1788 = vst.msk [vmem:[%s2977_s29 + $0x68] sm:$0xff] %vm1780_vm0, %v1771_v58  ;;  %v1818_v30 = vmul.f32 %v1797_v42, %v1771_v58  ;;  %v1853_v48 = vmul.f32 %v1771_v58, %v1771_v58  ;;  %v1866_v47 = vmul.f32 %v1852_v34, %v1796_v11 }
 0x24c   : > { %v1832_v12 = vadd.f32 %v1831_v14, %v1817_v10  ;;  %v1880_v61 = vadd.f32 %v1879_v1, %v1865_v31 }
 0x24d   : > { %v1867_v25 = vmul.f32 %v1853_v48, %v1797_v42  ;;  %v1833_v59 = vsel %vm1780_vm0, %v1818_v30, 0.0 }
 0x24e   : > { %v1834_v62 = vadd.f32 %v1833_v59, %v1832_v12  ;;  %v1881_v13 = vadd.f32 %v1880_v61, %v1866_v47 }
 0x24f   : > { %v1882_v18 = vsel %vm1780_vm0, %v1867_v25, 0.0 }
 0x250   : > { %1835 = vadd.xlane.f32.xlu0 %v1834_v62  ;;  %v1883_v60 = vadd.f32 %v1882_v18, %v1881_v13 }
 0x252   : > { %1884 = vadd.xlane.f32.xlu2 %v1883_v60 }
 0x2bb   : > { %v1827_v17 = vpop.xlane.xlu2 %1826 }
 0x2bc   : > { %1838 = vst.msk [vmem:[%s210_s8] sm:$0xff] %vm1837_vm1, %v1827_v17 }
 0x2bd   : > { %v1876_v19 = vpop.xlane.xlu1 %1875 }
 0x2be   : > { %1887 = vst.msk [vmem:[%s210_s8] sm:$0xff] %vm1886_vm3, %v1876_v19 }
 0x2c3   : > { %v1836_v4 = vpop.xlane.xlu0 %1835 }
 0x2c4   : > { %1839 = vst.msk [vmem:[%s210_s8 + $0x8] sm:$0xff] %vm1837_vm1, %v1836_v4 }
 0x2c5   : > { %v1885_v43 = vpop.xlane.xlu2 %1884 }
 0x2c6   : > { %1888 = vst.msk [vmem:[%s210_s8 + $0x8] sm:$0xff] %vm1886_vm3, %v1885_v43 }
 0x2c7 PF: > { %s15_s15 = sadd.s32 1, %s2289_s15  }
 0x2c8   : > { %p12_p4 = scmp.ge.s32.totalorder %s15_s15, 4  }
 0x2ca   :  { %14 = sbr.rel (!%p12_p4) target bundleno = 1 (0x1), region = 114 }

// kernel: residual_block.4
= control target key start
LH: loop header
LB: loop body
LE: loop exit
PB: predicated region body
PF: predicated region fallthrough
CT: control target
= control target key end

     0   :  { %s2791_s18 = smov 0   ;;  %s3723_s0 = inlined_call_operand.vmem [shape: f32[2,16,778], index: 0, kind: input, shape index: {}]   ;;  %s3724_s1 = inlined_call_operand.vmem [shape: bf16[8,216], index: 1, kind: input, shape index: {}]   ;;  %s3725_s2 = inlined_call_operand.vmem [shape: f32[8,2], index: 2, kind: input, shape index: {}]   ;;  %s3726_s3 = inlined_call_operand.vmem [shape: f32[1,778], index: 3, kind: input, shape index: {}]   ;;  %s3727_s4 = inlined_call_operand.vmem [shape: f32[2,8,778], index: 4, kind: output, shape index: {0}]   ;;  %s3728_s5 = inlined_call_operand.vmem [shape: f32[2,8,2], index: 5, kind: output, shape index: {1}]  }
   0x1 LB: > { %s2211_s19 = sadd.s32 4294967295, %s2730_s18   ;;  %p2215_p0 = scmp.ge.s32.totalorder %s2730_s18, 1  ;;  %s2730_s18 = sphi %s2791_s18, %s16_s18  }
   0x2   : > { %p190_p1 = scmp.lt.s32.totalorder %s2730_s18, 3 }
   0x4   : > { %p191_p2 = pnand %p2215_p0, %p190_p1 }
   0x5   : > { %p222_p3 = scmp.lt.s32.totalorder (!%p191_p2), %s2211_s19, 1  ;;  %s2734_s28 = smov (!%p191_p2), 111  }
   0x6   : > { %194 = sbr.rel (%p191_p2) target bundleno = 960 (0x3c0), region = 36  ;;  %s2735_s29 = smov (!%p191_p2), 34  }
   0x7   : > { %s2736_s30 = smov (!%p191_p2), 16   ;;  %s2737_s6 = smov (!%p191_p2), 126  }
   0x8   : > { %s2738_s7 = smov (!%p191_p2), 127   ;;  %s2739_s8 = smov (!%p191_p2), 26  }
   0x9   : > { %s2740_s9 = smov (!%p191_p2), 8   ;;  %s2741_s10 = smov (!%p191_p2), 7  }
   0xa   : > { %s2742_s11 = smov (!%p191_p2), 18   ;;  %s2743_s12 = smov (!%p191_p2), 106  }
   0xb   : > { %vm298_vm0 = vcmask 904192   ;;  %vm300_vm1 = vcmask 1044424   ;;  %vm301_vm2 = vcmask 850948   ;;  %v238_v0 = vld [vmem:[%s3725_s2] sm:$0xff]  ;;  %v2732_v1 = vmov 0   ;;  %s3742_s19 = smov (!%p222_p3, %s2211_s19), 1 }
   0xc   : > { %vm302_vm3 = vmor %vm301_vm2, %vm300_vm1  ;;  %2722 = vset.pattern.permute.xlu0 %v2732_v1  ;;  %299 = vst.msk [vmem:[#allocation2] sm:$0xf] %vm298_vm0, %v2732_v1  ;;  %v2733_v2 = vmov 1   ;;  %s2683_s22 = smul.u32 112, %s3742_s19  ;;  %v237_v4 = vld [vmem:[%s3726_s3] sm:$0x7f] }
   0xd   : > { %303 = vst.msk [vmem:[#allocation2 + $0x18] sm:$0xff] %vm302_vm3, %v2732_v1  ;;  %248 = vperm.xlu0 %2722, %v238_v0   ;;  %v2811_v12 = vperm.slane %v237_v4, 4  ;;  %v2813_v13 = vperm.slane %v237_v4, 5  ;;  %v2815_v14 = vperm.slane %v237_v4, 0  ;;  %v2817_v20 = vperm.slane %v237_v4, 1  ;;  %s2744_s13 = smov 17  }
   0xe   : > { %s226_s25 = scalar_lea.vmem %s3723_s0, %s2683_s22  ;;  %v2823_v40 = vperm.slane %v237_v4, 6  ;;  %v2825_v41 = vperm.slane %v237_v4, 2  ;;  %v2827_v42 = vperm.slane %v237_v4, 3  ;;  %vm323_vm4 = vcmask 908288   ;;  %s2745_s14 = smov 117  }
   0xf   : > { %v243_v5 = vld [vmem:[%s226_s25 + $0x20] sm:$0xff]  ;;  %v244_v6 = vld [vmem:[%s226_s25 + $0x28] sm:$0xff]  ;;  %v245_v9 = vld [vmem:[%s226_s25 + $0x30] sm:$0xff]  ;;  %vm341_vm5 = vcmask 986112   ;;  %vm350_vm6 = vcmask 76800   ;;  %vm335_vm7 = vcmask 1044344  }
  0x10   : > { %v239_v7 = vld [vmem:[%s226_s25] sm:$0xff]  ;;  %v240_v8 = vld [vmem:[%s226_s25 + $0x8] sm:$0xff]  ;;  %v241_v10 = vld [vmem:[%s226_s25 + $0x10] sm:$0xff]  ;;  %vm336_vm8 = vcmask 1047556   ;;  %vm325_vm10 = vcmask 1043456   ;;  %s2746_s15 = smov 6  }
  0x11   : > { %v242_v11 = vld [vmem:[%s226_s25 + $0x18] sm:$0xff]  ;;  %vm337_vm9 = vmor %vm336_vm8, %vm335_vm7  ;;  %s2747_s16 = smov 27   ;;  %s2748_s17 = smov 108   ;;  %vm373_vm11 = vcmask 1039360   ;;  %vm863_vm12 = vcmask 64512   ;;  %vm408_vm13 = vcmask 1031168  }
  0x12   : > { %s2749_s20 = smov 28   ;;  %s2750_s21 = smov 116   ;;  %vm1251_vm14 = vcmask 277504   ;;  %vm1181_vm15 = vcmask 293888   ;;  %vm793_vm0 = vcmask 138240   ;;  %vm758_vm1 = vcmask 146432  }
  0x13   : > { %s2751_s22 = smov 107   ;;  %s2752_s23 = smov 36   ;;  %vm828_vm2 = vcmask 130048   ;;  %vm1216_vm3 = vcmask 285696   ;;  %vm1111_vm7 = vcmask 367616   ;;  %vm971_vm8 = vcmask 457728  }
  0x14   : > { %v1233_v52 = vld [vmem:[#allocation2 + $0x1c] sm:$0xf]  ;;  %s2753_s24 = smov 118   ;;  %s2754_s25 = smov 44  }
  0x15   : > { %2723 = vset.pattern.permute.xlu0 %v2733_v2  ;;  %s2755_s26 = smov 35   ;;  %s2756_s27 = smov 54  }
  0x16   : > { %259 = vperm.xlu0 %2723, %v238_v0  }
  0x1e   : > { %1244 = vrot.lane.b32.xlu0 %v1233_v52, %s2735_s29 }
  0x7f   : > { %v249_v3 = vpop.permute.xlu0 %248 }
  0x80   : > { %v255_v15 = vmul.f32 %v249_v3, %v243_v5  ;;  %v256_v16 = vmul.f32 %v249_v3, %v244_v6  ;;  %v251_v17 = vmul.f32 %v249_v3, %v239_v7  ;;  %v252_v18 = vmul.f32 %v249_v3, %v240_v8 }
  0x81   : > { %v257_v21 = vmul.f32 %v249_v3, %v245_v9  ;;  %v253_v22 = vmul.f32 %v249_v3, %v241_v10  ;;  %v254_v23 = vmul.f32 %v249_v3, %v242_v11 }
  0x88   : > { %v260_v19 = vpop.permute.xlu0 %259 }
  0x89   : > { %v266_v24 = vadd.f32 %v260_v19, %v255_v15  ;;  %v267_v25 = vadd.f32 %v260_v19, %v256_v16  ;;  %v262_v26 = vadd.f32 %v260_v19, %v251_v17  ;;  %v263_v27 = vadd.f32 %v260_v19, %v252_v18 }
  0x8a   : > { %v268_v28 = vadd.f32 %v260_v19, %v257_v21  ;;  %v264_v29 = vadd.f32 %v260_v19, %v253_v22  ;;  %v265_v30 = vadd.f32 %v260_v19, %v254_v23 }
  0x8b   : > { %v273_v31 = vmax.f32 %v266_v24, 0.0  ;;  %v274_v32 = vmax.f32 %v267_v25, 0.0  ;;  %v269_v33 = vmax.f32 %v262_v26, 0.0  ;;  %v270_v34 = vmax.f32 %v263_v27, 0.0 }
  0x8c   : > { %v275_v39 = vmax.f32 %v268_v28, 0.0  ;;  %v271_v45 = vmax.f32 %v264_v29, 0.0  ;;  %v272_v46 = vmax.f32 %v265_v30, 0.0 }
  0x8d   : > { %v295_v35 = vmul.f32 %v2811_v12, %v273_v31  ;;  %v296_v36 = vmul.f32 %v2813_v13, %v274_v32  ;;  %v291_v37 = vmul.f32 %v2815_v14, %v269_v33  ;;  %v292_v38 = vmul.f32 %v2817_v20, %v270_v34 }
  0x8e   : > { %v297_v47 = vmul.f32 %v2823_v40, %v275_v39  ;;  %v293_v48 = vmul.f32 %v2825_v41, %v271_v45  ;;  %v294_v49 = vmul.f32 %v2827_v42, %v272_v46 }
  0x8f   : > { %v306_v43 = vpack.c.bf16 %v296_v36, %v295_v35  ;;  %v304_v44 = vpack.c.bf16 %v292_v38, %v291_v37 }
  0x90   : > { %v307_v50 = vpack.c.bf16 %v297_v47, %v297_v47  ;;  %v305_v51 = vpack.c.bf16 %v294_v49, %v293_v48  ;;  %v2905_v19 = vpop.permute.xlu0 %1244 }
  0x91   : > { %316 = vrot.lane.b32.xlu2 %v306_v43, %s2734_s28  ;;  %312 = vrot.lane.b32.xlu1 %v304_v44, %s2734_s28  ;;  %1264 = vst.msk [vmem:[#allocation3 + $0x2f0] sm:$0xf] %vm350_vm6, %v2905_v19 }
  0x99   : > { %318 = vrot.lane.b32.xlu2 %v307_v50, %s2734_s28  ;;  %314 = vrot.lane.b32.xlu1 %v305_v51, %s2734_s28  ;;  %s2757_s28 = smov 45  }
  0xeb   : > { %v317_v53 = vpop.permute.xlu2 %316 }
  0xec   : > { %v322_v54 = vrot.slane %v317_v53, 4 }
  0xf3   : > { %v319_v55 = vpop.permute.xlu2 %318 }
  0xf4   : > { %v330_v56 = vsel %vm323_vm4, %v322_v54, %v319_v55 }
  0xf5   : > { %342 = vst.msk [vmem:[#allocation2 + $0x18] sm:$0xf] %vm341_vm5, %v330_v56  ;;  %vm688_vm5 = vcmask 220160  }
  0xfc   : > { %v346_v57 = vld [vmem:[#allocation2 + $0x18] sm:$0xf] }
  0xfd   : > { %351 = vst.msk [vmem:[#allocation3 + $0x18] sm:$0xf] %vm350_vm6, %v346_v57  ;;  %v355_v5 = vld [vmem:[#allocation2 + $0x18] sm:$0xf] }
  0xfe   : > { %v390_v8 = vld [vmem:[#allocation2 + $0x18] sm:$0xf] }
  0xff   : > { %v810_v9 = vld [vmem:[#allocation2 + $0x18] sm:$0xf] }
 0x100   : > { %v670_v10 = vld [vmem:[#allocation2 + $0x18] sm:$0xf] }
 0x101   : > { %v775_v11 = vld [vmem:[#allocation2 + $0x18] sm:$0xf] }
 0x102   : > { %v2887_v15 = vld [vmem:[#allocation2 + $0x18] sm:$0xff] }
 0x103   : > { %v313_v58 = vpop.permute.xlu1 %312  ;;  %v635_v16 = vld [vmem:[#allocation2 + $0x18] sm:$0xf] }
 0x104   : > { %v320_v59 = vrot.slane %v313_v58, 4  ;;  %v740_v18 = vld [vmem:[#allocation2 + $0x18] sm:$0xf] }
 0x105   : > { %v705_v22 = vld [vmem:[#allocation2 + $0x18] sm:$0xf] }
 0x106   : > { %v324_v60 = vsel %vm323_vm4, %v320_v59, %v313_v58  ;;  %v600_v23 = vld [vmem:[#allocation2 + $0x18] sm:$0xf] }
 0x107   : > { %338 = vst.msk [vmem:[#allocation2] sm:$0xff] %vm337_vm9, %v324_v60  ;;  %vm3733_vm9 = vcmask 359424  }
 0x10b   : > { %v315_v61 = vpop.permute.xlu1 %314 }
 0x10c   : > { %v321_v62 = vrot.slane %v315_v61, 4 }
 0x10e   : > { %v326_v63 = vsel %vm325_vm10, %v320_v59, %v321_v62  ;;  %v328_v0 = vsel %vm325_vm10, %v321_v62, %v322_v54  ;;  %v2838_v1 = vld [vmem:[#allocation2] sm:$0xff] }
 0x10f   : > { %v343_v2 = vld [vmem:[#allocation2] sm:$0xff]  ;;  %v2841_v3 = vsel %vm323_vm4, %v326_v63, %v315_v61  ;;  %v2844_v4 = vsel %vm323_vm4, %v328_v0, %v317_v53  ;;  %815 = vrot.lane.b32.xlu0 %v2838_v1, %s2736_s30  ;;  %395 = vrot.lane.b32.xlu2 %v2838_v1, %s2737_s6  ;;  %vm1076_vm4 = vcmask 375808  }
 0x110   : > { %347 = vst [vmem:[#allocation3] sm:$0xff] %v343_v2  ;;  %360 = vrot.lane.b32.xlu1 %v2838_v1, %s2738_s7 }
 0x111   : > { %339 = vst [vmem:[#allocation2 + $0x8] sm:$0xff] %v2841_v3 }
 0x112   : > { %340 = vst [vmem:[#allocation2 + $0x10] sm:$0xff] %v2844_v4 }
 0x117   : > { %710 = vrot.lane.b32.xlu0 %v2838_v1, %s2739_s8  ;;  %850 = vrot.lane.b32.xlu2 %v2838_v1, %s2740_s9 }
 0x118   : > { %v344_v6 = vld [vmem:[#allocation2 + $0x8] sm:$0xff]  ;;  %366 = vrot.lane.b32.xlu1 %v355_v5, %s2738_s7 }
 0x119   : > { %348 = vst [vmem:[#allocation3 + $0x8] sm:$0xff] %v344_v6  ;;  %v345_v7 = vld [vmem:[#allocation2 + $0x10] sm:$0xff]  ;;  %v2909_v21 = vld [vmem:[#allocation2 + $0x4] sm:$0xff] }
 0x11a   : > { %349 = vst [vmem:[#allocation3 + $0x10] sm:$0xff] %v345_v7  ;;  %v2893_v17 = vld [vmem:[#allocation2 + $0xc] sm:$0xff]  ;;  %v2988_v39 = vld [vmem:[#allocation2 + $0x14] sm:$0xff] }
 0x11f   : > { %886 = vrot.lane.b32.xlu0 %v2838_v1, %s2741_s10  ;;  %745 = vrot.lane.b32.xlu2 %v2838_v1, %s2742_s11 }
 0x120   : > { %401 = vrot.lane.b32.xlu1 %v390_v8, %s2737_s6 }
 0x127   : > { %821 = vrot.lane.b32.xlu0 %v810_v9, %s2736_s30  ;;  %605 = vrot.lane.b32.xlu2 %v2838_v1, %s2743_s12 }
 0x128   : > { %780 = vrot.lane.b32.xlu1 %v2838_v1, %s2744_s13 }
 0x12f   : > { %465 = vrot.lane.b32.xlu0 %v2838_v1, %s2745_s14  ;;  %922 = vrot.lane.b32.xlu2 %v2838_v1, %s2746_s15 }
 0x130   : > { %675 = vrot.lane.b32.xlu1 %v2838_v1, %s2747_s16 }
 0x137   : > { %681 = vrot.lane.b32.xlu0 %v670_v10, %s2747_s16  ;;  %535 = vrot.lane.b32.xlu2 %v2838_v1, %s2748_s17 }
 0x138   : > { %640 = vrot.lane.b32.xlu1 %v2838_v1, %s2749_s20 }
 0x13f   : > { %500 = vrot.lane.b32.xlu2 %v2838_v1, %s2750_s21  ;;  %364 = vrot.lane.b32.xlu0 %v2844_v4, %s2738_s7 }
 0x140   : > { %570 = vrot.lane.b32.xlu1 %v2838_v1, %s2751_s22 }
 0x147   : > { %786 = vrot.lane.b32.xlu2 %v775_v11, %s2744_s13  ;;  %397 = vrot.lane.b32.xlu0 %v2841_v3, %s2737_s6 }
 0x148   : > { %856 = vrot.lane.b32.xlu1 %v2887_v15, %s2740_s9 }
 0x14f   : > { %646 = vrot.lane.b32.xlu2 %v635_v16, %s2749_s20  ;;  %1240 = vrot.lane.b32.xlu0 %v2893_v17, %s2735_s29 }
 0x150   : > { %751 = vrot.lane.b32.xlu1 %v740_v18, %s2742_s11 }
 0x157   : > { %1170 = vrot.lane.b32.xlu0 %v2893_v17, %s2752_s23  ;;  %362 = vrot.lane.b32.xlu2 %v2841_v3, %s2738_s7  ;;  %s2758_s7 = smov 46  }
 0x158   : > { %430 = vrot.lane.b32.xlu1 %v2838_v1, %s2753_s24 }
 0x15f   : > { %852 = vrot.lane.b32.xlu0 %v2841_v3, %s2740_s9  ;;  %1238 = vrot.lane.b32.xlu2 %v2909_v21, %s2735_s29 }
 0x160   : > { %716 = vrot.lane.b32.xlu1 %v705_v22, %s2739_s8 }
 0x167   : > { %1133 = vrot.lane.b32.xlu0 %v2909_v21, %s2754_s25  ;;  %1168 = vrot.lane.b32.xlu2 %v2909_v21, %s2752_s23 }
 0x168   : > { %611 = vrot.lane.b32.xlu1 %v600_v23, %s2743_s12 }
 0x169   : > { %v2921_v24 = vpop.permute.xlu2 %395 }
 0x16a   : > { %v403_v0 = vrot.slane %v2921_v24, 4 }
 0x16f   : > { %747 = vrot.lane.b32.xlu0 %v2841_v3, %s2742_s11  ;;  %1205 = vrot.lane.b32.xlu2 %v2893_v17, %s2755_s26 }
 0x170   : > { %399 = vrot.lane.b32.xlu1 %v2844_v4, %s2737_s6  ;;  %s2759_s6 = smov 56  }
 0x171   : > { %v2929_v25 = vpop.permute.xlu2 %850 }
 0x177   : > { %1028 = vrot.lane.b32.xlu0 %v2909_v21, %s2756_s27  ;;  %1100 = vrot.lane.b32.xlu2 %v2893_v17, %s2757_s28 }
 0x178   : > { %1203 = vrot.lane.b32.xlu1 %v2909_v21, %s2755_s26 }
 0x179   : > { %v2937_v26 = vpop.permute.xlu2 %745 }
 0x17f   : > { %1065 = vrot.lane.b32.xlu0 %v2893_v17, %s2758_s7  ;;  %782 = vrot.lane.b32.xlu2 %v2841_v3, %s2744_s13 }
 0x180   : > { %817 = vrot.lane.b32.xlu1 %v2841_v3, %s2736_s30 }
 0x181   : > { %v2945_v27 = vpop.permute.xlu0 %815  ;;  %v2947_v28 = vpop.permute.xlu2 %605 }
 0x182   : > { %v361_v29 = vpop.permute.xlu1 %360 }
 0x183   : > { %v368_v49 = vrot.slane %v361_v29, 4 }
 0x187   : > { %854 = vrot.lane.b32.xlu0 %v2844_v4, %s2740_s9  ;;  %1063 = vrot.lane.b32.xlu2 %v2909_v21, %s2758_s7  ;;  %s2684_s9 = smul.u32 56, %s3742_s19 }
 0x188   : > { %1098 = vrot.lane.b32.xlu1 %v2909_v21, %s2757_s28 }
 0x189   : > { %v2955_v30 = vpop.permute.xlu0 %710  ;;  %v2957_v31 = vpop.permute.xlu2 %922 }
 0x18a   : > { %v367_v32 = vpop.permute.xlu1 %366 }
 0x18b   : > { %386 = vst.msk [vmem:[#allocation3 + $0x34] sm:$0xf] %vm350_vm6, %v367_v32  ;;  %v371_v52 = vrot.slane %v367_v32, 4 }
 0x18f   : > { %960 = vrot.lane.b32.xlu0 %v2893_v17, %s2759_s6  ;;  %819 = vrot.lane.b32.xlu2 %v2844_v4, %s2736_s30  ;;  %s2760_s30 = smov 55  }
 0x190   : > { %1135 = vrot.lane.b32.xlu1 %v2893_v17, %s2754_s25 }
 0x191   : > { %v2966_v33 = vpop.permute.xlu0 %886  ;;  %v2968_v34 = vpop.permute.xlu2 %535 }
 0x192   : > { %v2970_v35 = vpop.permute.xlu1 %401 }
 0x193   : > { %421 = vst.msk [vmem:[#allocation3 + $0x50] sm:$0xf] %vm350_vm6, %v2970_v35 }
 0x197   : > { %749 = vrot.lane.b32.xlu0 %v2844_v4, %s2742_s11  ;;  %677 = vrot.lane.b32.xlu2 %v2841_v3, %s2747_s16 }
 0x198   : > { %1030 = vrot.lane.b32.xlu1 %v2893_v17, %s2756_s27 }
 0x199   : > { %v2980_v36 = vpop.permute.xlu0 %821  ;;  %v2982_v37 = vpop.permute.xlu2 %500 }
 0x19a   : > { %841 = vst.msk [vmem:[#allocation3 + $0x1a0] sm:$0xf] %vm350_vm6, %v2980_v36  ;;  %v2986_v38 = vpop.permute.xlu1 %780 }
 0x19f   : > { %607 = vrot.lane.b32.xlu0 %v2841_v3, %s2743_s12  ;;  %958 = vrot.lane.b32.xlu2 %v2909_v21, %s2759_s6 }
 0x1a0   : > { %1242 = vrot.lane.b32.xlu1 %v2988_v39, %s2735_s29 }
 0x1a1   : > { %v2996_v43 = vpop.permute.xlu0 %465  ;;  %v2998_v44 = vpop.permute.xlu2 %786 }
 0x1a2   : > { %806 = vst.msk [vmem:[#allocation3 + $0x184] sm:$0xf] %vm350_vm6, %v2998_v44  ;;  %v3002_v45 = vpop.permute.xlu1 %675 }
 0x1a7   : > { %924 = vrot.lane.b32.xlu0 %v2841_v3, %s2746_s15  ;;  %995 = vrot.lane.b32.xlu2 %v2893_v17, %s2760_s30 }
 0x1a8   : > { %712 = vrot.lane.b32.xlu1 %v2841_v3, %s2739_s8 }
 0x1a9   : > { %v3010_v46 = vpop.permute.xlu0 %681  ;;  %v3012_v47 = vpop.permute.xlu2 %646 }
 0x1aa   : > { %701 = vst.msk [vmem:[#allocation3 + $0x130] sm:$0xf] %vm350_vm6, %v3010_v46  ;;  %v3016_v48 = vpop.permute.xlu1 %640 }
 0x1ab   : > { %666 = vst.msk [vmem:[#allocation3 + $0x114] sm:$0xf] %vm350_vm6, %v3012_v47 }
 0x1af   : > { %679 = vrot.lane.b32.xlu0 %v2844_v4, %s2747_s16  ;;  %642 = vrot.lane.b32.xlu2 %v2841_v3, %s2749_s20 }
 0x1b0   : > { %993 = vrot.lane.b32.xlu1 %v2909_v21, %s2760_s30 }
 0x1b1   : > { %v365_v50 = vpop.permute.xlu0 %364  ;;  %v363_v51 = vpop.permute.xlu2 %362 }
 0x1b2   : > { %v370_v53 = vrot.slane %v365_v50, 4  ;;  %v369_v54 = vrot.slane %v363_v51, 4  ;;  %v3026_v55 = vpop.permute.xlu1 %570 }
 0x1b4   : > { %v377_v56 = vsel %vm325_vm10, %v370_v53, %v371_v52  ;;  %v372_v57 = vsel %vm325_vm10, %v368_v49, %v369_v54  ;;  %v375_v58 = vsel %vm325_vm10, %v369_v54, %v370_v53 }
 0x1b5   : > { %v378_v59 = vsel %vm373_vm11, %v365_v50, %v377_v56  ;;  %v374_v60 = vsel %vm373_vm11, %v361_v29, %v372_v57  ;;  %v376_v61 = vsel %vm373_vm11, %v363_v51, %v375_v58  ;;  %vm1041_vm11 = vcmask 441344  }
 0x1b6   : > { %385 = vst [vmem:[#allocation3 + $0x2c] sm:$0xff] %v378_v59 }
 0x1b7   : > { %383 = vst [vmem:[#allocation3 + $0x1c] sm:$0xff] %v374_v60  ;;  %537 = vrot.lane.b32.xlu0 %v2841_v3, %s2748_s17  ;;  %1207 = vrot.lane.b32.xlu2 %v2988_v39, %s2755_s26  ;;  %v858_v60 = vrot.slane %v2929_v25, 4 }
 0x1b8   : > { %384 = vst [vmem:[#allocation3 + $0x24] sm:$0xff] %v376_v61  ;;  %784 = vrot.lane.b32.xlu1 %v2844_v4, %s2744_s13  ;;  %s2218_s13 = sshll.u32 %s3742_s19, 3 }
 0x1b9   : > { %v3037_v62 = vpop.permute.xlu0 %397  ;;  %v1239_v63 = vpop.permute.xlu2 %1238  ;;  %s235_s16 = scalar_lea.vmem %s3728_s5, %s2218_s13 }
 0x1ba   : > { %v404_v1 = vrot.slane %v3037_v62, 4  ;;  %v3041_v2 = vpop.permute.xlu1 %856  ;;  %v1246_v11 = vrot.slane %v1239_v63, 4 }
 0x1bb   : > { %v861_v5 = vrot.slane %v3041_v2, 4 }
 0x1bc   : > { %v407_v6 = vsel %vm325_vm10, %v403_v0, %v404_v1 }
 0x1bd   : > { %v869_v7 = vsel %vm863_vm12, %v3041_v2, %v861_v5  ;;  %v409_v8 = vsel %vm408_vm13, %v2921_v24, %v407_v6 }
 0x1be   : > { %877 = vst.msk [vmem:[#allocation3 + $0x1bc] sm:$0xf] %vm350_vm6, %v869_v7 }
 0x1bf   : > { %1137 = vrot.lane.b32.xlu0 %v2988_v39, %s2754_s25  ;;  %572 = vrot.lane.b32.xlu2 %v2841_v3, %s2751_s22  ;;  %418 = vst [vmem:[#allocation3 + $0x38] sm:$0xff] %v409_v8 }
 0x1c0   : > { %888 = vrot.lane.b32.xlu1 %v2841_v3, %s2741_s10 }
 0x1c1   : > { %v3060_v9 = vpop.permute.xlu0 %1240  ;;  %v1169_v10 = vpop.permute.xlu2 %1168 }
 0x1c2   : > { %v1247_v16 = vrot.slane %v3060_v9, 4  ;;  %v3063_v17 = vpop.permute.xlu1 %751  ;;  %v1176_v50 = vrot.slane %v1169_v10, 4 }
 0x1c3   : > { %771 = vst.msk [vmem:[#allocation3 + $0x168] sm:$0xf] %vm350_vm6, %v3063_v17 }
 0x1c4   : > { %v1250_v18 = vsel %vm325_vm10, %v1246_v11, %v1247_v16 }
 0x1c5   : > { %v1252_v21 = vsel %vm1251_vm14, %v1239_v63, %v1250_v18 }
 0x1c6   : > { %v1670_v22 = vunpack.c.l.b16 %v1252_v21  ;;  %v1671_v23 = vunpack.c.h.b16 %v1252_v21 }
 0x1c7   : > { %502 = vrot.lane.b32.xlu0 %v2841_v3, %s2750_s21  ;;  %1102 = vrot.lane.b32.xlu2 %v2988_v39, %s2757_s28 }
 0x1c8   : > { %1172 = vrot.lane.b32.xlu1 %v2988_v39, %s2752_s23  ;;  %v1768_v24 = vpack.c.b16 %v1670_v22, %v1670_v22  ;;  %v1769_v29 = vpack.c.b16 %v1671_v23, %v1671_v23 }
 0x1c9   : > { %v3077_v32 = vpop.permute.xlu0 %1170  ;;  %v3079_v49 = vpop.permute.xlu2 %1205 }
 0x1ca   : > { %v3729_v51 = vrot.slane %v3077_v32, 4  ;;  %v3082_v52 = vpop.permute.xlu1 %430  ;;  %v1872_v53 = vsel %vm325_vm10, %v1768_v24, 0  ;;  %v1875_v54 = vsel %vm325_vm10, %v1769_v29, 0  ;;  %v753_v24 = vrot.slane %v2937_v26, 4 }
 0x1cb   : > { %1907 = vmatpush.bf16.msra.mxu1 %v1872_v53  ;;  %1933 = vmatpush.bf16.msra.mxu3 %v1875_v54 }
 0x1cc   : > { %v1180_v56 = vsel %vm325_vm10, %v1176_v50, %v3729_v51 }
 0x1cd   : > { %v1182_v57 = vsel %vm1181_vm15, %v1169_v10, %v1180_v56  ;;  %v788_v10 = vrot.slane %v2986_v38, 4 }
 0x1ce   : > { %1191 = vst [vmem:[#allocation3 + $0x2a0] sm:$0xff] %v1182_v57 }
 0x1cf   : > { %1032 = vrot.lane.b32.xlu0 %v2988_v39, %s2756_s27  ;;  %644 = vrot.lane.b32.xlu2 %v2844_v4, %s2749_s20 }
 0x1d0   : > { %714 = vrot.lane.b32.xlu1 %v2844_v4, %s2739_s8 }
 0x1d1   : > { %v3096_v58 = vpop.permute.xlu0 %852  ;;  %v3098_v59 = vpop.permute.xlu2 %1100 }
 0x1d2   : > { %v859_v61 = vrot.slane %v3096_v58, 4  ;;  %v3102_v63 = vpop.permute.xlu1 %716 }
 0x1d3   : > { %736 = vst.msk [vmem:[#allocation3 + $0x14c] sm:$0xf] %vm350_vm6, %v3102_v63 }
 0x1d4   : > { %v862_v0 = vsel %vm325_vm10, %v858_v60, %v859_v61 }
 0x1d5   : > { %v864_v6 = vsel %vm863_vm12, %v2929_v25, %v862_v0  ;;  %v826_v0 = vrot.slane %v2980_v36, 4  ;;  %v683_v36 = vrot.slane %v3002_v45, 4 }
 0x1d6   : > { %874 = vst [vmem:[#allocation3 + $0x1a4] sm:$0xff] %v864_v6 }
 0x1d7   : > { %574 = vrot.lane.b32.xlu0 %v2844_v4, %s2751_s22  ;;  %539 = vrot.lane.b32.xlu2 %v2844_v4, %s2748_s17 }
 0x1d8   : > { %609 = vrot.lane.b32.xlu1 %v2844_v4, %s2743_s12  ;;  %s3693_s12 = scalar_lea.vmem %s3727_s4, %s2684_s9 }
 0x1d9   : > { %v3117_v7 = vpop.permute.xlu0 %1133  ;;  %v3119_v8 = vpop.permute.xlu2 %782 }
 0x1da   : > { %v3730_v11 = vrot.slane %v3119_v8, 4  ;;  %v3123_v25 = vpop.permute.xlu1 %611 }
 0x1db   : > { %631 = vst.msk [vmem:[#allocation3 + $0xf8] sm:$0xf] %vm350_vm6, %v3123_v25 }
 0x1dc   : > { %v792_v18 = vsel %vm325_vm10, %v788_v10, %v3730_v11  ;;  %v1212_v10 = vrot.slane %v3079_v49, 4 }
 0x1dd   : > { %v794_v21 = vsel %vm793_vm0, %v2986_v38, %v792_v18  ;;  %v406_v38 = vrot.slane %v2970_v35, 4 }
 0x1de   : > { %803 = vst [vmem:[#allocation3 + $0x16c] sm:$0xff] %v794_v21 }
 0x1df   : > { %997 = vrot.lane.b32.xlu0 %v2988_v39, %s2760_s30  ;;  %432 = vrot.lane.b32.xlu2 %v2841_v3, %s2753_s24 }
 0x1e0   : > { %467 = vrot.lane.b32.xlu1 %v2841_v3, %s2745_s14 }
 0x1e1   : > { %v3138_v22 = vpop.permute.xlu0 %747  ;;  %v1064_v23 = vpop.permute.xlu2 %1063 }
 0x1e2   : > { %v754_v29 = vrot.slane %v3138_v22, 4  ;;  %v400_v50 = vpop.permute.xlu1 %399 }
 0x1e3   : > { %v405_v53 = vrot.slane %v400_v50, 4 }
 0x1e4   : > { %v757_v54 = vsel %vm325_vm10, %v753_v24, %v754_v29 }
 0x1e5   : > { %v759_v56 = vsel %vm758_vm1, %v2937_v26, %v757_v54  ;;  %v410_v3 = vsel %vm325_vm10, %v404_v1, %v405_v53  ;;  %v412_v57 = vsel %vm325_vm10, %v405_v53, %v406_v38  ;;  %v530_v38 = vld [vmem:[#allocation2 + $0x18] sm:$0xf] }
 0x1e6   : > { %768 = vst [vmem:[#allocation3 + $0x150] sm:$0xff] %v759_v56  ;;  %v411_v60 = vsel %vm408_vm13, %v3037_v62, %v410_v3  ;;  %v413_v35 = vsel %vm408_vm13, %v400_v50, %v412_v57  ;;  %v1071_v56 = vrot.slane %v1064_v23, 4  ;;  %vm618_vm13 = vcmask 867328  }
 0x1e7   : > { %419 = vst [vmem:[#allocation3 + $0x40] sm:$0xff] %v411_v60  ;;  %890 = vrot.lane.b32.xlu0 %v2844_v4, %s2741_s10  ;;  %962 = vrot.lane.b32.xlu2 %v2988_v39, %s2759_s6 }
 0x1e8   : > { %420 = vst [vmem:[#allocation3 + $0x48] sm:$0xff] %v413_v35  ;;  %1067 = vrot.lane.b32.xlu1 %v2988_v39, %s2758_s7  ;;  %v823_v35 = vrot.slane %v2945_v27, 4 }
 0x1e9   : > { %v3161_v26 = vpop.permute.xlu0 %1028  ;;  %v820_v1 = vpop.permute.xlu2 %819 }
 0x1ea   : > { %v825_v62 = vrot.slane %v820_v1, 4  ;;  %v1204_v6 = vpop.permute.xlu1 %1203 }
 0x1eb   : > { %v1211_v18 = vrot.slane %v1204_v6, 4 }
 0x1ec   : > { %v832_v21 = vsel %vm325_vm10, %v825_v62, %v826_v0 }
 0x1ed   : > { %v833_v24 = vsel %vm828_vm2, %v820_v1, %v832_v21  ;;  %v1215_v39 = vsel %vm325_vm10, %v1211_v18, %v1212_v10  ;;  %v1198_v18 = vld [vmem:[#allocation2 + $0x1c] sm:$0xf] }
 0x1ee   : > { %840 = vst [vmem:[#allocation3 + $0x198] sm:$0xff] %v833_v24  ;;  %v1217_v50 = vsel %vm1216_vm3, %v1204_v6, %v1215_v39 }
 0x1ef   : > { %1226 = vst [vmem:[#allocation3 + $0x2bc] sm:$0xff] %v1217_v50  ;;  %541 = vrot.lane.b32.xlu0 %v530_v38, %s2748_s17  ;;  %504 = vrot.lane.b32.xlu2 %v2844_v4, %s2750_s21  ;;  %v2557_v50 = vld [vmem:[#allocation3 + $0x2a0] sm:$0xf]  ;;  %v2676_v38 = vld [vmem:[#allocation3 + $0x2a4] sm:$0xf] }
 0x1f0   : > { %469 = vrot.lane.b32.xlu1 %v2844_v4, %s2745_s14 }
 0x1f1   : > { %v3177_v53 = vpop.permute.xlu0 %1065  ;;  %v3179_v54 = vpop.permute.xlu2 %677 }
 0x1f2   : > { %v3731_v3 = vrot.slane %v3177_v53, 4  ;;  %v684_v57 = vrot.slane %v3179_v54, 4  ;;  %v818_v60 = vpop.permute.xlu1 %817 }
 0x1f3   : > { %v824_v1 = vrot.slane %v818_v60, 4 }
 0x1f4   : > { %v1075_v0 = vsel %vm325_vm10, %v1071_v56, %v3731_v3  ;;  %v687_v6 = vsel %vm325_vm10, %v683_v36, %v684_v57 }
 0x1f5   : > { %v1077_v21 = vsel %vm1076_vm4, %v1064_v23, %v1075_v0  ;;  %v827_v24 = vsel %vm325_vm10, %v823_v35, %v824_v1  ;;  %v830_v39 = vsel %vm325_vm10, %v824_v1, %v825_v62  ;;  %v689_v36 = vsel %vm688_vm5, %v3002_v45, %v687_v6 }
 0x1f6   : > { %1086 = vst [vmem:[#allocation3 + $0x24c] sm:$0xff] %v1077_v21  ;;  %v829_v51 = vsel %vm828_vm2, %v2945_v27, %v827_v24  ;;  %v831_v11 = vsel %vm828_vm2, %v818_v60, %v830_v39  ;;  %v2679_v56 = vld [vmem:[#allocation3 + $0x2b8] sm:$0xf0]  ;;  %v2559_v3 = vld [vmem:[#allocation3 + $0x2bc] sm:$0xf0]  ;;  %v1107_v45 = vrot.slane %v3098_v59, 4 }
 0x1f7   : > { %838 = vst [vmem:[#allocation3 + $0x188] sm:$0xff] %v829_v51  ;;  %1209 = vrot.lane.b32.xlu0 %v1198_v18, %s2755_s26  ;;  %434 = vrot.lane.b32.xlu2 %v2844_v4, %s2753_s24  ;;  %v2558_v23 = vor.u32 %v2679_v56, %v2557_v50  ;;  %v2562_v62 = vor.u32 %v2676_v38, %v2559_v3  ;;  %v1163_v3 = vld [vmem:[#allocation2 + $0x1c] sm:$0xf]  ;;  %v2644_v24 = vld [vmem:[#allocation3 + $0x1a0] sm:$0xf0]  ;;  %vm723_vm2 = vcmask 211968  }
 0x1f8   : > { %839 = vst [vmem:[#allocation3 + $0x190] sm:$0xff] %v831_v11  ;;  %926 = vrot.lane.b32.xlu1 %v2844_v4, %s2746_s15  ;;  %v1093_v4 = vld [vmem:[#allocation2 + $0x1c] sm:$0xf]  ;;  %v2419_v39 = vld [vmem:[#allocation3 + $0x1a4] sm:$0xf0] }
 0x1f9   : > { %1908 = vmatpush.bf16.msra.mxu1 %v2558_v23  ;;  %1934 = vmatpush.bf16.msra.mxu3 %v2562_v62  ;;  %v855_v27 = vpop.permute.xlu0 %854  ;;  %v959_v60 = vpop.permute.xlu2 %958  ;;  %698 = vst [vmem:[#allocation3 + $0x118] sm:$0xff] %v689_v36  ;;  %v2389_v56 = vld [vmem:[#allocation3 + $0x150] sm:$0xf]  ;;  %v2634_v36 = vld [vmem:[#allocation3 + $0x154] sm:$0xf]  ;;  %v1141_v23 = vrot.slane %v3117_v7, 4 }
 0x1fa   : > { %v860_v35 = vrot.slane %v855_v27, 4  ;;  %v1099_v1 = vpop.permute.xlu1 %1098 }
 0x1fb   : > { %v1106_v51 = vrot.slane %v1099_v1, 4 }
 0x1fc   : > { %v865_v0 = vsel %vm325_vm10, %v859_v61, %v860_v35  ;;  %v867_v11 = vsel %vm325_vm10, %v860_v35, %v861_v5  ;;  %v565_v5 = vld [vmem:[#allocation2 + $0x18] sm:$0xf]  ;;  %v966_v35 = vrot.slane %v959_v60, 4 }
 0x1fd   : > { %v866_v6 = vsel %vm863_vm12, %v3096_v58, %v865_v0  ;;  %v868_v18 = vsel %vm863_vm12, %v855_v27, %v867_v11  ;;  %v1110_v21 = vsel %vm325_vm10, %v1106_v51, %v1107_v45  ;;  %v2637_v0 = vld [vmem:[#allocation3 + $0x168] sm:$0xf0]  ;;  %v2391_v11 = vld [vmem:[#allocation3 + $0x16c] sm:$0xf0]  ;;  %vm653_vm12 = vcmask 228352  }
 0x1fe   : > { %875 = vst [vmem:[#allocation3 + $0x1ac] sm:$0xff] %v866_v6  ;;  %v1112_v61 = vsel %vm1111_vm7, %v1099_v1, %v1110_v21  ;;  %v2417_v50 = vld [vmem:[#allocation3 + $0x188] sm:$0xf]  ;;  %v2641_v2 = vld [vmem:[#allocation3 + $0x18c] sm:$0xf]  ;;  %v2394_v6 = vor.u32 %v2634_v36, %v2391_v11 }
 0x1ff   : > { %876 = vst [vmem:[#allocation3 + $0x1b4] sm:$0xff] %v868_v18  ;;  %1104 = vrot.lane.b32.xlu0 %v1093_v4, %s2757_s28  ;;  %1174 = vrot.lane.b32.xlu2 %v1163_v3, %s2752_s23  ;;  %v2418_v58 = vor.u32 %v2644_v24, %v2417_v50  ;;  %v2422_v38 = vor.u32 %v2641_v2, %v2419_v39  ;;  %v1023_v21 = vld [vmem:[#allocation2 + $0x1c] sm:$0xf]  ;;  %v495_v50 = vld [vmem:[#allocation2 + $0x18] sm:$0xf] }
 0x200   : > { %1121 = vst [vmem:[#allocation3 + $0x268] sm:$0xff] %v1112_v61  ;;  %576 = vrot.lane.b32.xlu1 %v565_v5, %s2751_s22  ;;  %v2390_v3 = vor.u32 %v2637_v0, %v2389_v56  ;;  %v460_v2 = vld [vmem:[#allocation2 + $0x18] sm:$0xf] }
 0x201   : > { %1892 = vmatpush.bf16.msra.mxu0 %v2418_v58  ;;  %1918 = vmatpush.bf16.msra.mxu2 %v2422_v38  ;;  %v3221_v62 = vpop.permute.xlu0 %960  ;;  %v3223_v27 = vpop.permute.xlu2 %995  ;;  %v648_v58 = vrot.slane %v3016_v48, 4  ;;  %v756_v38 = vrot.slane %v3063_v17, 4 }
 0x202   : > { %v967_v1 = vrot.slane %v3221_v62, 4  ;;  %v3226_v51 = vpop.permute.xlu1 %1135 }
 0x203   : > { %v1142_v4 = vrot.slane %v3226_v51, 4 }
 0x204   : > { %v970_v18 = vsel %vm325_vm10, %v966_v35, %v967_v1 }
 0x205   : > { %v972_v24 = vsel %vm971_vm8, %v959_v60, %v970_v18  ;;  %v1145_v39 = vsel %vm325_vm10, %v1141_v23, %v1142_v4  ;;  %1893 = vmatpush.bf16.msra.mxu0 %v2390_v3  ;;  %1919 = vmatpush.bf16.msra.mxu2 %v2394_v6  ;;  %v1036_v23 = vrot.slane %v3161_v26, 4  ;;  %v988_v3 = vld [vmem:[#allocation2 + $0x1c] sm:$0xf]  ;;  %v425_v6 = vld [vmem:[#allocation2 + $0x18] sm:$0xf] }
 0x206   : > { %981 = vst [vmem:[#allocation3 + $0x1f8] sm:$0xff] %v972_v24  ;;  %v1147_v61 = vsel %vm3733_vm9, %v3117_v7, %v1145_v39  ;;  %v1128_v39 = vld [vmem:[#allocation2 + $0x1c] sm:$0xf] }
 0x207   : > { %1156 = vst [vmem:[#allocation3 + $0x284] sm:$0xff] %v1147_v61  ;;  %1034 = vrot.lane.b32.xlu0 %v1023_v21, %s2756_s27  ;;  %506 = vrot.lane.b32.xlu2 %v495_v50, %s2750_s21  ;;  %v2529_v61 = vld [vmem:[#allocation3 + $0x268] sm:$0xf] }
 0x208   : > { %471 = vrot.lane.b32.xlu1 %v460_v2, %s2745_s14 }
 0x209   : > { %v750_v60 = vpop.permute.xlu0 %749  ;;  %v3241_v5 = vpop.permute.xlu2 %642 }
 0x20a   : > { %v755_v56 = vrot.slane %v750_v60, 4  ;;  %v649_v36 = vrot.slane %v3241_v5, 4  ;;  %v3246_v7 = vpop.permute.xlu1 %1030 }
 0x20b   : > { %v1037_v35 = vrot.slane %v3246_v7, 4 }
 0x20c   : > { %v760_v0 = vsel %vm325_vm10, %v754_v29, %v755_v56  ;;  %v762_v11 = vsel %vm325_vm10, %v755_v56, %v756_v38  ;;  %v652_v17 = vsel %vm325_vm10, %v648_v58, %v649_v36  ;;  %v2669_v29 = vld [vmem:[#allocation3 + $0x26c] sm:$0xf] }
 0x20d   : > { %v761_v18 = vsel %vm758_vm1, %v3138_v22, %v760_v0  ;;  %v763_v21 = vsel %vm758_vm1, %v750_v60, %v762_v11  ;;  %v1040_v24 = vsel %vm325_vm10, %v1036_v23, %v1037_v35  ;;  %v654_v38 = vsel %vm653_vm12, %v3016_v48, %v652_v17 }
 0x20e   : > { %769 = vst [vmem:[#allocation3 + $0x158] sm:$0xff] %v761_v18  ;;  %v1042_v50 = vsel %vm1041_vm11, %v3161_v26, %v1040_v24  ;;  %v2672_v2 = vld [vmem:[#allocation3 + $0x280] sm:$0xf0]  ;;  %v2531_v58 = vld [vmem:[#allocation3 + $0x284] sm:$0xf0]  ;;  %v613_v23 = vrot.slane %v2947_v28, 4 }
 0x20f   : > { %770 = vst [vmem:[#allocation3 + $0x160] sm:$0xff] %v763_v21  ;;  %999 = vrot.lane.b32.xlu0 %v988_v3, %s2760_s30  ;;  %436 = vrot.lane.b32.xlu2 %v425_v6, %s2753_s24  ;;  %v2530_v22 = vor.u32 %v2672_v2, %v2529_v61  ;;  %v2534_v60 = vor.u32 %v2669_v29, %v2531_v58  ;;  %v1249_v17 = vrot.slane %v2905_v19, 4  ;;  %v953_v21 = vld [vmem:[#allocation2 + $0x1c] sm:$0xf]  ;;  %v2665_v2 = vld [vmem:[#allocation3 + $0x248] sm:$0xf0] }
 0x210   : > { %1051 = vst [vmem:[#allocation3 + $0x230] sm:$0xff] %v1042_v50  ;;  %1139 = vrot.lane.b32.xlu1 %v1128_v39, %s2754_s25  ;;  %v1058_v29 = vld [vmem:[#allocation2 + $0x1c] sm:$0xf]  ;;  %vm583_vm1 = vcmask 875520  }
 0x211   : > { %1909 = vmatpush.bf16.msra.mxu1 %v2530_v22  ;;  %1935 = vmatpush.bf16.msra.mxu3 %v2534_v60  ;;  %v3270_v56 = vpop.permute.xlu0 %607  ;;  %v3272_v26 = vpop.permute.xlu2 %1207  ;;  %663 = vst [vmem:[#allocation3 + $0xfc] sm:$0xff] %v654_v38  ;;  %v930_v22 = vrot.slane %v2957_v31, 4  ;;  %v578_v60 = vrot.slane %v3026_v55, 4 }
 0x212   : > { %v614_v48 = vrot.slane %v3270_v56, 4  ;;  %v1213_v0 = vrot.slane %v3272_v26, 4  ;;  %v1243_v11 = vpop.permute.xlu1 %1242 }
 0x213   : > { %v1248_v3 = vrot.slane %v1243_v11, 4 }
 0x214   : > { %v617_v6 = vsel %vm325_vm10, %v613_v23, %v614_v48  ;;  %v1218_v18 = vsel %vm325_vm10, %v1212_v10, %v1213_v0 }
 0x215   : > { %v619_v24 = vsel %vm618_vm13, %v2947_v28, %v617_v6  ;;  %v1219_v39 = vsel %vm1216_vm3, %v3079_v49, %v1218_v18  ;;  %v1253_v19 = vsel %vm325_vm10, %v1247_v16, %v1248_v3  ;;  %v1255_v61 = vsel %vm325_vm10, %v1248_v3, %v1249_v17  ;;  %v2503_v28 = vld [vmem:[#allocation3 + $0x24c] sm:$0xf0] }
 0x216   : > { %628 = vst [vmem:[#allocation3 + $0xe0] sm:$0xff] %v619_v24  ;;  %v3296_v50 = vsel %vm1251_vm14, %v3060_v9, %v1253_v19  ;;  %v3299_v10 = vsel %vm1251_vm14, %v1243_v11, %v1255_v61  ;;  %vm3732_vm14 = vcmask 48128   ;;  %v718_v6 = vrot.slane %v2955_v30, 4 }
 0x217   : > { %1227 = vst [vmem:[#allocation3 + $0x2c4] sm:$0xff] %v1219_v39  ;;  %964 = vrot.lane.b32.xlu2 %v953_v21, %s2759_s6  ;;  %v2501_v49 = vld [vmem:[#allocation3 + $0x230] sm:$0xf]  ;;  %v2662_v58 = vld [vmem:[#allocation3 + $0x234] sm:$0xf] }
 0x218   : > { %1069 = vrot.lane.b32.xlu1 %v1058_v29, %s2758_s7  ;;  %v2502_v16 = vor.u32 %v2665_v2, %v2501_v49  ;;  %v2506_v38 = vor.u32 %v2662_v58, %v2503_v28 }
 0x219   : > { %v3305_v9 = vpop.permute.xlu0 %924  ;;  %v3307_v23 = vpop.permute.xlu2 %572 }
 0x21a   : > { %1910 = vmatpush.bf16.msra.mxu1 %v2502_v16  ;;  %1936 = vmatpush.bf16.msra.mxu3 %v2506_v38  ;;  %v931_v11 = vrot.slane %v3305_v9, 4  ;;  %v579_v17 = vrot.slane %v3307_v23, 4  ;;  %v3311_v3 = vpop.permute.xlu1 %712  ;;  %v1002_v16 = vrot.slane %v3223_v27, 4 }
 0x21b   : > { %v719_v18 = vrot.slane %v3311_v3, 4 }
 0x21c   : > { %v934_v21 = vsel %vm325_vm10, %v930_v22, %v931_v11  ;;  %v582_v24 = vsel %vm325_vm10, %v578_v60, %v579_v17 }
 0x21d   : > { %v936_v39 = vsel %vm3732_vm14, %v2957_v31, %v934_v21  ;;  %v584_v19 = vsel %vm583_vm1, %v3026_v55, %v582_v24  ;;  %v722_v61 = vsel %vm325_vm10, %v718_v6, %v719_v18  ;;  %v686_v55 = vrot.slane %v3010_v46, 4  ;;  %v2361_v24 = vld [vmem:[#allocation3 + $0x118] sm:$0xf] }
 0x21e   : > { %946 = vst [vmem:[#allocation3 + $0x1dc] sm:$0xff] %v936_v39  ;;  %v724_v29 = vsel %vm723_vm2, %v2955_v30, %v722_v61  ;;  %vm1006_vm14 = vcmask 449536   ;;  %v2627_v39 = vld [vmem:[#allocation3 + $0x11c] sm:$0xf] }
 0x21f   : > { %593 = vst [vmem:[#allocation3 + $0xc4] sm:$0xff] %v584_v19  ;;  %928 = vrot.lane.b32.xlu2 %v2887_v15, %s2746_s15 }
 0x220   : > { %733 = vst [vmem:[#allocation3 + $0x134] sm:$0xff] %v724_v29  ;;  %892 = vrot.lane.b32.xlu1 %v2887_v15, %s2741_s10  ;;  %v2333_v29 = vld [vmem:[#allocation3 + $0xe0] sm:$0xf] }
 0x221   : > { %v680_v31 = vpop.permute.xlu0 %679  ;;  %v3334_v2 = vpop.permute.xlu2 %1102 }
 0x222   : > { %v685_v28 = vrot.slane %v680_v31, 4  ;;  %v1108_v49 = vrot.slane %v3334_v2, 4  ;;  %v994_v58 = vpop.permute.xlu1 %993 }
 0x223   : > { %v1001_v30 = vrot.slane %v994_v58, 4 }
 0x224   : > { %v690_v38 = vsel %vm325_vm10, %v684_v57, %v685_v28  ;;  %v692_v22 = vsel %vm325_vm10, %v685_v28, %v686_v55  ;;  %v1113_v15 = vsel %vm325_vm10, %v1107_v45, %v1108_v49  ;;  %v2620_v28 = vld [vmem:[#allocation3 + $0xe4] sm:$0xf] }
 0x225   : > { %v691_v46 = vsel %vm688_vm5, %v3179_v54, %v690_v38  ;;  %v693_v60 = vsel %vm688_vm5, %v680_v31, %v692_v22  ;;  %v1114_v6 = vsel %vm1111_vm7, %v3098_v59, %v1113_v15  ;;  %v1005_v57 = vsel %vm325_vm10, %v1001_v30, %v1002_v16  ;;  %v2623_v15 = vld [vmem:[#allocation3 + $0xf8] sm:$0xf0] }
 0x226   : > { %699 = vst [vmem:[#allocation3 + $0x120] sm:$0xff] %v691_v46  ;;  %v1007_v21 = vsel %vm1006_vm14, %v994_v58, %v1005_v57  ;;  %v543_v31 = vrot.slane %v2968_v34, 4  ;;  %v651_v30 = vrot.slane %v3012_v47, 4  ;;  %vm548_vm5 = vcmask 883712   ;;  %v2335_v57 = vld [vmem:[#allocation3 + $0xfc] sm:$0xf0] }
 0x227   : > { %700 = vst [vmem:[#allocation3 + $0x128] sm:$0xff] %v693_v60  ;;  %v2630_v19 = vld [vmem:[#allocation3 + $0x130] sm:$0xf0]  ;;  %v2363_v45 = vld [vmem:[#allocation3 + $0x134] sm:$0xf0]  ;;  %v791_v46 = vrot.slane %v2998_v44, 4 }
 0x228   : > { %1122 = vst [vmem:[#allocation3 + $0x270] sm:$0xff] %v1114_v6  ;;  %v2362_v61 = vor.u32 %v2630_v19, %v2361_v24  ;;  %v2366_v54 = vor.u32 %v2627_v39, %v2363_v45  ;;  %v2334_v6 = vor.u32 %v2623_v15, %v2333_v29  ;;  %v2338_v39 = vor.u32 %v2620_v28, %v2335_v57  ;;  %v2655_v28 = vld [vmem:[#allocation3 + $0x1fc] sm:$0xf] }
 0x229   : > { %1016 = vst [vmem:[#allocation3 + $0x214] sm:$0xff] %v1007_v21  ;;  %v538_v59 = vpop.permute.xlu0 %537  ;;  %v645_v55 = vpop.permute.xlu2 %644 }
 0x22a   : > { %1894 = vmatpush.bf16.msra.mxu0 %v2362_v61  ;;  %1920 = vmatpush.bf16.msra.mxu2 %v2366_v54  ;;  %v544_v58 = vrot.slane %v538_v59, 4  ;;  %v650_v38 = vrot.slane %v645_v55, 4  ;;  %v785_v22 = vpop.permute.xlu1 %784  ;;  %v3734_v61 = vrot.slane %v3119_v8, 4 }
 0x22b   : > { %v790_v60 = vrot.slane %v785_v22, 4 }
 0x22c   : > { %v547_v24 = vsel %vm325_vm10, %v543_v31, %v544_v58  ;;  %v655_v21 = vsel %vm325_vm10, %v649_v36, %v650_v38  ;;  %v657_v47 = vsel %vm325_vm10, %v650_v38, %v651_v30  ;;  %v2473_v31 = vld [vmem:[#allocation3 + $0x1f8] sm:$0xf] }
 0x22d   : > { %v549_v19 = vsel %vm548_vm5, %v2968_v34, %v547_v24  ;;  %v656_v45 = vsel %vm653_vm12, %v3241_v5, %v655_v21  ;;  %v658_v44 = vsel %vm653_vm12, %v645_v55, %v657_v47  ;;  %v795_v54 = vsel %vm325_vm10, %v3734_v61, %v790_v60  ;;  %v2616_v47 = vld [vmem:[#allocation3 + $0xc0] sm:$0xf0] }
 0x22e   : > { %558 = vst [vmem:[#allocation3 + $0xa8] sm:$0xff] %v549_v19  ;;  %v796_v29 = vsel %vm793_vm0, %v3119_v8, %v795_v54  ;;  %v797_v36 = vsel %vm325_vm10, %v790_v60, %v791_v46  ;;  %1895 = vmatpush.bf16.msra.mxu0 %v2334_v6  ;;  %1921 = vmatpush.bf16.msra.mxu2 %v2338_v39  ;;  %v2307_v54 = vld [vmem:[#allocation3 + $0xc4] sm:$0xf0]  ;;  %vm513_vm12 = vcmask 949248  }
 0x22f   : > { %664 = vst [vmem:[#allocation3 + $0x104] sm:$0xff] %v656_v45  ;;  %v798_v34 = vsel %vm793_vm0, %v785_v22, %v797_v36  ;;  %v894_v22 = vrot.slane %v2966_v33, 4  ;;  %vm899_vm0 = vcmask 56320  }
 0x230   : > { %665 = vst [vmem:[#allocation3 + $0x10c] sm:$0xff] %v658_v44  ;;  %v2658_v5 = vld [vmem:[#allocation3 + $0x210] sm:$0xf0]  ;;  %v2475_v55 = vld [vmem:[#allocation3 + $0x214] sm:$0xf0] }
 0x231   : > { %804 = vst [vmem:[#allocation3 + $0x174] sm:$0xff] %v796_v29  ;;  %v2474_v30 = vor.u32 %v2658_v5, %v2473_v31  ;;  %v2478_v38 = vor.u32 %v2655_v28, %v2475_v55  ;;  %v3377_v15 = vpop.permute.xlu0 %1137  ;;  %v3379_v57 = vpop.permute.xlu2 %539  ;;  %v1672_v31 = vunpack.c.l.b16 %v3296_v50 }
 0x232   : > { %805 = vst [vmem:[#allocation3 + $0x17c] sm:$0xff] %v798_v34  ;;  %v1143_v8 = vrot.slane %v3377_v15, 4  ;;  %v545_v46 = vrot.slane %v3379_v57, 4  ;;  %v3383_v60 = vpop.permute.xlu1 %888 }
 0x233   : > { %1911 = vmatpush.bf16.msra.mxu1 %v2474_v30  ;;  %1937 = vmatpush.bf16.msra.mxu3 %v2478_v38  ;;  %v895_v6 = vrot.slane %v3383_v60, 4 }
 0x234   : > { %v1148_v24 = vsel %vm325_vm10, %v1142_v4, %v1143_v8  ;;  %v550_v21 = vsel %vm325_vm10, %v544_v58, %v545_v46 }
 0x235   : > { %v1149_v39 = vsel %vm3733_vm9, %v3226_v51, %v1148_v24  ;;  %v551_v19 = vsel %vm548_vm5, %v538_v59, %v550_v21  ;;  %v898_v45 = vsel %vm325_vm10, %v894_v22, %v895_v6  ;;  %v2305_v44 = vld [vmem:[#allocation3 + $0xa8] sm:$0xf]  ;;  %v2613_v61 = vld [vmem:[#allocation3 + $0xac] sm:$0xf]  ;;  %v508_v51 = vrot.slane %v2982_v37, 4 }
 0x236   : > { %1157 = vst [vmem:[#allocation3 + $0x28c] sm:$0xff] %v1149_v39  ;;  %v900_v4 = vsel %vm899_vm0, %v2966_v33, %v898_v45  ;;  %v2306_v29 = vor.u32 %v2616_v47, %v2305_v44  ;;  %v2310_v36 = vor.u32 %v2613_v61, %v2307_v54  ;;  %v438_v59 = vrot.slane %v3082_v52, 4  ;;  %v2645_v39 = vld [vmem:[#allocation3 + $0x1a8] sm:$0xf0]  ;;  %v2651_v45 = vld [vmem:[#allocation3 + $0x1d8] sm:$0xf0] }
 0x237   : > { %559 = vst [vmem:[#allocation3 + $0xb0] sm:$0xff] %v551_v19  ;;  %vm443_vm9 = vcmask 965632   ;;  %v3735_v21 = vrot.slane %v3077_v32, 4  ;;  %v2447_v44 = vld [vmem:[#allocation3 + $0x1dc] sm:$0xf0]  ;;  %v1770_v61 = vpack.c.b16 %v1672_v31, %v1672_v31 }
 0x238   : > { %910 = vst [vmem:[#allocation3 + $0x1c0] sm:$0xff] %v900_v4  ;;  %1896 = vmatpush.bf16.msra.mxu0 %v2306_v29  ;;  %1922 = vmatpush.bf16.msra.mxu2 %v2310_v36  ;;  %v2425_v29 = vld [vmem:[#allocation3 + $0x190] sm:$0xf] }
 0x239   : > { %v3405_v58 = vpop.permute.xlu0 %502  ;;  %v3407_v34 = vpop.permute.xlu2 %432  ;;  %v1878_v31 = vsel %vm325_vm10, %v1770_v61, 0 }
 0x23a   : > { %v509_v28 = vrot.slane %v3405_v58, 4  ;;  %v439_v33 = vrot.slane %v3407_v34, 4  ;;  %v3412_v5 = vpop.permute.xlu1 %1172 }
 0x23b   : > { %v1178_v55 = vrot.slane %v3412_v5, 4 }
 0x23c   : > { %v512_v30 = vsel %vm325_vm10, %v508_v51, %v509_v28  ;;  %v442_v38 = vsel %vm325_vm10, %v438_v59, %v439_v33  ;;  %v2426_v59 = vor.u32 %v2645_v39, %v2425_v29 }
 0x23d   : > { %v514_v22 = vsel %vm513_vm12, %v2982_v37, %v512_v30  ;;  %v444_v24 = vsel %vm443_vm9, %v3082_v52, %v442_v38  ;;  %v1183_v47 = vsel %vm325_vm10, %v3735_v21, %v1178_v55  ;;  %v2638_v30 = vld [vmem:[#allocation3 + $0x170] sm:$0xf0] }
 0x23e   : > { %523 = vst [vmem:[#allocation3 + $0x8c] sm:$0xff] %v514_v22  ;;  %v1184_v19 = vsel %vm1181_vm15, %v3077_v32, %v1183_v47  ;;  %v2397_v47 = vld [vmem:[#allocation3 + $0x158] sm:$0xf] }
 0x23f   : > { %453 = vst [vmem:[#allocation3 + $0x54] sm:$0xff] %v444_v24  ;;  %v2445_v54 = vld [vmem:[#allocation3 + $0x1c0] sm:$0xf]  ;;  %v2648_v37 = vld [vmem:[#allocation3 + $0x1c4] sm:$0xf]  ;;  %v721_v24 = vrot.slane %v3102_v63, 4 }
 0x240   : > { %1192 = vst [vmem:[#allocation3 + $0x2a8] sm:$0xff] %v1184_v19  ;;  %v2446_v4 = vor.u32 %v2651_v45, %v2445_v54  ;;  %v2450_v52 = vor.u32 %v2648_v37, %v2447_v44  ;;  %v2398_v45 = vor.u32 %v2638_v30, %v2397_v47  ;;  %v616_v30 = vrot.slane %v3123_v25, 4 }
 0x241   : > { %v3432_v36 = vpop.permute.xlu0 %1032  ;;  %v3434_v51 = vpop.permute.xlu2 %962 }
 0x242   : > { %1912 = vmatpush.bf16.msra.mxu1 %v2446_v4  ;;  %1938 = vmatpush.bf16.msra.mxu3 %v2450_v52  ;;  %v1038_v32 = vrot.slane %v3432_v36, 4  ;;  %v968_v38 = vrot.slane %v3434_v51, 4  ;;  %v715_v22 = vpop.permute.xlu1 %714  ;;  %v2680_v4 = vld [vmem:[#allocation3 + $0x2c0] sm:$0xf0] }
 0x243   : > { %v720_v21 = vrot.slane %v715_v22, 4 }
 0x244   : > { %v1043_v39 = vsel %vm325_vm10, %v1037_v35, %v1038_v32  ;;  %v973_v19 = vsel %vm325_vm10, %v967_v1, %v968_v38 }
 0x245   : > { %v1044_v63 = vsel %vm1041_vm11, %v3246_v7, %v1043_v39  ;;  %v974_v44 = vsel %vm971_vm8, %v3221_v62, %v973_v19  ;;  %v725_v61 = vsel %vm325_vm10, %v719_v18, %v720_v21  ;;  %v727_v54 = vsel %vm325_vm10, %v720_v21, %v721_v24  ;;  %v2673_v18 = vld [vmem:[#allocation3 + $0x288] sm:$0xf0] }
 0x246   : > { %1944 = vmatpush.bf16.msrb.mxu1 %v2426_v59  ;;  %1959 = vmatpush.bf16.msrb.mxu3 %v1878_v31  ;;  %1052 = vst [vmem:[#allocation3 + $0x238] sm:$0xff] %v1044_v63  ;;  %v726_v35 = vsel %vm723_vm2, %v3311_v3, %v725_v61  ;;  %v728_v37 = vsel %vm723_vm2, %v715_v22, %v727_v54  ;;  %v2537_v22 = vld [vmem:[#allocation3 + $0x270] sm:$0xf]  ;;  %vm1866_vm2 = vcmask 719872  }
 0x247   : > { %982 = vst [vmem:[#allocation3 + $0x200] sm:$0xff] %v974_v44  ;;  %v2565_v1 = vld [vmem:[#allocation3 + $0x2a8] sm:$0xf]  ;;  %v2538_v47 = vor.u32 %v2673_v18, %v2537_v22 }
 0x248   : > { %734 = vst [vmem:[#allocation3 + $0x13c] sm:$0xff] %v726_v35  ;;  %v2566_v7 = vor.u32 %v2680_v4, %v2565_v1 }
 0x249   : > { %735 = vst [vmem:[#allocation3 + $0x144] sm:$0xff] %v728_v37  ;;  %v3461_v62 = vpop.permute.xlu0 %574  ;;  %v3463_v52 = vpop.permute.xlu2 %504 }
 0x24a   : > { %1945 = vmatpush.bf16.msrb.mxu1 %v2398_v45  ;;  %1960 = vmatpush.bf16.msrb.mxu3 %v2566_v7  ;;  %v580_v29 = vrot.slane %v3461_v62, 4  ;;  %v510_v59 = vrot.slane %v3463_v52, 4  ;;  %v610_v3 = vpop.permute.xlu1 %609 }
 0x24b   : > { %v615_v31 = vrot.slane %v610_v3, 4 }
 0x24c   : > { %v585_v24 = vsel %vm325_vm10, %v579_v17, %v580_v29  ;;  %v515_v21 = vsel %vm325_vm10, %v509_v28, %v510_v59  ;;  %v2369_v28 = vld [vmem:[#allocation3 + $0x120] sm:$0xf] }
 0x24d   : > { %v586_v39 = vsel %vm583_vm1, %v3307_v23, %v585_v24  ;;  %v516_v25 = vsel %vm513_vm12, %v3405_v58, %v515_v21  ;;  %v620_v19 = vsel %vm325_vm10, %v614_v48, %v615_v31  ;;  %v622_v45 = vsel %vm325_vm10, %v615_v31, %v616_v30  ;;  %v2624_v31 = vld [vmem:[#allocation3 + $0x100] sm:$0xf0] }
 0x24e   : > { %594 = vst [vmem:[#allocation3 + $0xcc] sm:$0xff] %v586_v39  ;;  %v621_v17 = vsel %vm618_vm13, %v3270_v56, %v620_v19  ;;  %v623_v63 = vsel %vm618_vm13, %v610_v3, %v622_v45  ;;  %1961 = vmatpush.bf16.msrb.mxu3 %v2538_v47  ;;  %v473_v56 = vrot.slane %v2996_v43, 4  ;;  %vm478_vm13 = vcmask 957440   ;;  %v2313_v19 = vld [vmem:[#allocation3 + $0xb0] sm:$0xf] }
 0x24f   : > { %524 = vst [vmem:[#allocation3 + $0x94] sm:$0xff] %v516_v25  ;;  %v2631_v44 = vld [vmem:[#allocation3 + $0x138] sm:$0xf0] }
 0x250   : > { %629 = vst [vmem:[#allocation3 + $0xe8] sm:$0xff] %v621_v17  ;;  %v2370_v23 = vor.u32 %v2631_v44, %v2369_v28 }
 0x251   : > { %630 = vst [vmem:[#allocation3 + $0xf0] sm:$0xff] %v623_v63  ;;  %v3489_v58 = vpop.permute.xlu0 %997  ;;  %v3491_v61 = vpop.permute.xlu2 %434 }
 0x252   : > { %1946 = vmatpush.bf16.msrb.mxu1 %v2370_v23  ;;  %v1003_v48 = vrot.slane %v3489_v58, 4  ;;  %v440_v54 = vrot.slane %v3491_v61, 4  ;;  %v3495_v35 = vpop.permute.xlu1 %467 }
 0x253   : > { %v474_v37 = vrot.slane %v3495_v35, 4 }
 0x254   : > { %v1008_v1 = vsel %vm325_vm10, %v1002_v16, %v1003_v48  ;;  %v445_v4 = vsel %vm325_vm10, %v439_v33, %v440_v54 }
 0x255   : > { %v1009_v7 = vsel %vm1006_vm14, %v3223_v27, %v1008_v1  ;;  %v446_v18 = vsel %vm443_vm9, %v3407_v34, %v445_v4  ;;  %v477_v3 = vsel %vm325_vm10, %v473_v56, %v474_v37  ;;  %v3521_v27 = vld [vmem:[%s3724_s1] sm:$0xff]  ;;  %v2617_v24 = vld [vmem:[#allocation3 + $0xc8] sm:$0xf0]  ;;  %v3736_v56 = vrot.slane %v3177_v53, 4 }
 0x256   : > { %1017 = vst [vmem:[#allocation3 + $0x21c] sm:$0xff] %v1009_v7  ;;  %v479_v16 = vsel %vm478_vm13, %v2996_v43, %v477_v3  ;;  %v1376_v21 = vunpack.c.h.b16 %v3521_v27  ;;  %v2314_v28 = vor.u32 %v2617_v24, %v2313_v19  ;;  %v2249_v24 = vld [vmem:[#allocation3 + $0x38] sm:$0xf]  ;;  %v1673_v19 = vunpack.c.h.b16 %v3296_v50 }
 0x257   : > { %454 = vst [vmem:[#allocation3 + $0x5c] sm:$0xff] %v446_v18  ;;  %v2341_v30 = vld [vmem:[#allocation3 + $0xe8] sm:$0xf] }
 0x258   : > { %488 = vst [vmem:[#allocation3 + $0x70] sm:$0xff] %v479_v16  ;;  %v2342_v22 = vor.u32 %v2624_v31, %v2341_v30  ;;  %v3531_v45 = vpack.c.b16 %v1376_v21, %v1376_v21  ;;  %v2602_v30 = vld [vmem:[#allocation3 + $0x50] sm:$0xf0]  ;;  %v2251_v31 = vld [vmem:[#allocation3 + $0x54] sm:$0xf0] }
 0x259   : > { %v3523_v33 = vpop.permute.xlu0 %890  ;;  %v1175_v34 = vpop.permute.xlu2 %1174 }
 0x25a   : > { %1947 = vmatpush.bf16.msrb.mxu1 %v2342_v22  ;;  %v896_v47 = vrot.slane %v3523_v33, 4  ;;  %v1179_v43 = vrot.slane %v1175_v34, 4  ;;  %1194 = vst.msk [vmem:[#allocation3 + $0x2b8] sm:$0xf] %vm350_vm6, %v1175_v34  ;;  %v3528_v39 = vpop.permute.xlu1 %1067  ;;  %2584 = vmatmul.msk.bf16.vlgmr.msra.gmra.mxu3 %vm1866_vm2, %v3531_v45 }
 0x25b   : > { %v1073_v25 = vrot.slane %v3528_v39, 4  ;;  %2583 = vmatmul.msk.bf16.vlgmr.msra.gmra.mxu1 %vm1866_vm2, %v3531_v45 }
 0x25c   : > { %v901_v17 = vsel %vm325_vm10, %v895_v6, %v896_v47  ;;  %v1185_v63 = vsel %vm325_vm10, %v1178_v55, %v1179_v43  ;;  %v2279_v55 = vld [vmem:[#allocation3 + $0x8c] sm:$0xf0]  ;;  %v2599_v43 = vld [vmem:[#allocation3 + $0x3c] sm:$0xf] }
 0x25d   : > { %v902_v44 = vsel %vm899_vm0, %v3383_v60, %v901_v17  ;;  %v1186_v23 = vsel %vm1181_vm15, %v3412_v5, %v1185_v63  ;;  %v1078_v1 = vsel %vm325_vm10, %v3736_v56, %v1073_v25  ;;  %v2609_v60 = vld [vmem:[#allocation3 + $0x88] sm:$0xf0]  ;;  %vm3737_vm15 = vcmask 48128  }
 0x25e   : > { %911 = vst [vmem:[#allocation3 + $0x1c8] sm:$0xff] %v902_v44  ;;  %v1079_v6 = vsel %vm1076_vm4, %v3177_v53, %v1078_v1  ;;  %1948 = vmatpush.bf16.msrb.mxu1 %v2314_v28  ;;  %v2250_v28 = vor.u32 %v2602_v30, %v2249_v24  ;;  %v2254_v44 = vor.u32 %v2599_v43, %v2251_v31  ;;  %v2221_v1 = vld [vmem:[#allocation3] sm:$0xf]  ;;  %v2659_v31 = vld [vmem:[#allocation3 + $0x218] sm:$0xf0] }
 0x25f   : > { %1193 = vst [vmem:[#allocation3 + $0x2b0] sm:$0xff] %v1186_v23  ;;  %v2277_v5 = vld [vmem:[#allocation3 + $0x70] sm:$0xf]  ;;  %v2606_v4 = vld [vmem:[#allocation3 + $0x74] sm:$0xf] }
 0x260   : > { %1087 = vst [vmem:[#allocation3 + $0x254] sm:$0xff] %v1079_v6  ;;  %v2278_v7 = vor.u32 %v2609_v60, %v2277_v5  ;;  %v2282_v18 = vor.u32 %v2606_v4, %v2279_v55  ;;  %v2223_v6 = vld [vmem:[#allocation3 + $0x1c] sm:$0xf0]  ;;  %v1375_v60 = vunpack.c.l.b16 %v3521_v27  ;;  %v2427_v55 = vld [vmem:[#allocation3 + $0x1ac] sm:$0xf0]  ;;  %v1771_v4 = vpack.c.b16 %v1673_v19, %v1673_v19 }
 0x261   : > { %v542_v3 = vpop.permute.xlu0 %541  ;;  %v507_v16 = vpop.permute.xlu2 %506 }
 0x262   : > { %1897 = vmatpush.bf16.msra.mxu0 %v2278_v7  ;;  %1923 = vmatpush.bf16.msra.mxu2 %v2282_v18  ;;  %v546_v22 = vrot.slane %v542_v3, 4  ;;  %561 = vst.msk [vmem:[#allocation3 + $0xc0] sm:$0xf] %vm350_vm6, %v542_v3  ;;  %v511_v34 = vrot.slane %v507_v16, 4  ;;  %v3557_v53 = vpop.permute.xlu1 %469  ;;  %v2642_v3 = vld [vmem:[#allocation3 + $0x194] sm:$0xf] }
 0x263   : > { %526 = vst.msk [vmem:[#allocation3 + $0xa4] sm:$0xf] %vm350_vm6, %v507_v16  ;;  %v475_v21 = vrot.slane %v3557_v53, 4  ;;  %v2430_v27 = vor.u32 %v2642_v3, %v2427_v55  ;;  %v2610_v55 = vld [vmem:[#allocation3 + $0x90] sm:$0xf0] }
 0x264   : > { %v552_v17 = vsel %vm325_vm10, %v545_v46, %v546_v22  ;;  %v517_v63 = vsel %vm325_vm10, %v510_v59, %v511_v34  ;;  %v2595_v46 = vld [vmem:[#allocation3 + $0x18] sm:$0xf0]  ;;  %v2399_v34 = vld [vmem:[#allocation3 + $0x174] sm:$0xf0] }
 0x265   : > { %v553_v23 = vsel %vm548_vm5, %v3379_v57, %v552_v17  ;;  %v518_v56 = vsel %vm513_vm12, %v3463_v52, %v517_v63  ;;  %v480_v50 = vsel %vm325_vm10, %v474_v37, %v475_v21  ;;  %v2592_v57 = vld [vmem:[#allocation3 + $0x4] sm:$0xf]  ;;  %v2509_v52 = vld [vmem:[#allocation3 + $0x238] sm:$0xf]  ;;  %v2222_v7 = vor.u32 %v2595_v46, %v2221_v1  ;;  %v2635_v22 = vld [vmem:[#allocation3 + $0x15c] sm:$0xf] }
 0x266   : > { %560 = vst [vmem:[#allocation3 + $0xb8] sm:$0xff] %v553_v23  ;;  %v481_v59 = vsel %vm478_vm13, %v3495_v35, %v480_v50  ;;  %1898 = vmatpush.bf16.msra.mxu0 %v2250_v28  ;;  %1924 = vmatpush.bf16.msra.mxu2 %v2254_v44  ;;  %v2226_v37 = vor.u32 %v2592_v57, %v2223_v6  ;;  %v2677_v17 = vld [vmem:[#allocation3 + $0x2ac] sm:$0xf]  ;;  %v1881_v63 = vsel %vm325_vm10, %v1771_v4, 0  ;;  %v2481_v44 = vld [vmem:[#allocation3 + $0x200] sm:$0xf] }
 0x267   : > { %525 = vst [vmem:[#allocation3 + $0x9c] sm:$0xff] %v518_v56  ;;  %v2666_v5 = vld [vmem:[#allocation3 + $0x250] sm:$0xf0]  ;;  %v3580_v35 = vpack.c.b16 %v1375_v60, %v1375_v60  ;;  %v2482_v50 = vor.u32 %v2659_v31, %v2481_v44  ;;  %v2402_v1 = vor.u32 %v2635_v22, %v2399_v34  ;;  %v2539_v57 = vld [vmem:[#allocation3 + $0x28c] sm:$0xf0] }
 0x268   : > { %489 = vst [vmem:[#allocation3 + $0x78] sm:$0xff] %v481_v59  ;;  %v2510_v18 = vor.u32 %v2666_v5, %v2509_v52  ;;  %v2628_v52 = vld [vmem:[#allocation3 + $0x124] sm:$0xf]  ;;  %v2603_v3 = vld [vmem:[#allocation3 + $0x58] sm:$0xf0] }
 0x269   : > { %v1210_v16 = vpop.permute.xlu0 %1209  ;;  %v437_v30 = vpop.permute.xlu2 %436  ;;  %v2621_v31 = vld [vmem:[#allocation3 + $0xec] sm:$0xf]  ;;  %v2511_v34 = vld [vmem:[#allocation3 + $0x254] sm:$0xf0]  ;;  %v2343_v44 = vld [vmem:[#allocation3 + $0x104] sm:$0xf0] }
 0x26a   : > { %1899 = vmatpush.bf16.msra.mxu0 %v2222_v7  ;;  %1925 = vmatpush.bf16.msra.mxu2 %v2226_v37  ;;  %v1214_v24 = vrot.slane %v1210_v16, 4  ;;  %1229 = vst.msk [vmem:[#allocation3 + $0x2d4] sm:$0xf] %vm350_vm6, %v1210_v16  ;;  %v441_v43 = vrot.slane %v437_v30, 4  ;;  %v3583_v19 = vpop.permute.xlu1 %926  ;;  %v2670_v37 = vld [vmem:[#allocation3 + $0x274] sm:$0xf] }
 0x26b   : > { %1962 = vmatpush.bf16.msrb.mxu3 %v2510_v18  ;;  %456 = vst.msk [vmem:[#allocation3 + $0x6c] sm:$0xf] %vm350_vm6, %v437_v30  ;;  %v932_v28 = vrot.slane %v3583_v19, 4  ;;  %v2257_v18 = vld [vmem:[#allocation3 + $0x40] sm:$0xf]  ;;  %v2542_v30 = vor.u32 %v2670_v37, %v2539_v57 }
 0x26c   : > { %v1220_v23 = vsel %vm325_vm10, %v1213_v0, %v1214_v24  ;;  %v447_v56 = vsel %vm325_vm10, %v440_v54, %v441_v43  ;;  %v2567_v0 = vld [vmem:[#allocation3 + $0x2c4] sm:$0xf0]  ;;  %v1674_v24 = vunpack.c.l.b16 %v3299_v10 }
 0x26d   : > { %v1221_v46 = vsel %vm1216_vm3, %v3272_v26, %v1220_v23  ;;  %v448_v6 = vsel %vm443_vm9, %v3491_v61, %v447_v56  ;;  %v937_v60 = vsel %vm325_vm10, %v931_v11, %v932_v28  ;;  %1926 = vmatmul.bf16.vlgmr.msra.gmra.mxu2 %v3580_v35  ;;  %1900 = vmatmul.bf16.vlgmr.msra.gmra.mxu0 %v3580_v35  ;;  %v2371_v26 = vld [vmem:[#allocation3 + $0x13c] sm:$0xf0]  ;;  %vm3738_vm3 = vmmov %vm3737_vm15 }
 0x26e   : > { %1970 = vmatpush.bf16.msrb.mxu0 %v2430_v27  ;;  %1985 = vmatpush.bf16.msrb.mxu2 %v1881_v63  ;;  %1228 = vst [vmem:[#allocation3 + $0x2cc] sm:$0xff] %v1221_v46  ;;  %v938_v54 = vsel %vm3737_vm15, %v3305_v9, %v937_v60  ;;  %v2570_v59 = vor.u32 %v2677_v17, %v2567_v0  ;;  %v2229_v46 = vld [vmem:[#allocation3 + $0x8] sm:$0xf] }
 0x26f   : > { %455 = vst [vmem:[#allocation3 + $0x64] sm:$0xff] %v448_v6  ;;  %1963 = vmatpush.bf16.msrb.mxu3 %v2482_v50  ;;  %v2285_v61 = vld [vmem:[#allocation3 + $0x78] sm:$0xf]  ;;  %v2374_v7 = vor.u32 %v2628_v52, %v2371_v26  ;;  %v2258_v63 = vor.u32 %v2603_v3, %v2257_v18  ;;  %v2596_v6 = vld [vmem:[#allocation3 + $0x20] sm:$0xf0] }
 0x270   : > { %947 = vst [vmem:[#allocation3 + $0x1e4] sm:$0xff] %v938_v54  ;;  %v2286_v11 = vor.u32 %v2610_v55, %v2285_v61  ;;  %v2315_v54 = vld [vmem:[#allocation3 + $0xcc] sm:$0xf0]  ;;  %v2639_v26 = vld [vmem:[#allocation3 + $0x178] sm:$0xf0]  ;;  %v2230_v61 = vor.u32 %v2596_v6, %v2229_v46 }
 0x271   : > { %v1105_v5 = vpop.permute.xlu0 %1104  ;;  %v965_v4 = vpop.permute.xlu2 %964  ;;  %v2607_v52 = vld [vmem:[#allocation3 + $0x7c] sm:$0xf]  ;;  %v2287_v18 = vld [vmem:[#allocation3 + $0x94] sm:$0xf0]  ;;  %v2405_v3 = vld [vmem:[#allocation3 + $0x160] sm:$0xf] }
 0x272   : > { %1971 = vmatpush.bf16.msrb.mxu0 %v2402_v1  ;;  %1986 = vmatpush.bf16.msrb.mxu2 %v2570_v59  ;;  %v1109_v9 = vrot.slane %v1105_v5, 4  ;;  %1124 = vst.msk [vmem:[#allocation3 + $0x280] sm:$0xf] %vm350_vm6, %v1105_v5  ;;  %v969_v16 = vrot.slane %v965_v4, 4  ;;  %v577_v27 = vpop.permute.xlu1 %576  ;;  %v2663_v1 = vld [vmem:[#allocation3 + $0x23c] sm:$0xf] }
 0x273   : > { %1949 = vmatpush.bf16.msrb.mxu1 %v2286_v11  ;;  %984 = vst.msk [vmem:[#allocation3 + $0x210] sm:$0xf] %vm350_vm6, %v965_v4  ;;  %v581_v22 = vrot.slane %v577_v27, 4  ;;  %v2514_v0 = vor.u32 %v2663_v1, %v2511_v34  ;;  %v2433_v59 = vld [vmem:[#allocation3 + $0x198] sm:$0xf] }
 0x274   : > { %v1115_v43 = vsel %vm325_vm10, %v1108_v49, %v1109_v9  ;;  %v975_v17 = vsel %vm325_vm10, %v968_v38, %v969_v16  ;;  %596 = vst.msk [vmem:[#allocation3 + $0xdc] sm:$0xf] %vm350_vm6, %v577_v27  ;;  %v2346_v49 = vor.u32 %v2621_v31, %v2343_v44  ;;  %v2646_v38 = vld [vmem:[#allocation3 + $0x1b0] sm:$0xf0]  ;;  %v2649_v46 = vld [vmem:[#allocation3 + $0x1cc] sm:$0xf] }
 0x275   : > { %v1116_v23 = vsel %vm1111_vm7, %v3334_v2, %v1115_v43  ;;  %v976_v56 = vsel %vm971_vm8, %v3434_v51, %v975_v17  ;;  %v587_v50 = vsel %vm325_vm10, %v580_v29, %v581_v22  ;;  %v2483_v2 = vld [vmem:[#allocation3 + $0x21c] sm:$0xf0]  ;;  %v2453_v51 = vld [vmem:[#allocation3 + $0x1c8] sm:$0xf]  ;;  %v1772_v29 = vpack.c.b16 %v1674_v24, %v1674_v24  ;;  %v2614_v11 = vld [vmem:[#allocation3 + $0xb4] sm:$0xf] }
 0x276   : > { %1972 = vmatpush.bf16.msrb.mxu0 %v2374_v7  ;;  %1987 = vmatpush.bf16.msrb.mxu2 %v2542_v30  ;;  %1123 = vst [vmem:[#allocation3 + $0x278] sm:$0xff] %v1116_v23  ;;  %v588_v60 = vsel %vm583_vm1, %v3461_v62, %v587_v50  ;;  %v2318_v62 = vor.u32 %v2614_v11, %v2315_v54  ;;  %v2656_v7 = vld [vmem:[#allocation3 + $0x204] sm:$0xf]  ;;  %v2681_v31 = vld [vmem:[#allocation3 + $0x2c8] sm:$0xf0]  ;;  %vm3739_vm7 = vmmov %vm3738_vm3  ;;  %v1675_v54 = vunpack.c.h.b16 %v3299_v10  ;;  %vm3740_vm8 = vcmask 359424  }
 0x277   : > { %1950 = vmatpush.bf16.msrb.mxu1 %v2258_v63  ;;  %983 = vst [vmem:[#allocation3 + $0x208] sm:$0xff] %v976_v56  ;;  %v2652_v57 = vld [vmem:[#allocation3 + $0x1e0] sm:$0xf0]  ;;  %v2434_v37 = vor.u32 %v2646_v38, %v2433_v59  ;;  %v2486_v30 = vor.u32 %v2656_v7, %v2483_v2  ;;  %v1884_v22 = vsel %vm325_vm10, %v1772_v29, 0  ;;  %v2290_v24 = vor.u32 %v2607_v52, %v2287_v18  ;;  %v2455_v43 = vld [vmem:[#allocation3 + $0x1e4] sm:$0xf0] }
 0x278   : > { %595 = vst [vmem:[#allocation3 + $0xd4] sm:$0xff] %v588_v60  ;;  %v2454_v55 = vor.u32 %v2652_v57, %v2453_v51  ;;  %v2406_v17 = vor.u32 %v2639_v26, %v2405_v3  ;;  %v2643_v56 = vld [vmem:[#allocation3 + $0x19c] sm:$0xf]  ;;  %v2435_v50 = vld [vmem:[#allocation3 + $0x1b4] sm:$0xf0]  ;;  %v2458_v6 = vor.u32 %v2649_v46, %v2455_v43 }
 0x279   : > { %v1035_v5 = vpop.permute.xlu0 %1034  ;;  %v929_v4 = vpop.permute.xlu2 %928  ;;  %v2632_v60 = vld [vmem:[#allocation3 + $0x140] sm:$0xf0]  ;;  %v2377_v2 = vld [vmem:[#allocation3 + $0x128] sm:$0xf]  ;;  %v2407_v59 = vld [vmem:[#allocation3 + $0x17c] sm:$0xf0] }
 0x27a   : > { %1973 = vmatpush.bf16.msrb.mxu0 %v2346_v49  ;;  %1988 = vmatpush.bf16.msrb.mxu2 %v2514_v0  ;;  %v1039_v9 = vrot.slane %v1035_v5, 4  ;;  %1054 = vst.msk [vmem:[#allocation3 + $0x248] sm:$0xf] %vm350_vm6, %v1035_v5  ;;  %v933_v16 = vrot.slane %v929_v4, 4  ;;  %v472_v27 = vpop.permute.xlu1 %471  ;;  %v2438_v0 = vor.u32 %v2643_v56, %v2435_v50  ;;  %v2636_v57 = vld [vmem:[#allocation3 + $0x164] sm:$0xf]  ;;  %v1773_v5 = vpack.c.b16 %v1675_v54, %v1675_v54 }
 0x27b   : > { %1951 = vmatpush.bf16.msrb.mxu1 %v2230_v61  ;;  %1964 = vmatpush.bf16.msrb.mxu3 %v2454_v55  ;;  %v476_v34 = vrot.slane %v472_v27, 4  ;;  %491 = vst.msk [vmem:[#allocation3 + $0x88] sm:$0xf] %vm350_vm6, %v472_v27  ;;  %v2231_v29 = vld [vmem:[#allocation3 + $0x24] sm:$0xf0]  ;;  %v2410_v10 = vor.u32 %v2636_v57, %v2407_v59 }
 0x27c   : > { %v1045_v63 = vsel %vm325_vm10, %v1038_v32, %v1039_v9  ;;  %v939_v44 = vsel %vm325_vm10, %v932_v28, %v933_v16  ;;  %v941_v23 = vsel %vm3738_vm3, %v929_v4, %v933_v16  ;;  %v2573_v28 = vld [vmem:[#allocation3 + $0x2b0] sm:$0xf]  ;;  %v2625_v7 = vld [vmem:[#allocation3 + $0x108] sm:$0xf0]  ;;  %v2678_v43 = vld [vmem:[#allocation3 + $0x2b4] sm:$0xf] }
 0x27d   : > { %v1046_v49 = vsel %vm1041_vm11, %v3432_v36, %v1045_v63  ;;  %v940_v1 = vsel %vm3739_vm7, %v3583_v19, %v939_v44  ;;  %949 = vst.msk [vmem:[#allocation3 + $0x1f4] sm:$0xf] %vm350_vm6, %v941_v23  ;;  %v482_v32 = vsel %vm325_vm10, %v475_v21, %v476_v34  ;;  %v2574_v38 = vor.u32 %v2681_v31, %v2573_v28  ;;  %v2259_v19 = vld [vmem:[#allocation3 + $0x5c] sm:$0xf0]  ;;  %v2600_v21 = vld [vmem:[#allocation3 + $0x44] sm:$0xf] }
 0x27e   : > { %1974 = vmatpush.bf16.msrb.mxu0 %v2318_v62  ;;  %1989 = vmatpush.bf16.msrb.mxu2 %v2486_v30  ;;  %1053 = vst [vmem:[#allocation3 + $0x240] sm:$0xff] %v1046_v49  ;;  %v483_v36 = vsel %vm478_vm13, %v3557_v53, %v482_v32  ;;  %v2262_v51 = vor.u32 %v2600_v21, %v2259_v19  ;;  %v2349_v11 = vld [vmem:[#allocation3 + $0xf0] sm:$0xf]  ;;  %v2593_v62 = vld [vmem:[#allocation3 + $0xc] sm:$0xf] }
 0x27f   : > { %1996 = vmatpush.bf16.msra.mxu3 %v2434_v37  ;;  %2011 = vmatpush.bf16.msra.mxu1 %v1884_v22  ;;  %948 = vst [vmem:[#allocation3 + $0x1ec] sm:$0xff] %v940_v1  ;;  %v2378_v53 = vor.u32 %v2632_v60, %v2377_v2  ;;  %v2379_v37 = vld [vmem:[#allocation3 + $0x144] sm:$0xf0]  ;;  %v2234_v9 = vor.u32 %v2593_v62, %v2231_v29  ;;  %v2629_v30 = vld [vmem:[#allocation3 + $0x12c] sm:$0xf]  ;;  %v1887_v22 = vsel %vm325_vm10, %v1773_v5, 0 }
 0x280   : > { %2585 = vmatmul.msk.bf16.vlgmr.msrb.gmra.mxu3 %vm1866_vm2, %v3531_v45  ;;  %1952 = vmatmul.bf16.vlgmr.msrb.gmra.mxu1 %v3580_v35  ;;  %490 = vst [vmem:[#allocation3 + $0x80] sm:$0xff] %v483_v36  ;;  %v2350_v16 = vor.u32 %v2625_v7, %v2349_v11  ;;  %v2618_v27 = vld [vmem:[#allocation3 + $0xd0] sm:$0xf0]  ;;  %v2382_v31 = vor.u32 %v2629_v30, %v2379_v37  ;;  %v2321_v34 = vld [vmem:[#allocation3 + $0xb8] sm:$0xf] }
 0x281   : > { %v1000_v26 = vpop.permute.xlu0 %999  ;;  %v2351_v63 = vld [vmem:[#allocation3 + $0x10c] sm:$0xf0]  ;;  %v2611_v50 = vld [vmem:[#allocation3 + $0x98] sm:$0xf0]  ;;  %v2323_v49 = vld [vmem:[#allocation3 + $0xd4] sm:$0xf0] }
 0x282   : > { %1975 = vmatpush.bf16.msrb.mxu0 %v2290_v24  ;;  %1990 = vmatpush.bf16.msrb.mxu2 %v2458_v6  ;;  %v1004_v61 = vrot.slane %v1000_v26, 4  ;;  %1019 = vst.msk [vmem:[#allocation3 + $0x22c] sm:$0xf] %vm350_vm6, %v1000_v26  ;;  %v1140_v55 = vpop.permute.xlu1 %1139  ;;  %v2622_v24 = vld [vmem:[#allocation3 + $0xf4] sm:$0xf] }
 0x283   : > { %1997 = vmatpush.bf16.msra.mxu3 %v2406_v17  ;;  %2012 = vmatpush.bf16.msra.mxu1 %v2574_v38  ;;  %v1144_v52 = vrot.slane %v1140_v55, 4  ;;  %1159 = vst.msk [vmem:[#allocation3 + $0x29c] sm:$0xf] %vm350_vm6, %v1140_v55  ;;  %v2354_v56 = vor.u32 %v2622_v24, %v2351_v63  ;;  %v1373_v1 = vld [vmem:[#allocation3 + $0x2f0] sm:$0xf] }
 0x284   : > { %v1010_v4 = vsel %vm325_vm10, %v1003_v48, %v1004_v61  ;;  %v2615_v28 = vld [vmem:[#allocation3 + $0xbc] sm:$0xf]  ;;  %v2545_v36 = vld [vmem:[#allocation3 + $0x278] sm:$0xf]  ;;  %v2604_v6 = vld [vmem:[#allocation3 + $0x60] sm:$0xf0]  ;;  %v1676_v59 = vunpack.c.l.b16 %v1373_v1 }
 0x285   : > { %2586 = vmatmul.msk.bf16.vlgmr.msrb.gmra.mxu2 %vm1866_vm2, %v3531_v45  ;;  %v1011_v18 = vsel %vm1006_vm14, %v3489_v58, %v1010_v4  ;;  %v1150_v3 = vsel %vm325_vm10, %v1143_v8, %v1144_v52  ;;  %v2575_v58 = vld [vmem:[#allocation3 + $0x2cc] sm:$0xf0]  ;;  %v2322_v8 = vor.u32 %v2618_v27, %v2321_v34  ;;  %v2671_v60 = vld [vmem:[#allocation3 + $0x27c] sm:$0xf]  ;;  %v2326_v21 = vor.u32 %v2615_v28, %v2323_v49  ;;  %v2265_v26 = vld [vmem:[#allocation3 + $0x48] sm:$0xf] }
 0x286   : > { %2022 = vmatpush.bf16.msra.mxu2 %v2438_v0  ;;  %1976 = vmatpush.bf16.msrb.mxu0 %v2262_v51  ;;  %1018 = vst [vmem:[#allocation3 + $0x224] sm:$0xff] %v1011_v18  ;;  %v1151_v48 = vsel %vm3740_vm8, %v3377_v15, %v1150_v3  ;;  %v2578_v44 = vor.u32 %v2678_v43, %v2575_v58  ;;  %v2295_v57 = vld [vmem:[#allocation3 + $0x9c] sm:$0xf0]  ;;  %v2597_v29 = vld [vmem:[#allocation3 + $0x28] sm:$0xf0] }
 0x287   : > { %1998 = vmatpush.bf16.msra.mxu3 %v2378_v53  ;;  %1158 = vst [vmem:[#allocation3 + $0x294] sm:$0xff] %v1151_v48  ;;  %v2293_v23 = vld [vmem:[#allocation3 + $0x80] sm:$0xf]  ;;  %v2608_v51 = vld [vmem:[#allocation3 + $0x84] sm:$0xf]  ;;  %v1774_v55 = vpack.c.b16 %v1676_v59, %v1676_v59 }
 0x288   : > { %v2294_v46 = vor.u32 %v2611_v50, %v2293_v23  ;;  %v2298_v61 = vor.u32 %v2608_v51, %v2295_v57  ;;  %v2237_v11 = vld [vmem:[#allocation3 + $0x10] sm:$0xf]  ;;  %v2267_v52 = vld [vmem:[#allocation3 + $0x64] sm:$0xf0]  ;;  %v2601_v62 = vld [vmem:[#allocation3 + $0x4c] sm:$0xf] }
 0x289   : > { %v2238_v4 = vor.u32 %v2597_v29, %v2237_v11  ;;  %v2517_v7 = vld [vmem:[#allocation3 + $0x240] sm:$0xf]  ;;  %v2664_v37 = vld [vmem:[#allocation3 + $0x244] sm:$0xf]  ;;  %v1890_v48 = vsel %vm325_vm10, %v1774_v55, 0 }
 0x28a   : > { %2023 = vmatpush.bf16.msra.mxu2 %v2410_v10  ;;  %1977 = vmatpush.bf16.msrb.mxu0 %v2234_v9  ;;  %v1070_v17 = vpop.permute.xlu1 %1069  ;;  %v2581_v27 = vld [vmem:[#allocation3 + $0x2b8] sm:$0xf]  ;;  %v2657_v63 = vld [vmem:[#allocation3 + $0x20c] sm:$0xf]  ;;  %v2647_v50 = vld [vmem:[#allocation3 + $0x1b8] sm:$0xf0] }
 0x28b   : > { %1999 = vmatpush.bf16.msra.mxu3 %v2350_v16  ;;  %v1074_v15 = vrot.slane %v1070_v17, 4  ;;  %1089 = vst.msk [vmem:[#allocation3 + $0x264] sm:$0xf] %vm350_vm6, %v1070_v17  ;;  %v2270_v16 = vor.u32 %v2601_v62, %v2267_v52  ;;  %v2661_v59 = vld [vmem:[#allocation3 + $0x228] sm:$0xf0] }
 0x28c   : > { %v2633_v51 = vld [vmem:[#allocation3 + $0x148] sm:$0xf0]  ;;  %v2626_v11 = vld [vmem:[#allocation3 + $0x110] sm:$0xf0]  ;;  %v2301_v62 = vld [vmem:[#allocation3 + $0x88] sm:$0xf] }
 0x28d   : > { %1978 = vmatmul.bf16.vlgmr.msrb.gmra.mxu0 %v3580_v35  ;;  %v1080_v32 = vsel %vm325_vm10, %v1073_v25, %v1074_v15  ;;  %v2266_v25 = vor.u32 %v2604_v6, %v2265_v26  ;;  %v2660_v58 = vld [vmem:[#allocation3 + $0x220] sm:$0xf0]  ;;  %v2491_v34 = vld [vmem:[#allocation3 + $0x224] sm:$0xf0]  ;;  %v2553_v15 = vld [vmem:[#allocation3 + $0x280] sm:$0xf] }
 0x28e   : > { %2037 = vmatpush.bf16.msra.mxu0 %v1887_v22  ;;  %2024 = vmatpush.bf16.msra.mxu2 %v2382_v31  ;;  %v1081_v38 = vsel %vm1076_vm4, %v3528_v39, %v1080_v32  ;;  %v2674_v19 = vld [vmem:[#allocation3 + $0x290] sm:$0xf0]  ;;  %v2547_v0 = vld [vmem:[#allocation3 + $0x294] sm:$0xf0]  ;;  %v2239_v22 = vld [vmem:[#allocation3 + $0x2c] sm:$0xf0]  ;;  %v2494_v23 = vor.u32 %v2657_v63, %v2491_v34 }
 0x28f   : > { %2000 = vmatpush.bf16.msra.mxu3 %v2322_v8  ;;  %1088 = vst [vmem:[#allocation3 + $0x25c] sm:$0xff] %v1081_v38  ;;  %v2546_v54 = vor.u32 %v2674_v19, %v2545_v36  ;;  %v2550_v2 = vor.u32 %v2671_v60, %v2547_v0  ;;  %v2682_v31 = vld [vmem:[#allocation3 + $0x2d0] sm:$0xf0]  ;;  %v2489_v8 = vld [vmem:[#allocation3 + $0x208] sm:$0xf]  ;;  %vm2123_vm4 = vcmask 15368  }
 0x290   : > { %v2582_v24 = vor.u32 %v2682_v31, %v2581_v27  ;;  %v2490_v17 = vor.u32 %v2660_v58, %v2489_v8  ;;  %v2441_v6 = vld [vmem:[#allocation3 + $0x1a0] sm:$0xf]  ;;  %v2525_v60 = vld [vmem:[#allocation3 + $0x248] sm:$0xf] }
 0x291   : > { %2013 = vmatpush.bf16.msra.mxu1 %v2546_v54  ;;  %v2442_v19 = vor.u32 %v2647_v50, %v2441_v6  ;;  %v2413_v0 = vld [vmem:[#allocation3 + $0x168] sm:$0xf]  ;;  %v2640_v54 = vld [vmem:[#allocation3 + $0x180] sm:$0xf0] }
 0x292   : > { %2038 = vmatpush.bf16.msra.mxu0 %v2578_v44  ;;  %2025 = vmatpush.bf16.msra.mxu2 %v2354_v56  ;;  %v893_v53 = vpop.permute.xlu1 %892  ;;  %v2675_v44 = vld [vmem:[#allocation3 + $0x298] sm:$0xf0]  ;;  %v2653_v56 = vld [vmem:[#allocation3 + $0x1e8] sm:$0xf0]  ;;  %v2668_v38 = vld [vmem:[#allocation3 + $0x260] sm:$0xf0]  ;;  %v2414_v26 = vor.u32 %v2640_v54, %v2413_v0 }
 0x293   : > { %2001 = vmatpush.bf16.msra.mxu3 %v2294_v46  ;;  %v897_v39 = vrot.slane %v893_v53, 4  ;;  %v2554_v49 = vor.u32 %v2675_v44, %v2553_v15  ;;  %v2463_v46 = vld [vmem:[#allocation3 + $0x1ec] sm:$0xf0] }
 0x295   : > { %v903_v10 = vsel %vm325_vm10, %v896_v47, %v897_v39  ;;  %v905_v5 = vsel %vm899_vm0, %v893_v53, %v897_v39  ;;  %v2385_v53 = vld [vmem:[#allocation3 + $0x130] sm:$0xf]  ;;  %v2654_v39 = vld [vmem:[#allocation3 + $0x1f0] sm:$0xf0]  ;;  %vm2098_vm10 = vcmask 7168  }
 0x296   : > { %2026 = vmatpush.bf16.msra.mxu2 %v2326_v21  ;;  %2039 = vmatpush.bf16.msra.mxu0 %v2550_v2  ;;  %v904_v18 = vsel %vm899_vm0, %v3523_v33, %v903_v10  ;;  %913 = vst.msk [vmem:[#allocation3 + $0x1d8] sm:$0xf] %vm350_vm6, %v905_v5  ;;  %v2667_v3 = vld [vmem:[#allocation3 + $0x258] sm:$0xf0]  ;;  %v2519_v9 = vld [vmem:[#allocation3 + $0x25c] sm:$0xf0]  ;;  %v2526_v21 = vor.u32 %v2668_v38, %v2525_v60 }
 0x297   : > { %2002 = vmatpush.bf16.msra.mxu3 %v2266_v25  ;;  %912 = vst [vmem:[#allocation3 + $0x1d0] sm:$0xff] %v904_v18  ;;  %v2518_v47 = vor.u32 %v2667_v3, %v2517_v7  ;;  %v2522_v30 = vor.u32 %v2664_v37, %v2519_v9  ;;  %v2594_v33 = vld [vmem:[#allocation3 + $0x14] sm:$0xf]  ;;  %v2497_v2 = vld [vmem:[#allocation3 + $0x210] sm:$0xf]  ;;  %v2386_v29 = vor.u32 %v2633_v51, %v2385_v53  ;;  %vm2080_vm6 = vcmask 80896  }
 0x298   : > { %v2242_v43 = vor.u32 %v2594_v33, %v2239_v22  ;;  %v2498_v25 = vor.u32 %v2661_v59, %v2497_v2  ;;  %v2619_v10 = vld [vmem:[#allocation3 + $0xd8] sm:$0xf0]  ;;  %v2329_v5 = vld [vmem:[#allocation3 + $0xc0] sm:$0xf]  ;;  %v2612_v7 = vld [vmem:[#allocation3 + $0xa0] sm:$0xf0] }
 0x299   : > { %2014 = vmatpush.bf16.msra.mxu1 %v2518_v47  ;;  %v2302_v37 = vor.u32 %v2612_v7, %v2301_v62  ;;  %v2605_v18 = vld [vmem:[#allocation3 + $0x68] sm:$0xf0]  ;;  %v2273_v3 = vld [vmem:[#allocation3 + $0x50] sm:$0xf] }
 0x29a   : > { %2027 = vmatpush.bf16.msra.mxu2 %v2298_v61  ;;  %2040 = vmatpush.bf16.msra.mxu0 %v2522_v30  ;;  %v2357_v61 = vld [vmem:[#allocation3 + $0xf8] sm:$0xf]  ;;  %v2274_v9 = vor.u32 %v2605_v18, %v2273_v3 }
 0x29b   : > { %2003 = vmatpush.bf16.msra.mxu3 %v2238_v4  ;;  %v2358_v52 = vor.u32 %v2626_v11, %v2357_v61  ;;  %v2330_v4 = vor.u32 %v2619_v10, %v2329_v5 }
 0x29d   : > { %2015 = vmatpush.bf16.msra.mxu1 %v2490_v17  ;;  %v2469_v57 = vld [vmem:[#allocation3 + $0x1d8] sm:$0xf] }
 0x29e   : > { %2028 = vmatpush.bf16.msra.mxu2 %v2270_v16  ;;  %2004 = vmatmul.bf16.vlgmr.msra.gmra.mxu3 %v3580_v35  ;;  %v2461_v1 = vld [vmem:[#allocation3 + $0x1d0] sm:$0xf]  ;;  %v2650_v32 = vld [vmem:[#allocation3 + $0x1d4] sm:$0xf]  ;;  %v2470_v55 = vor.u32 %v2654_v39, %v2469_v57 }
 0x29f   : > { %2063 = vmatpush.bf16.msrb.mxu3 %v1890_v48  ;;  %2041 = vmatpush.bf16.msra.mxu0 %v2494_v23  ;;  %v2462_v28 = vor.u32 %v2653_v56, %v2461_v1  ;;  %v2466_v36 = vor.u32 %v2650_v32, %v2463_v46  ;;  %v2598_v16 = vld [vmem:[#allocation3 + $0x30] sm:$0xf0]  ;;  %v2245_v48 = vld [vmem:[#allocation3 + $0x18] sm:$0xf] }
 0x2a0   : > { %v2246_v47 = vor.u32 %v2598_v16, %v2245_v48 }
 0x2a1   : > { %2016 = vmatpush.bf16.msra.mxu1 %v2462_v28 }
 0x2a2   : > { %2029 = vmatpush.bf16.msra.mxu2 %v2242_v43 }
 0x2a3   : > { %2064 = vmatpush.bf16.msrb.mxu3 %v2582_v24  ;;  %2042 = vmatpush.bf16.msra.mxu0 %v2466_v36 }
 0x2a4   : > { %2587 = vmatmul.msk.bf16.vlgmr.msra.gmra.mxu1 %vm1866_vm2, %v3531_v45 }
 0x2a5   : > { %2030 = vmatmul.bf16.vlgmr.msra.gmra.mxu2 %v3580_v35  ;;  %2048 = vmatpush.bf16.msrb.mxu1 %v2442_v19 }
 0x2a6   : > { %2588 = vmatmul.msk.bf16.vlgmr.msra.gmra.mxu0 %vm1866_vm2, %v3531_v45 }
 0x2a7   : > { %2065 = vmatpush.bf16.msrb.mxu3 %v2554_v49 }
 0x2a9   : > { %2049 = vmatpush.bf16.msrb.mxu1 %v2414_v26 }
 0x2ab   : > { %2066 = vmatpush.bf16.msrb.mxu3 %v2526_v21 }
 0x2ad   : > { %2050 = vmatpush.bf16.msrb.mxu1 %v2386_v29 }
 0x2af   : > { %2067 = vmatpush.bf16.msrb.mxu3 %v2498_v25 }
 0x2b1   : > { %2051 = vmatpush.bf16.msrb.mxu1 %v2358_v52 }
 0x2b3   : > { %2068 = vmatpush.bf16.msrb.mxu3 %v2470_v55 }
 0x2b5   : > { %2052 = vmatpush.bf16.msrb.mxu1 %v2330_v4 }
 0x2b6   : > { %2589 = vmatmul.msk.bf16.vlgmr.msrb.gmra.mxu3 %vm1866_vm2, %v3531_v45 }
 0x2b9   : > { %2053 = vmatpush.bf16.msrb.mxu1 %v2302_v37 }
 0x2bd   : > { %2054 = vmatpush.bf16.msrb.mxu1 %v2274_v9 }
 0x2c1   : > { %2055 = vmatpush.bf16.msrb.mxu1 %v2246_v47 }
 0x2c4   : > { %2056 = vmatmul.bf16.vlgmr.msrb.gmra.mxu1 %v3580_v35 }
 0x2d8   : > { %v1914_v30 = vpop.f32.mrf.mxu1 }
 0x2dd   : > { %v1940_v27 = vpop.f32.mrf.mxu3 }
 0x2e0   : > { %v1916_v45 = vpop.f32.mrf.mxu1 }
 0x2e5   : > { %v1942_v31 = vpop.f32.mrf.mxu3 }
 0x2ea   : > { %v1901_v22 = vpop.f32.mrf.mxu0 }
 0x2eb   : > { %v1915_v58 = vadd.f32 %v1914_v30, %v1901_v22 }
 0x2ed   : > { %2074 = vst [vmem:[%s3693_s12] sm:$0xff] %v1915_v58  ;;  %v2100_v34 = vmul.f32 %v1915_v58, %v1915_v58  ;;  %v2082_v35 = vmul.f32 %v1915_v58, %v2815_v14 }
 0x2ef   : > { %v2107_v43 = vmul.f32 %v2100_v34, %v2815_v14 }
 0x2f0   : > { %v1927_v33 = vpop.f32.mrf.mxu2 }
 0x2f1   : > { %v1941_v24 = vadd.f32 %v1940_v27, %v1927_v33 }
 0x2f2   : > { %v1903_v8 = vpop.f32.mrf.mxu0 }
 0x2f3   : > { %2075 = vst [vmem:[%s3693_s12 + $0x8] sm:$0xff] %v1941_v24  ;;  %v2083_v17 = vmul.f32 %v1941_v24, %v2817_v20  ;;  %v2101_v63 = vmul.f32 %v1941_v24, %v1941_v24 }
 0x2f5   : > { %v2089_v44 = vadd.f32 %v2083_v17, %v2082_v35  ;;  %v2108_v23 = vmul.f32 %v2101_v63, %v2817_v20 }
 0x2f7   : > { %v2114_v15 = vadd.f32 %v2108_v23, %v2107_v43 }
 0x2f8   : > { %v1929_v56 = vpop.f32.mrf.mxu2 }
 0x2fd   : > { %v1953_v50 = vpop.f32.mrf.mxu1 }
 0x303   : > { %v1966_v49 = vpop.f32.mrf.mxu3 }
 0x304   : > { %v1967_v1 = vadd.f32 %v1966_v49, %v1953_v50 }
 0x305   : > { %v1955_v32 = vpop.f32.mrf.mxu1 }
 0x306   : > { %2076 = vst [vmem:[%s3693_s12 + $0x10] sm:$0xff] %v1967_v1  ;;  %v2102_v25 = vmul.f32 %v1967_v1, %v1967_v1  ;;  %v2084_v57 = vmul.f32 %v1967_v1, %v2825_v41 }
 0x308   : > { %v1992_v28 = vpop.f32.mrf.mxu2  ;;  %v2109_v29 = vmul.f32 %v2102_v25, %v2825_v41  ;;  %v2090_v61 = vadd.f32 %v2089_v44, %v2084_v57 }
 0x30a   : > { %v1979_v46 = vpop.f32.mrf.mxu0  ;;  %v2115_v52 = vadd.f32 %v2114_v15, %v2109_v29 }
 0x30b   : > { %v1993_v14 = vadd.f32 %v1992_v28, %v1979_v46  ;;  %v1968_v36 = vpop.f32.mrf.mxu3 }
 0x30d   : > { %2077 = vst [vmem:[%s3693_s12 + $0x18] sm:$0xff] %v1993_v14  ;;  %v2103_v39 = vmul.f32 %v1993_v14, %v1993_v14  ;;  %v2085_v55 = vmul.f32 %v1993_v14, %v2827_v42 }
 0x30f   : > { %v2110_v10 = vmul.f32 %v2103_v39, %v2827_v42  ;;  %v2091_v62 = vadd.f32 %v2090_v61, %v2085_v55 }
 0x310   : > { %v1994_v38 = vpop.f32.mrf.mxu2 }
 0x311   : > { %v2116_v9 = vadd.f32 %v2115_v52, %v2110_v10 }
 0x312   : > { %v1981_v6 = vpop.f32.mrf.mxu0 }
 0x321   : > { %v2005_v19 = vpop.f32.mrf.mxu3  ;;  %v2018_v60 = vpop.f32.mrf.mxu1 }
 0x322   : > { %v2019_v0 = vadd.f32 %v2018_v60, %v2005_v19 }
 0x323   : > { %v2044_v20 = vpop.f32.mrf.mxu0 }
 0x324   : > { %2078 = vst [vmem:[%s3693_s12 + $0x20] sm:$0xff] %v2019_v0  ;;  %v2104_v11 = vmul.f32 %v2019_v0, %v2019_v0  ;;  %v2086_v5 = vmul.f32 %v2019_v0, %v2811_v12 }
 0x326   : > { %v2111_v7 = vmul.f32 %v2104_v11, %v2811_v12  ;;  %v2092_v41 = vadd.f32 %v2091_v62, %v2086_v5 }
 0x328   : > { %v2031_v21 = vpop.f32.mrf.mxu2  ;;  %v2117_v47 = vadd.f32 %v2116_v9, %v2111_v7 }
 0x329   : > { %v2045_v54 = vadd.f32 %v2044_v20, %v2031_v21  ;;  %v2007_v2 = vpop.f32.mrf.mxu3  ;;  %v2020_v59 = vpop.f32.mrf.mxu1 }
 0x32b   : > { %2079 = vst [vmem:[%s3693_s12 + $0x28] sm:$0xff] %v2045_v54  ;;  %v2046_v26 = vpop.f32.mrf.mxu0  ;;  %v2105_v37 = vmul.f32 %v2045_v54, %v2045_v54  ;;  %v2087_v18 = vmul.f32 %v2045_v54, %v2813_v13 }
 0x32d   : > { %v2112_v48 = vmul.f32 %v2105_v37, %v2813_v13  ;;  %v2093_v27 = vadd.f32 %v2092_v41, %v2087_v18 }
 0x32f   : > { %v2118_v22 = vadd.f32 %v2117_v47, %v2112_v48 }
 0x330   : > { %v2033_v51 = vpop.f32.mrf.mxu2 }
 0x339   : > { %v2070_v53 = vpop.f32.mrf.mxu3 }
 0x341   : > { %v2072_v4 = vpop.f32.mrf.mxu3  ;;  %v2057_v3 = vpop.f32.mrf.mxu1 }
 0x342   : > { %v2071_v16 = vadd.f32 %v2070_v53, %v2057_v3 }
 0x344   : > { %v2106_v30 = vmul.f32 %v2071_v16, %v2071_v16  ;;  %2081 = vst.msk [vmem:[%s3693_s12 + $0x30] sm:$0xff] %vm2080_vm6, %v2071_v16  ;;  %v2088_v42 = vmul.f32 %v2071_v16, %v2823_v40 }
 0x346   : > { %v2094_v45 = vsel %vm2080_vm6, %v2088_v42, 0.0  ;;  %v2113_v12 = vmul.f32 %v2106_v30, %v2823_v40 }
 0x347   : > { %v2095_v31 = vadd.f32 %v2094_v45, %v2093_v27 }
 0x348   : > { %v2119_v58 = vsel %vm2080_vm6, %v2113_v12, 0.0 }
 0x349   : > { %v2059_v34 = vpop.f32.mrf.mxu1  ;;  %2096 = vadd.xlane.f32.xlu0 %v2095_v31  ;;  %v2120_v33 = vadd.f32 %v2119_v58, %v2118_v22 }
 0x34b   : > { %2121 = vadd.xlane.f32.xlu1 %v2120_v33 }
 0x3bc   : > { %v2097_v13 = vpop.xlane.xlu0 %2096 }
 0x3bd   : > { %2099 = vst.msk [vmem:[%s235_s16] sm:$0xff] %vm2098_vm10, %v2097_v13 }
 0x3be   : > { %v2122_v35 = vpop.xlane.xlu1 %2121 }
 0x3bf   : > { %2124 = vst.msk [vmem:[%s235_s16] sm:$0xff] %vm2123_vm4, %v2122_v35 }
 0x3c0 PF: > { %s16_s18 = sadd.s32 1, %s2730_s18  }
 0x3c1   : > { %p13_p4 = scmp.ge.s32.totalorder %s16_s18, 4  }
 0x3c3   :  { %15 = sbr.rel (!%p13_p4) target bundleno = 1 (0x1), region = 78 }

</bundles_post_ra>
